<compile_context>
chip_gen: v5e
topology: v5e:2x2
jax: 0.10.0
libtpu: 0.0.40
codegen_flags: <defaults>
</compile_context>

<pallas_src>
import jax
import jax.numpy as jnp
from jax import lax
from jax.experimental import pallas as pl
from jax.experimental.pallas import tpu as pltpu


def _conv3x3_accumulate(acc_ref, x, w_ref):
    """3x3 'same' (zero padded) convolution of `x`; result left in acc_ref.

    acc_ref : (H, W, Cout) f32 VMEM scratch (fully overwritten).
    x       : (H, W, Cin)  f32 value already resident in VMEM/vregs.
    w_ref   : (3, 3*Cin, Cout) bf16 ref, packed so that
              w_ref[kx][ky*Cin:(ky+1)*Cin, :] == w_hwio[ky, kx]
              (row taps folded into the matmul K dimension).
    """
    H, W, Cin = x.shape
    Cout = acc_ref.shape[-1]

    # Fold the 3 row taps (ky) into K: ycat[i, j] = [x[i-1,j]; x[i,j]; x[i+1,j]]
    # with zero rows outside the image.  Row shifts are contiguous leading-dim
    # slices of a major-dim concat -- no relayout copies of the activation.
    zrow = jnp.zeros((1, W, Cin), x.dtype)
    xext = jnp.concatenate([zrow, x, zrow], axis=0)                  # (H+2, W, Cin)
    ycat = jnp.concatenate([xext[0:H], xext[1:H + 1], xext[2:H + 2]],
                           axis=-1)                                  # (H, W, 3*Cin)
    rows = ycat.astype(jnp.bfloat16).reshape(H * W, 3 * Cin)         # bf16 -> MXU

    # One MXU matmul per column tap (kx), f32 accumulation in VMEM scratch.
    # The centre tap initialises the accumulator (no zero-fill pass); the +-1
    # taps accumulate into a column-shifted window, realising zero padding
    # along W without a padded scratch buffer.
    acc_ref[...] = jnp.dot(
        rows, w_ref[1], preferred_element_type=jnp.float32).reshape(H, W, Cout)
    for b in (0, 2):                        # kernel column index, offset dx = b-1
        dx = b - 1
        contrib = jnp.dot(
            rows, w_ref[b], preferred_element_type=jnp.float32).reshape(H, W, Cout)
        src_lo, src_hi = max(0, dx), W + min(0, dx)
        dst_lo, dst_hi = src_lo - dx, src_hi - dx
        acc_ref[:, dst_lo:dst_hi, :] += contrib[:, src_lo:src_hi, :]


def _resnet_block_kernel(x_ref, w1_ref, s1_ref, b1_ref, w2_ref, s2_ref, b2_ref,
                         out_ref, acc_ref, h1_ref):
    # x_ref   : (H, W, Cin)      bf16, one batch element (N squeezed by BlockSpec)
    # w1_ref  : (3, 3*Cin, Cout) bf16 packed conv1 weights
    # s1/b1   : (1, 1, Cout)     f32 folded BN1 scale / shift (conv1 bias folded in)
    # w2_ref  : (3, 3*Cout, Cout) bf16 packed conv2 weights
    # s2/b2   : (1, 1, Cout)     f32 folded BN2 scale / shift (conv2 bias folded in)
    # out_ref : (H, W, Cout)     f32
    # acc_ref : (H, W, Cout)     f32 VMEM accumulator scratch
    # h1_ref  : (H, W, Cout)     f32 VMEM scratch for conv1 -> BN1 -> ReLU output
    x32 = x_ref[...].astype(jnp.float32)        # reused for the residual add

    # conv1 -> BN1 -> ReLU
    _conv3x3_accumulate(acc_ref, x32, w1_ref)
    h1_ref[...] = jnp.maximum(acc_ref[...] * s1_ref[...] + b1_ref[...], 0.0)

    # conv2 -> BN2 -> + identity -> ReLU   (all epilogue math in f32)
    _conv3x3_accumulate(acc_ref, h1_ref[...], w2_ref)
    y = acc_ref[...] * s2_ref[...] + b2_ref[...] + x32
    out_ref[...] = jnp.maximum(y, 0.0).astype(out_ref.dtype)


def resnet_block(x_nchw, params, eps=1e-5):
    """ResNetBlock forward (stride=1, identity_downsample=None). Input NCHW f32."""
    # ---- layout / dtype glue (plain JAX) ----
    x = jnp.transpose(x_nchw, (0, 2, 3, 1))                 # NCHW -> NHWC
    N, H, W, Cin = x.shape
    Cout = params["conv1_w"].shape[0]
    assert params["conv1_w"].shape[2:] == (3, 3)
    assert Cin == Cout, "residual add requires in_channels == out_channels"

    # Fold conv bias + BN running stats into per-channel scale/shift (f32).
    s1 = params["bn1_gamma"] / jnp.sqrt(params["bn1_var"] + eps)
    b1 = params["bn1_beta"] + (params["conv1_b"] - params["bn1_mean"]) * s1
    s2 = params["bn2_gamma"] / jnp.sqrt(params["bn2_var"] + eps)
    b2 = params["bn2_beta"] + (params["conv2_b"] - params["bn2_mean"]) * s2
    s1 = s1.reshape(1, 1, Cout).astype(jnp.float32)
    b1 = b1.reshape(1, 1, Cout).astype(jnp.float32)
    s2 = s2.reshape(1, 1, Cout).astype(jnp.float32)
    b2 = b2.reshape(1, 1, Cout).astype(jnp.float32)

    # Pack weights: OIHW (o, i, ky, kx) -> (kx, ky, i, o) -> (3, 3*Cin, Cout),
    # i.e. the 3 row taps stacked along the matmul K axis for each column tap.
    w1p = (jnp.transpose(params["conv1_w"], (3, 2, 1, 0))
           .reshape(3, 3 * Cin, Cout).astype(jnp.bfloat16))
    w2p = (jnp.transpose(params["conv2_w"], (3, 2, 1, 0))
           .reshape(3, 3 * Cout, Cout).astype(jnp.bfloat16))

    # bf16 activations halve HBM->VMEM DMA volume; accumulation stays f32.
    x_bf = x.astype(jnp.bfloat16)

    flops = int(2 * N * H * W * 9 * Cin * Cout           # conv1
                + 2 * N * H * W * 9 * Cout * Cout        # conv2
                + 8 * N * H * W * Cout)                  # BN / ReLU / residual
    bytes_accessed = int(N * H * W * Cin * 2             # x (bf16)
                         + N * H * W * Cout * 4          # out (f32)
                         + (w1p.size + w2p.size) * 2     # packed weights (bf16)
                         + 4 * Cout * 4)                 # scale / shift vectors

    const_map = lambda n: (0, 0, 0)
    out_nhwc = pl.pallas_call(
        _resnet_block_kernel,
        out_shape=jax.ShapeDtypeStruct((N, H, W, Cout), jnp.float32),
        grid=(N,),                                    # pipelined over the batch
        in_specs=[
            pl.BlockSpec((None, H, W, Cin), lambda n: (n, 0, 0, 0)),
            pl.BlockSpec((3, 3 * Cin, Cout), const_map),
            pl.BlockSpec((1, 1, Cout), const_map),
            pl.BlockSpec((1, 1, Cout), const_map),
            pl.BlockSpec((3, 3 * Cout, Cout), const_map),
            pl.BlockSpec((1, 1, Cout), const_map),
            pl.BlockSpec((1, 1, Cout), const_map),
        ],
        out_specs=pl.BlockSpec((None, H, W, Cout), lambda n: (n, 0, 0, 0)),
        scratch_shapes=[
            pltpu.VMEM((H, W, Cout), jnp.float32),    # conv accumulator
            pltpu.VMEM((H, W, Cout), jnp.float32),    # conv1 -> BN1 -> ReLU output
        ],
        compiler_params=pltpu.CompilerParams(
            dimension_semantics=("parallel",),        # v7x: both TCs split batch
            vmem_limit_bytes=32 * 1024 * 1024,
        ),
        cost_estimate=pl.CostEstimate(
            flops=flops, transcendentals=0, bytes_accessed=bytes_accessed),
    )(x_bf, w1p, s1, b1, w2p, s2, b2)

    return jnp.transpose(out_nhwc, (0, 3, 1, 2))             # NHWC -> NCHW


def _reference(x_nchw, params, eps=1e-5):
    """Pure-JAX reference (lax conv, f32) mirroring the PyTorch module."""
    def conv(x, w, b):
        y = lax.conv_general_dilated(
            x, w, window_strides=(1, 1), padding=((1, 1), (1, 1)),
            dimension_numbers=("NCHW", "OIHW", "NCHW"))
        return y + b[None, :, None, None]

    def bn(x, g, be, m, v):
        return (x - m[None, :, None, None]) / jnp.sqrt(v + eps)[None, :, None, None] \
               * g[None, :, None, None] + be[None, :, None, None]

    h = conv(x_nchw, params["conv1_w"], params["conv1_b"])
    h = jnp.maximum(bn(h, params["bn1_gamma"], params["bn1_beta"],
                       params["bn1_mean"], params["bn1_var"]), 0.0)
    h = conv(h, params["conv2_w"], params["conv2_b"])
    h = bn(h, params["bn2_gamma"], params["bn2_beta"],
           params["bn2_mean"], params["bn2_var"])
    return jnp.maximum(h + x_nchw, 0.0)


if __name__ == "__main__":
    key = jax.random.PRNGKey(0)
    N, C, Hs, Ws = 2, 4, 16, 16          # in_channels == out_channels == 4
    ks = jax.random.split(key, 12)

    params = {
        "conv1_w": 0.1 * jax.random.normal(ks[0], (C, C, 3, 3), jnp.float32),
        "conv1_b": 0.1 * jax.random.normal(ks[1], (C,), jnp.float32),
        "bn1_gamma": 1.0 + 0.1 * jax.random.normal(ks[2], (C,), jnp.float32),
        "bn1_beta": 0.1 * jax.random.normal(ks[3], (C,), jnp.float32),
        "bn1_mean": 0.1 * jax.random.normal(ks[4], (C,), jnp.float32),
        "bn1_var": jnp.abs(jax.random.normal(ks[5], (C,), jnp.float32)) + 0.5,
        "conv2_w": 0.1 * jax.random.normal(ks[6], (C, C, 3, 3), jnp.float32),
        "conv2_b": 0.1 * jax.random.normal(ks[7], (C,), jnp.float32),
        "bn2_gamma": 1.0 + 0.1 * jax.random.normal(ks[8], (C,), jnp.float32),
        "bn2_beta": 0.1 * jax.random.normal(ks[9], (C,), jnp.float32),
        "bn2_mean": 0.1 * jax.random.normal(ks[10], (C,), jnp.float32),
        "bn2_var": jnp.abs(jax.random.normal(ks[11], (C,), jnp.float32)) + 0.5,
    }

    x = jax.random.normal(key, (N, C, Hs, Ws), jnp.float32)

    out = jax.block_until_ready(resnet_block(x, params))
    ref = jax.block_until_ready(_reference(x, params))

    assert out.shape == (N, C, Hs, Ws)
    # bf16 matmul inputs with f32 accumulation (per the perf guidance) =>
    # compare against the pure-f32 reference with a bf16-appropriate tolerance.
    max_err = float(jnp.max(jnp.abs(out - ref)))
    assert jnp.allclose(out, ref, rtol=3e-2, atol=3e-2), f"max abs err {max_err}"
    print("KERNEL_OK")
</pallas_src>

<mosaic_0001>
module attributes {stable_mosaic.version = 11 : i64} {
  func.func @_resnet_block_kernel(%arg0: i32, %arg1: memref<1x16x16x4xbf16, #tpu.memory_space<vmem>>, %arg2: memref<3x12x4xbf16, #tpu.memory_space<vmem>>, %arg3: memref<1x1x4xf32, #tpu.memory_space<vmem>>, %arg4: memref<1x1x4xf32, #tpu.memory_space<vmem>>, %arg5: memref<3x12x4xbf16, #tpu.memory_space<vmem>>, %arg6: memref<1x1x4xf32, #tpu.memory_space<vmem>>, %arg7: memref<1x1x4xf32, #tpu.memory_space<vmem>>, %arg8: memref<1x16x16x4xf32, #tpu.memory_space<vmem>>, %arg9: memref<16x16x4xf32, #tpu.memory_space<vmem>>, %arg10: memref<16x16x4xf32, #tpu.memory_space<vmem>>) attributes {dimension_semantics = [#tpu.dimension_semantics<parallel>], iteration_bounds = array<i64: 2>, scalar_prefetch = 0 : i64, scratch_operands = 2 : i64, tpu.core_type = #tpu.core_type<tc>, window_params = [{transform_indices = @transform_0, window_bounds = array<i64: 1, 16, 16, 4>}, {pipeline_mode = #tpu.pipeline_mode<synchronous>, transform_indices = @transform_1, window_bounds = array<i64: 3, 12, 4>}, {pipeline_mode = #tpu.pipeline_mode<synchronous>, transform_indices = @transform_2, window_bounds = array<i64: 1, 1, 4>}, {pipeline_mode = #tpu.pipeline_mode<synchronous>, transform_indices = @transform_3, window_bounds = array<i64: 1, 1, 4>}, {pipeline_mode = #tpu.pipeline_mode<synchronous>, transform_indices = @transform_4, window_bounds = array<i64: 3, 12, 4>}, {pipeline_mode = #tpu.pipeline_mode<synchronous>, transform_indices = @transform_5, window_bounds = array<i64: 1, 1, 4>}, {pipeline_mode = #tpu.pipeline_mode<synchronous>, transform_indices = @transform_6, window_bounds = array<i64: 1, 1, 4>}, {transform_indices = @transform_7, window_bounds = array<i64: 1, 16, 16, 4>}]} {
    %c0 = arith.constant 0 : index
    %c0_0 = arith.constant 0 : index
    %c0_1 = arith.constant 0 : index
    %c0_2 = arith.constant 0 : index
    %0 = vector.load %arg1[%c0, %c0_0, %c0_1, %c0_2] : memref<1x16x16x4xbf16, #tpu.memory_space<vmem>>, vector<1x16x16x4xbf16>
    %1 = vector.shape_cast %0 : vector<1x16x16x4xbf16> to vector<16x16x4xbf16>
    %2 = arith.extf %1 : vector<16x16x4xbf16> to vector<16x16x4xf32>
    %cst = arith.constant 0.000000e+00 : f32
    %3 = vector.broadcast %cst : f32 to vector<1x16x4xf32>
    %4 = tpu.concatenate %3, %2, %3 in 0 : vector<1x16x4xf32>, vector<16x16x4xf32>, vector<1x16x4xf32> -> vector<18x16x4xf32>
    %5 = vector.extract_strided_slice %4 {offsets = [0, 0, 0], sizes = [16, 16, 4], strides = [1, 1, 1]} : vector<18x16x4xf32> to vector<16x16x4xf32>
    %6 = vector.extract_strided_slice %4 {offsets = [1, 0, 0], sizes = [16, 16, 4], strides = [1, 1, 1]} : vector<18x16x4xf32> to vector<16x16x4xf32>
    %7 = vector.extract_strided_slice %4 {offsets = [2, 0, 0], sizes = [16, 16, 4], strides = [1, 1, 1]} : vector<18x16x4xf32> to vector<16x16x4xf32>
    %8 = tpu.concatenate %5, %6, %7 in 2 : vector<16x16x4xf32>, vector<16x16x4xf32>, vector<16x16x4xf32> -> vector<16x16x12xf32>
    %9 = arith.truncf %8 : vector<16x16x12xf32> to vector<16x16x12xbf16>
    %10 = vector.shape_cast %9 : vector<16x16x12xbf16> to vector<256x12xbf16>
    %c1 = arith.constant 1 : index
    %c0_3 = arith.constant 0 : index
    %c0_4 = arith.constant 0 : index
    %11 = vector.load %arg2[%c1, %c0_3, %c0_4] : memref<3x12x4xbf16, #tpu.memory_space<vmem>>, vector<1x12x4xbf16>
    %12 = vector.shape_cast %11 : vector<1x12x4xbf16> to vector<12x4xbf16>
    %cst_5 = arith.constant dense<0.000000e+00> : vector<256x4xf32>
    %13 = tpu.matmul %10, %12, %cst_5 {dimension_numbers = #tpu.dot_dimension_numbers<[1], [0], [0], [1], [0, 0, 1, 1], [], []>} : vector<256x12xbf16>, vector<12x4xbf16>, vector<256x4xf32> -> vector<256x4xf32>
    %14 = vector.shape_cast %13 : vector<256x4xf32> to vector<16x16x4xf32>
    %c0_6 = arith.constant 0 : index
    %c0_7 = arith.constant 0 : index
    %c0_8 = arith.constant 0 : index
    %15 = vector.load %arg9[%c0_6, %c0_7, %c0_8] : memref<16x16x4xf32, #tpu.memory_space<vmem>>, vector<16x16x4xf32>
    tpu.vector_store %arg9[%c0_6, %c0_7, %c0_8], %14 {strides = array<i32>} : memref<16x16x4xf32, #tpu.memory_space<vmem>>, vector<16x16x4xf32>,
    %c0_9 = arith.constant 0 : index
    %c0_10 = arith.constant 0 : index
    %c0_11 = arith.constant 0 : index
    %16 = vector.load %arg2[%c0_9, %c0_10, %c0_11] : memref<3x12x4xbf16, #tpu.memory_space<vmem>>, vector<1x12x4xbf16>
    %17 = vector.shape_cast %16 : vector<1x12x4xbf16> to vector<12x4xbf16>
    %cst_12 = arith.constant dense<0.000000e+00> : vector<256x4xf32>
    %18 = tpu.matmul %10, %17, %cst_12 {dimension_numbers = #tpu.dot_dimension_numbers<[1], [0], [0], [1], [0, 0, 1, 1], [], []>} : vector<256x12xbf16>, vector<12x4xbf16>, vector<256x4xf32> -> vector<256x4xf32>
    %19 = vector.shape_cast %18 : vector<256x4xf32> to vector<16x16x4xf32>
    %c0_13 = arith.constant 0 : index
    %c1_14 = arith.constant 1 : index
    %c0_15 = arith.constant 0 : index
    %20 = vector.load %arg9[%c0_13, %c1_14, %c0_15] : memref<16x16x4xf32, #tpu.memory_space<vmem>>, vector<16x15x4xf32>
    %21 = vector.extract_strided_slice %19 {offsets = [0, 0, 0], sizes = [16, 15, 4], strides = [1, 1, 1]} : vector<16x16x4xf32> to vector<16x15x4xf32>
    %22 = arith.addf %20, %21 : vector<16x15x4xf32>
    %c0_16 = arith.constant 0 : index
    %c1_17 = arith.constant 1 : index
    %c0_18 = arith.constant 0 : index
    %23 = vector.load %arg9[%c0_16, %c1_17, %c0_18] : memref<16x16x4xf32, #tpu.memory_space<vmem>>, vector<16x15x4xf32>
    tpu.vector_store %arg9[%c0_16, %c1_17, %c0_18], %22 {strides = array<i32>} : memref<16x16x4xf32, #tpu.memory_space<vmem>>, vector<16x15x4xf32>,
    %c2 = arith.constant 2 : index
    %c0_19 = arith.constant 0 : index
    %c0_20 = arith.constant 0 : index
    %24 = vector.load %arg2[%c2, %c0_19, %c0_20] : memref<3x12x4xbf16, #tpu.memory_space<vmem>>, vector<1x12x4xbf16>
    %25 = vector.shape_cast %24 : vector<1x12x4xbf16> to vector<12x4xbf16>
    %cst_21 = arith.constant dense<0.000000e+00> : vector<256x4xf32>
    %26 = tpu.matmul %10, %25, %cst_21 {dimension_numbers = #tpu.dot_dimension_numbers<[1], [0], [0], [1], [0, 0, 1, 1], [], []>} : vector<256x12xbf16>, vector<12x4xbf16>, vector<256x4xf32> -> vector<256x4xf32>
    %27 = vector.shape_cast %26 : vector<256x4xf32> to vector<16x16x4xf32>
    %c0_22 = arith.constant 0 : index
    %c0_23 = arith.constant 0 : index
    %c0_24 = arith.constant 0 : index
    %28 = vector.load %arg9[%c0_22, %c0_23, %c0_24] : memref<16x16x4xf32, #tpu.memory_space<vmem>>, vector<16x15x4xf32>
    %29 = vector.extract_strided_slice %27 {offsets = [0, 1, 0], sizes = [16, 15, 4], strides = [1, 1, 1]} : vector<16x16x4xf32> to vector<16x15x4xf32>
    %30 = arith.addf %28, %29 : vector<16x15x4xf32>
    %c0_25 = arith.constant 0 : index
    %c0_26 = arith.constant 0 : index
    %c0_27 = arith.constant 0 : index
    %31 = vector.load %arg9[%c0_25, %c0_26, %c0_27] : memref<16x16x4xf32, #tpu.memory_space<vmem>>, vector<16x15x4xf32>
    tpu.vector_store %arg9[%c0_25, %c0_26, %c0_27], %30 {strides = array<i32>} : memref<16x16x4xf32, #tpu.memory_space<vmem>>, vector<16x15x4xf32>,
    %c0_28 = arith.constant 0 : index
    %c0_29 = arith.constant 0 : index
    %c0_30 = arith.constant 0 : index
    %32 = vector.load %arg9[%c0_28, %c0_29, %c0_30] : memref<16x16x4xf32, #tpu.memory_space<vmem>>, vector<16x16x4xf32>
    %c0_31 = arith.constant 0 : index
    %c0_32 = arith.constant 0 : index
    %c0_33 = arith.constant 0 : index
    %33 = vector.load %arg3[%c0_31, %c0_32, %c0_33] : memref<1x1x4xf32, #tpu.memory_space<vmem>>, vector<1x1x4xf32>
    %34 = vector.broadcast %33 : vector<1x1x4xf32> to vector<16x16x4xf32>
    %35 = arith.mulf %32, %34 : vector<16x16x4xf32>
    %c0_34 = arith.constant 0 : index
    %c0_35 = arith.constant 0 : index
    %c0_36 = arith.constant 0 : index
    %36 = vector.load %arg4[%c0_34, %c0_35, %c0_36] : memref<1x1x4xf32, #tpu.memory_space<vmem>>, vector<1x1x4xf32>
    %37 = vector.broadcast %36 : vector<1x1x4xf32> to vector<16x16x4xf32>
    %38 = arith.addf %35, %37 : vector<16x16x4xf32>
    %cst_37 = arith.constant 0.000000e+00 : f32
    %39 = vector.broadcast %cst_37 : f32 to vector<16x16x4xf32>
    %40 = arith.maximumf %38, %39 : vector<16x16x4xf32>
    %c0_38 = arith.constant 0 : index
    %c0_39 = arith.constant 0 : index
    %c0_40 = arith.constant 0 : index
    %41 = vector.load %arg10[%c0_38, %c0_39, %c0_40] : memref<16x16x4xf32, #tpu.memory_space<vmem>>, vector<16x16x4xf32>
    tpu.vector_store %arg10[%c0_38, %c0_39, %c0_40], %40 {strides = array<i32>} : memref<16x16x4xf32, #tpu.memory_space<vmem>>, vector<16x16x4xf32>,
    %c0_41 = arith.constant 0 : index
    %c0_42 = arith.constant 0 : index
    %c0_43 = arith.constant 0 : index
    %42 = vector.load %arg10[%c0_41, %c0_42, %c0_43] : memref<16x16x4xf32, #tpu.memory_space<vmem>>, vector<16x16x4xf32>
    %cst_44 = arith.constant 0.000000e+00 : f32
    %43 = vector.broadcast %cst_44 : f32 to vector<1x16x4xf32>
    %44 = tpu.concatenate %43, %42, %43 in 0 : vector<1x16x4xf32>, vector<16x16x4xf32>, vector<1x16x4xf32> -> vector<18x16x4xf32>
    %45 = vector.extract_strided_slice %44 {offsets = [0, 0, 0], sizes = [16, 16, 4], strides = [1, 1, 1]} : vector<18x16x4xf32> to vector<16x16x4xf32>
    %46 = vector.extract_strided_slice %44 {offsets = [1, 0, 0], sizes = [16, 16, 4], strides = [1, 1, 1]} : vector<18x16x4xf32> to vector<16x16x4xf32>
    %47 = vector.extract_strided_slice %44 {offsets = [2, 0, 0], sizes = [16, 16, 4], strides = [1, 1, 1]} : vector<18x16x4xf32> to vector<16x16x4xf32>
    %48 = tpu.concatenate %45, %46, %47 in 2 : vector<16x16x4xf32>, vector<16x16x4xf32>, vector<16x16x4xf32> -> vector<16x16x12xf32>
    %49 = arith.truncf %48 : vector<16x16x12xf32> to vector<16x16x12xbf16>
    %50 = vector.shape_cast %49 : vector<16x16x12xbf16> to vector<256x12xbf16>
    %c1_45 = arith.constant 1 : index
    %c0_46 = arith.constant 0 : index
    %c0_47 = arith.constant 0 : index
    %51 = vector.load %arg5[%c1_45, %c0_46, %c0_47] : memref<3x12x4xbf16, #tpu.memory_space<vmem>>, vector<1x12x4xbf16>
    %52 = vector.shape_cast %51 : vector<1x12x4xbf16> to vector<12x4xbf16>
    %cst_48 = arith.constant dense<0.000000e+00> : vector<256x4xf32>
    %53 = tpu.matmul %50, %52, %cst_48 {dimension_numbers = #tpu.dot_dimension_numbers<[1], [0], [0], [1], [0, 0, 1, 1], [], []>} : vector<256x12xbf16>, vector<12x4xbf16>, vector<256x4xf32> -> vector<256x4xf32>
    %54 = vector.shape_cast %53 : vector<256x4xf32> to vector<16x16x4xf32>
    %c0_49 = arith.constant 0 : index
    %c0_50 = arith.constant 0 : index
    %c0_51 = arith.constant 0 : index
    %55 = vector.load %arg9[%c0_49, %c0_50, %c0_51] : memref<16x16x4xf32, #tpu.memory_space<vmem>>, vector<16x16x4xf32>
    tpu.vector_store %arg9[%c0_49, %c0_50, %c0_51], %54 {strides = array<i32>} : memref<16x16x4xf32, #tpu.memory_space<vmem>>, vector<16x16x4xf32>,
    %c0_52 = arith.constant 0 : index
    %c0_53 = arith.constant 0 : index
    %c0_54 = arith.constant 0 : index
    %56 = vector.load %arg5[%c0_52, %c0_53, %c0_54] : memref<3x12x4xbf16, #tpu.memory_space<vmem>>, vector<1x12x4xbf16>
    %57 = vector.shape_cast %56 : vector<1x12x4xbf16> to vector<12x4xbf16>
    %cst_55 = arith.constant dense<0.000000e+00> : vector<256x4xf32>
    %58 = tpu.matmul %50, %57, %cst_55 {dimension_numbers = #tpu.dot_dimension_numbers<[1], [0], [0], [1], [0, 0, 1, 1], [], []>} : vector<256x12xbf16>, vector<12x4xbf16>, vector<256x4xf32> -> vector<256x4xf32>
    %59 = vector.shape_cast %58 : vector<256x4xf32> to vector<16x16x4xf32>
    %c0_56 = arith.constant 0 : index
    %c1_57 = arith.constant 1 : index
    %c0_58 = arith.constant 0 : index
    %60 = vector.load %arg9[%c0_56, %c1_57, %c0_58] : memref<16x16x4xf32, #tpu.memory_space<vmem>>, vector<16x15x4xf32>
    %61 = vector.extract_strided_slice %59 {offsets = [0, 0, 0], sizes = [16, 15, 4], strides = [1, 1, 1]} : vector<16x16x4xf32> to vector<16x15x4xf32>
    %62 = arith.addf %60, %61 : vector<16x15x4xf32>
    %c0_59 = arith.constant 0 : index
    %c1_60 = arith.constant 1 : index
    %c0_61 = arith.constant 0 : index
    %63 = vector.load %arg9[%c0_59, %c1_60, %c0_61] : memref<16x16x4xf32, #tpu.memory_space<vmem>>, vector<16x15x4xf32>
    tpu.vector_store %arg9[%c0_59, %c1_60, %c0_61], %62 {strides = array<i32>} : memref<16x16x4xf32, #tpu.memory_space<vmem>>, vector<16x15x4xf32>,
    %c2_62 = arith.constant 2 : index
    %c0_63 = arith.constant 0 : index
    %c0_64 = arith.constant 0 : index
    %64 = vector.load %arg5[%c2_62, %c0_63, %c0_64] : memref<3x12x4xbf16, #tpu.memory_space<vmem>>, vector<1x12x4xbf16>
    %65 = vector.shape_cast %64 : vector<1x12x4xbf16> to vector<12x4xbf16>
    %cst_65 = arith.constant dense<0.000000e+00> : vector<256x4xf32>
    %66 = tpu.matmul %50, %65, %cst_65 {dimension_numbers = #tpu.dot_dimension_numbers<[1], [0], [0], [1], [0, 0, 1, 1], [], []>} : vector<256x12xbf16>, vector<12x4xbf16>, vector<256x4xf32> -> vector<256x4xf32>
    %67 = vector.shape_cast %66 : vector<256x4xf32> to vector<16x16x4xf32>
    %c0_66 = arith.constant 0 : index
    %c0_67 = arith.constant 0 : index
    %c0_68 = arith.constant 0 : index
    %68 = vector.load %arg9[%c0_66, %c0_67, %c0_68] : memref<16x16x4xf32, #tpu.memory_space<vmem>>, vector<16x15x4xf32>
    %69 = vector.extract_strided_slice %67 {offsets = [0, 1, 0], sizes = [16, 15, 4], strides = [1, 1, 1]} : vector<16x16x4xf32> to vector<16x15x4xf32>
    %70 = arith.addf %68, %69 : vector<16x15x4xf32>
    %c0_69 = arith.constant 0 : index
    %c0_70 = arith.constant 0 : index
    %c0_71 = arith.constant 0 : index
    %71 = vector.load %arg9[%c0_69, %c0_70, %c0_71] : memref<16x16x4xf32, #tpu.memory_space<vmem>>, vector<16x15x4xf32>
    tpu.vector_store %arg9[%c0_69, %c0_70, %c0_71], %70 {strides = array<i32>} : memref<16x16x4xf32, #tpu.memory_space<vmem>>, vector<16x15x4xf32>,
    %c0_72 = arith.constant 0 : index
    %c0_73 = arith.constant 0 : index
    %c0_74 = arith.constant 0 : index
    %72 = vector.load %arg9[%c0_72, %c0_73, %c0_74] : memref<16x16x4xf32, #tpu.memory_space<vmem>>, vector<16x16x4xf32>
    %c0_75 = arith.constant 0 : index
    %c0_76 = arith.constant 0 : index
    %c0_77 = arith.constant 0 : index
    %73 = vector.load %arg6[%c0_75, %c0_76, %c0_77] : memref<1x1x4xf32, #tpu.memory_space<vmem>>, vector<1x1x4xf32>
    %74 = vector.broadcast %73 : vector<1x1x4xf32> to vector<16x16x4xf32>
    %75 = arith.mulf %72, %74 : vector<16x16x4xf32>
    %c0_78 = arith.constant 0 : index
    %c0_79 = arith.constant 0 : index
    %c0_80 = arith.constant 0 : index
    %76 = vector.load %arg7[%c0_78, %c0_79, %c0_80] : memref<1x1x4xf32, #tpu.memory_space<vmem>>, vector<1x1x4xf32>
    %77 = vector.broadcast %76 : vector<1x1x4xf32> to vector<16x16x4xf32>
    %78 = arith.addf %75, %77 : vector<16x16x4xf32>
    %79 = arith.addf %78, %2 : vector<16x16x4xf32>
    %cst_81 = arith.constant 0.000000e+00 : f32
    %80 = vector.broadcast %cst_81 : f32 to vector<16x16x4xf32>
    %81 = arith.maximumf %79, %80 : vector<16x16x4xf32>
    %c0_82 = arith.constant 0 : index
    %c0_83 = arith.constant 0 : index
    %c0_84 = arith.constant 0 : index
    %c0_85 = arith.constant 0 : index
    %82 = vector.load %arg8[%c0_82, %c0_83, %c0_84, %c0_85] : memref<1x16x16x4xf32, #tpu.memory_space<vmem>>, vector<1x16x16x4xf32>
    %83 = vector.shape_cast %82 : vector<1x16x16x4xf32> to vector<16x16x4xf32>
    %84 = vector.shape_cast %81 : vector<16x16x4xf32> to vector<1x16x16x4xf32>
    tpu.vector_store %arg8[%c0_82, %c0_83, %c0_84, %c0_85], %84 {strides = array<i32>} : memref<1x16x16x4xf32, #tpu.memory_space<vmem>>, vector<1x16x16x4xf32>,
    return
  }
  func.func @transform_0(%arg0: i32) -> (i32, i32, i32, i32) {
    %c0_i32 = arith.constant 0 : i32
    %c0_i32_0 = arith.constant 0 : i32
    %c0_i32_1 = arith.constant 0 : i32
    %c0_i32_2 = arith.constant 0 : i32
    return %arg0, %c0_i32, %c0_i32_0, %c0_i32_1 : i32, i32, i32, i32
  }
  func.func @transform_1(%arg0: i32) -> (i32, i32, i32) {
    %c0_i32 = arith.constant 0 : i32
    %c0_i32_0 = arith.constant 0 : i32
    %c0_i32_1 = arith.constant 0 : i32
    %c0_i32_2 = arith.constant 0 : i32
    return %c0_i32, %c0_i32_0, %c0_i32_1 : i32, i32, i32
  }
  func.func @transform_2(%arg0: i32) -> (i32, i32, i32) {
    %c0_i32 = arith.constant 0 : i32
    %c0_i32_0 = arith.constant 0 : i32
    %c0_i32_1 = arith.constant 0 : i32
    %c0_i32_2 = arith.constant 0 : i32
    return %c0_i32, %c0_i32_0, %c0_i32_1 : i32, i32, i32
  }
  func.func @transform_3(%arg0: i32) -> (i32, i32, i32) {
    %c0_i32 = arith.constant 0 : i32
    %c0_i32_0 = arith.constant 0 : i32
    %c0_i32_1 = arith.constant 0 : i32
    %c0_i32_2 = arith.constant 0 : i32
    return %c0_i32, %c0_i32_0, %c0_i32_1 : i32, i32, i32
  }
  func.func @transform_4(%arg0: i32) -> (i32, i32, i32) {
    %c0_i32 = arith.constant 0 : i32
    %c0_i32_0 = arith.constant 0 : i32
    %c0_i32_1 = arith.constant 0 : i32
    %c0_i32_2 = arith.constant 0 : i32
    return %c0_i32, %c0_i32_0, %c0_i32_1 : i32, i32, i32
  }
  func.func @transform_5(%arg0: i32) -> (i32, i32, i32) {
    %c0_i32 = arith.constant 0 : i32
    %c0_i32_0 = arith.constant 0 : i32
    %c0_i32_1 = arith.constant 0 : i32
    %c0_i32_2 = arith.constant 0 : i32
    return %c0_i32, %c0_i32_0, %c0_i32_1 : i32, i32, i32
  }
  func.func @transform_6(%arg0: i32) -> (i32, i32, i32) {
    %c0_i32 = arith.constant 0 : i32
    %c0_i32_0 = arith.constant 0 : i32
    %c0_i32_1 = arith.constant 0 : i32
    %c0_i32_2 = arith.constant 0 : i32
    return %c0_i32, %c0_i32_0, %c0_i32_1 : i32, i32, i32
  }
  func.func @transform_7(%arg0: i32) -> (i32, i32, i32, i32) {
    %c0_i32 = arith.constant 0 : i32
    %c0_i32_0 = arith.constant 0 : i32
    %c0_i32_1 = arith.constant 0 : i32
    %c0_i32_2 = arith.constant 0 : i32
    return %arg0, %c0_i32, %c0_i32_0, %c0_i32_1 : i32, i32, i32, i32
  }
}

</mosaic_0001>

<bundles_post_ra>
// kernel: tpu_custom_call.1
= control target key start
LH: loop header
LB: loop body
LE: loop exit
PB: predicated region body
PF: predicated region fallthrough
CT: control target
= control target key end

     0   :  { %s3571_s24 = smov 0   ;;  %s4867_s0 = inlined_call_operand.vmem [shape: bf16[2,16,16,4], index: 0, kind: input, shape index: {}]   ;;  %s4868_s1 = inlined_call_operand.vmem [shape: bf16[3,12,4], index: 1, kind: input, shape index: {}]   ;;  %s4869_s2 = inlined_call_operand.vmem [shape: f32[1,1,4], index: 2, kind: input, shape index: {}]   ;;  %s4870_s3 = inlined_call_operand.vmem [shape: f32[1,1,4], index: 3, kind: input, shape index: {}]   ;;  %s4871_s4 = inlined_call_operand.vmem [shape: bf16[3,12,4], index: 4, kind: input, shape index: {}]   ;;  %s4872_s5 = inlined_call_operand.vmem [shape: f32[1,1,4], index: 5, kind: input, shape index: {}]   ;;  %s4873_s6 = inlined_call_operand.vmem [shape: f32[1,1,4], index: 6, kind: input, shape index: {}]   ;;  %s4874_s7 = inlined_call_operand.vmem [shape: f32[2,16,16,4], index: 7, kind: output, shape index: {}]  }
   0x1 LB: > { %s2963_s25 = sadd.s32 4294967295, %s3526_s24   ;;  %p2967_p0 = scmp.ge.s32.totalorder %s3526_s24, 1  ;;  %s3526_s24 = sphi %s3571_s24, %s17_s24  }
   0x2   : > { %p237_p1 = scmp.lt.s32.totalorder %s3526_s24, 3 }
   0x4   : > { %p238_p2 = pnand %p2967_p0, %p237_p1 }
   0x6   : > { %241 = sbr.rel (%p238_p2) target bundleno = 1008 (0x3f0), region = 48 }
   0xb   : > { %p269_p3 = scmp.lt.s32.totalorder %s2963_s25, 1  ;;  %s3528_s30 = smov 4   ;;  %v3530_v36 = vmov 0.0   ;;  %v2976_v45 = vld [vmem:[%s4868_s1 + $0x8] sm:$0xf]  ;;  %vm801_vm0 = vcmask 1045504  }
   0xc   : > { %s3529_s8 = smov 8   ;;  %v3104_v46 = vld [vmem:[%s4868_s1 + $0x8] sm:$0x30]  ;;  %v2996_v48 = vld [vmem:[%s4868_s1] sm:$0xf]  ;;  %vm566_vm1 = vcmask 31744  }
   0xd   : > { %s4914_s25 = smov (!%p269_p3, %s2963_s25), 1  ;;  %v2977_v47 = vor.u32 %v3104_v46, %v2976_v45  ;;  %v3105_v49 = vld [vmem:[%s4868_s1] sm:$0x30]  ;;  %v3018_v53 = vld [vmem:[%s4868_s1 + $0x10] sm:$0xf]  ;;  %vm599_vm2 = vcmask 64512  }
   0xe   : > { %s3102_s26 = sshll.u32 %s4914_s25, 7  ;;  %v2997_v50 = vor.u32 %v3105_v49, %v2996_v48  ;;  %v3106_v54 = vld [vmem:[%s4868_s1 + $0x10] sm:$0x30]  ;;  %vm752_vm3 = vcmask 97280   ;;  %vm1090_vm4 = vcmask 30720   ;;  %vm1286_vm5 = vcmask 1046528  }
   0xf   : > { %s3585_s29 = scalar_lea.vmem %s4867_s0, %s3102_s26  ;;  %v803_v51 = vsel %vm801_vm0, %v2977_v47, 0  ;;  %v3019_v56 = vor.u32 %v3106_v54, %v3018_v53  ;;  %s3103_s26 = sshll.u32 %s4914_s25, 8 }
  0x10   : > { %v3181_v0 = vld [vmem:[%s3585_s29 + $0x40] sm:$0xff]   ;;  %v3182_v1 = vld [vmem:[%s3585_s29 + $0x48] sm:$0xff]   ;;  %v3183_v2 = vld [vmem:[%s3585_s29 + $0x50] sm:$0xff]   ;;  %3189 = vmatpush.bf16.msra.mxu2 %v803_v51  ;;  %v934_v52 = vsel %vm801_vm0, %v2997_v50, 0  ;;  %812 = vmatpush.bf16.msra.mxu0 %v803_v51 }
  0x11   : > { %v3590_v3 = vunpack.c.l.bf16 %v3181_v0  ;;  %v3592_v4 = vunpack.c.h.bf16 %v3181_v0  ;;  %v3594_v5 = vunpack.c.l.bf16 %v3182_v1  ;;  %v3596_v6 = vunpack.c.h.bf16 %v3182_v1  ;;  %v3184_v12 = vld [vmem:[%s3585_s29 + $0x58] sm:$0xff]   ;;  %v3185_v15 = vld [vmem:[%s3585_s29 + $0x60] sm:$0xff]   ;;  %v3186_v20 = vld [vmem:[%s3585_s29 + $0x68] sm:$0xff]   ;;  %3190 = vmatpush.bf16.msra.mxu3 %v934_v52  ;;  %943 = vmatpush.bf16.msra.mxu1 %v934_v52 }
  0x12   : > { %v3598_v7 = vunpack.c.l.bf16 %v3183_v2  ;;  %v3600_v8 = vunpack.c.h.bf16 %v3183_v2  ;;  %v3615_v13 = vunpack.c.l.bf16 %v3184_v12  ;;  %v3617_v14 = vunpack.c.h.bf16 %v3184_v12  ;;  %v3187_v23 = vld [vmem:[%s3585_s29 + $0x70] sm:$0xff]   ;;  %v3647_v27 = vld [vmem:[%s3585_s29 + $0x78] sm:$0xff]   ;;  %v3111_v32 = vld [vmem:[%s3585_s29] sm:$0xff]  }
  0x13   : > { %v3604_v9 = vpack.i.bf16 %v3592_v4, %v3590_v3  ;;  %v3212_v10 = vpack.i.bf16 %v3596_v6, %v3594_v5  ;;  %v3624_v17 = vunpack.c.l.bf16 %v3185_v15  ;;  %v3626_v18 = vunpack.c.h.bf16 %v3185_v15  ;;  %4899 = vst [vmem:[#allocation14_spill] sm:$0xff] %v3647_v27  ;;  %v3174_v37 = vld [vmem:[%s3585_s29 + $0x8] sm:$0xff]   ;;  %v3175_v40 = vld [vmem:[%s3585_s29 + $0x10] sm:$0xff]   ;;  %v3176_v55 = vld [vmem:[%s3585_s29 + $0x18] sm:$0xff]  }
  0x14   : > { %4889 = vst [vmem:[#allocation4_spill] sm:$0xff] %v3598_v7  ;;  %v3222_v11 = vpack.i.bf16 %v3600_v8, %v3598_v7  ;;  %v3227_v16 = vpack.i.bf16 %v3617_v14, %v3615_v13  ;;  %v3634_v21 = vunpack.c.l.bf16 %v3186_v20  ;;  %v3636_v22 = vunpack.c.h.bf16 %v3186_v20  ;;  %v3180_v62 = vld [vmem:[%s3585_s29 + $0x38] sm:$0xff]   ;;  %v3177_v48 = vld [vmem:[%s3585_s29 + $0x20] sm:$0xff]   ;;  %v3178_v49 = vld [vmem:[%s3585_s29 + $0x28] sm:$0xff]  }
  0x15   : > { %4890 = vst [vmem:[#allocation5_spill] sm:$0xff] %v3600_v8  ;;  %3203 = vrot.lane.b32.xlu0 %v3604_v9, %s3528_s30  ;;  %3213 = vrot.lane.b32.xlu1 %v3212_v10, %s3528_s30  ;;  %v3237_v19 = vpack.i.bf16 %v3626_v18, %v3624_v17  ;;  %v3640_v24 = vunpack.c.l.bf16 %v3187_v23  ;;  %v3642_v25 = vunpack.c.h.bf16 %v3187_v23  ;;  %v4876_v29 = vunpack.c.l.bf16 %v3647_v27 }
  0x16   : > { %3223 = vrot.lane.b32.xlu2 %v3222_v11, %s3528_s30  ;;  %4891 = vst [vmem:[#allocation6_spill] sm:$0xff] %v3615_v13  ;;  %v3247_v26 = vpack.i.bf16 %v3636_v22, %v3634_v21  ;;  %v4875_v30 = vunpack.c.h.bf16 %v3647_v27  ;;  %v3663_v33 = vunpack.c.l.bf16 %v3111_v32  ;;  %v3665_v34 = vunpack.c.h.bf16 %v3111_v32 }
  0x17   : > { %4892 = vst [vmem:[#allocation7_spill] sm:$0xff] %v3617_v14  ;;  %v3257_v28 = vpack.i.bf16 %v3642_v25, %v3640_v24  ;;  %v3672_v38 = vunpack.c.l.bf16 %v3174_v37  ;;  %v3674_v39 = vunpack.c.h.bf16 %v3174_v37  ;;  %v3677_v41 = vunpack.c.l.bf16 %v3175_v40 }
  0x18   : > { %4893 = vst [vmem:[#allocation8_spill] sm:$0xff] %v3624_v17  ;;  %v3267_v31 = vpack.i.bf16 %v4875_v30, %v4876_v29  ;;  %v3277_v35 = vpack.i.bf16 %v3665_v34, %v3663_v33  ;;  %v3679_v42 = vunpack.c.h.bf16 %v3175_v40  ;;  %v3710_v57 = vunpack.c.l.bf16 %v3176_v55 }
  0x19   : > { %4894 = vst [vmem:[#allocation9_spill] sm:$0xff] %v3626_v18  ;;  %v3287_v43 = vpack.i.bf16 %v3674_v39, %v3672_v38  ;;  %v3712_v58 = vunpack.c.h.bf16 %v3176_v55  ;;  %v1131_v59 = vsel %vm801_vm0, %v3019_v56, 0  ;;  %v3720_v2 = vunpack.c.l.bf16 %v3180_v62 }
  0x1a   : > { %4895 = vst [vmem:[#allocation10_spill] sm:$0xff] %v3634_v21  ;;  %v3292_v44 = vpack.i.bf16 %v3679_v42, %v3677_v41  ;;  %1140 = vmatpush.bf16.msrb.mxu2 %v1131_v59  ;;  %v3743_v51 = vunpack.c.l.bf16 %v3177_v48  ;;  %v3745_v52 = vunpack.c.h.bf16 %v3177_v48  ;;  %v3747_v53 = vunpack.c.l.bf16 %v3178_v49 }
  0x1b   : > { %4896 = vst [vmem:[#allocation11_spill] sm:$0xff] %v3636_v22  ;;  %v3302_v60 = vpack.i.bf16 %v3712_v58, %v3710_v57  ;;  %v3749_v54 = vunpack.c.h.bf16 %v3178_v49 }
  0x1c   : > { %4897 = vst [vmem:[#allocation12_spill] sm:$0xff] %v3640_v24  ;;  %v3317_v59 = vpack.i.bf16 %v3745_v52, %v3743_v51 }
  0x1d   : > { %3208 = vrot.lane.b32.xlu0 %v3212_v10, %s3529_s8  ;;  %3218 = vrot.lane.b32.xlu1 %v3222_v11, %s3529_s8  ;;  %4898 = vst [vmem:[#allocation13_spill] sm:$0xff] %v3642_v25  ;;  %v3722_v10 = vunpack.c.h.bf16 %v3180_v62 }
  0x1e   : > { %3228 = vrot.lane.b32.xlu2 %v3227_v16, %s3529_s8 }
  0x25   : > { %3233 = vrot.lane.b32.xlu0 %v3227_v16, %s3528_s30  ;;  %3238 = vrot.lane.b32.xlu1 %v3237_v19, %s3529_s8 }
  0x26   : > { %3243 = vrot.lane.b32.xlu2 %v3237_v19, %s3528_s30 }
  0x2d   : > { %3248 = vrot.lane.b32.xlu0 %v3247_v26, %s3529_s8  ;;  %3253 = vrot.lane.b32.xlu1 %v3247_v26, %s3528_s30 }
  0x2e   : > { %3258 = vrot.lane.b32.xlu2 %v3257_v28, %s3529_s8 }
  0x35   : > { %3268 = vrot.lane.b32.xlu1 %v3267_v31, %s3529_s8  ;;  %3263 = vrot.lane.b32.xlu0 %v3257_v28, %s3528_s30 }
  0x36   : > { %3273 = vrot.lane.b32.xlu2 %v3267_v31, %s3528_s30 }
  0x3d   : > { %3278 = vrot.lane.b32.xlu1 %v3277_v35, %s3528_s30  ;;  %533 = vrot.lane.b32.xlu0 %v3530_v36, %s3529_s8 }
  0x3e   : > { %3283 = vrot.lane.b32.xlu2 %v3287_v43, %s3529_s8 }
  0x45   : > { %3288 = vrot.lane.b32.xlu0 %v3287_v43, %s3528_s30  ;;  %3293 = vrot.lane.b32.xlu1 %v3292_v44, %s3529_s8 }
  0x46   : > { %3298 = vrot.lane.b32.xlu2 %v3292_v44, %s3528_s30 }
  0x4d   : > { %3303 = vrot.lane.b32.xlu0 %v3302_v60, %s3529_s8  ;;  %3308 = vrot.lane.b32.xlu1 %v3302_v60, %s3528_s30  ;;  %v3757_v60 = vpack.i.bf16 %v3749_v54, %v3747_v53 }
  0x4e   : > { %3313 = vrot.lane.b32.xlu2 %v3317_v59, %s3529_s8 }
  0x55   : > { %3318 = vrot.lane.b32.xlu0 %v3317_v59, %s3528_s30  ;;  %3323 = vrot.lane.b32.xlu1 %v3757_v60, %s3529_s8 }
  0x56   : > { %3328 = vrot.lane.b32.xlu2 %v3757_v60, %s3528_s30 }
  0x70   : > { %v3224_v50 = vpop.permute.xlu2 %3223 }
  0x87   : > { %v3204_v61 = vpop.permute.xlu0 %3203  ;;  %v3214_v63 = vpop.permute.xlu1 %3213 }
  0x88   : > { %v3206_v0 = vunpack.i.h.bf16 %v3204_v61  ;;  %v3205_v1 = vunpack.i.l.bf16 %v3204_v61  ;;  %v3216_v31 = vunpack.i.h.bf16 %v3214_v63  ;;  %v3215_v32 = vunpack.i.l.bf16 %v3214_v63 }
  0x8a   : > { %v583_v16 = vsel %vm566_vm1, %v3720_v2, %v3205_v1  ;;  %v584_v19 = vsel %vm566_vm1, %v3722_v10, %v3206_v0  ;;  %v585_v46 = vsel %vm566_vm1, %v3590_v3, %v3215_v32  ;;  %v586_v47 = vsel %vm566_vm1, %v3592_v4, %v3216_v31 }
  0x8b   : > { %v3226_v0 = vunpack.i.h.bf16 %v3224_v50  ;;  %v3225_v1 = vunpack.i.l.bf16 %v3224_v50 }
  0x8f   : > { %v3209_v11 = vpop.permute.xlu0 %3208  ;;  %v3219_v35 = vpop.permute.xlu1 %3218 }
  0x90   : > { %v3211_v12 = vunpack.i.h.bf16 %v3209_v11  ;;  %v3210_v15 = vunpack.i.l.bf16 %v3209_v11  ;;  %v3221_v43 = vunpack.i.h.bf16 %v3219_v35  ;;  %v3220_v45 = vunpack.i.l.bf16 %v3219_v35  ;;  %v3229_v11 = vpop.permute.xlu2 %3228 }
  0x92   : > { %v616_v20 = vsel %vm599_vm2, %v583_v16, %v3210_v15  ;;  %v617_v23 = vsel %vm599_vm2, %v584_v19, %v3211_v12  ;;  %v618_v55 = vsel %vm599_vm2, %v585_v46, %v3220_v45  ;;  %v619_v56 = vsel %vm599_vm2, %v586_v47, %v3221_v43 }
  0x93   : > { %v648_v26 = vpack.c.bf16 %v616_v20, %v616_v20  ;;  %v649_v28 = vpack.c.bf16 %v617_v23, %v617_v23  ;;  %v650_v44 = vpack.c.bf16 %v618_v55, %v618_v55  ;;  %v651_v61 = vpack.c.bf16 %v619_v56, %v619_v56  ;;  %v3179_v23 = vld [vmem:[%s3585_s29 + $0x30] sm:$0xff]   ;;  %s4501_s29 = scalar_lea.vmem %s4874_s7, %s3103_s26 }
  0x94   : > { %v3231_v15 = vunpack.i.h.bf16 %v3229_v11  ;;  %v3230_v16 = vunpack.i.l.bf16 %v3229_v11  ;;  %v587_v19 = vsel %vm566_vm1, %v3594_v5, %v3225_v1  ;;  %v588_v20 = vsel %vm566_vm1, %v3596_v6, %v3226_v0 }
  0x95   : > { %v715_v36 = vunpack.c.l.b16 %v648_v26  ;;  %v716_v37 = vunpack.c.l.b16 %v649_v28  ;;  %v717_v62 = vunpack.c.l.b16 %v650_v44  ;;  %v718_v63 = vunpack.c.l.b16 %v651_v61 }
  0x96   : > { %v3774_v26 = vunpack.c.l.bf16 %v3179_v23  ;;  %v3776_v28 = vunpack.c.h.bf16 %v3179_v23  ;;  %v620_v31 = vsel %vm599_vm2, %v587_v19, %v3230_v16  ;;  %v621_v32 = vsel %vm599_vm2, %v588_v20, %v3231_v15 }
  0x97   : > { %v3730_v40 = vpack.c.b16 %v716_v37, %v715_v36  ;;  %v3762_v12 = vpack.c.b16 %v718_v63, %v717_v62  ;;  %v652_v36 = vpack.c.bf16 %v620_v31, %v620_v31  ;;  %v653_v37 = vpack.c.bf16 %v621_v32, %v621_v32  ;;  %v3234_v43 = vpop.permute.xlu0 %3233  ;;  %v3239_v49 = vpop.permute.xlu1 %3238 }
  0x98   : > { %v3332_v35 = vpack.i.bf16 %v3776_v28, %v3774_v26  ;;  %v3236_v47 = vunpack.i.h.bf16 %v3234_v43  ;;  %v3235_v48 = vunpack.i.l.bf16 %v3234_v43  ;;  %v3241_v50 = vunpack.i.h.bf16 %v3239_v49  ;;  %v3244_v63 = vpop.permute.xlu2 %3243 }
  0x99   : > { %2986 = vmatmul.msk.bf16.vlgmr.msra.gmra.mxu2 %vm752_vm3, %v3730_v40  ;;  %3006 = vmatmul.msk.bf16.vlgmr.msra.gmra.mxu3 %vm752_vm3, %v3730_v40  ;;  %v719_v45 = vunpack.c.l.b16 %v652_v36  ;;  %v720_v46 = vunpack.c.l.b16 %v653_v37  ;;  %v3240_v55 = vunpack.i.l.bf16 %v3239_v49  ;;  %v3246_v19 = vunpack.i.h.bf16 %v3244_v63 }
  0x9a   : > { %3333 = vrot.lane.b32.xlu0 %v3332_v35, %s3529_s8  ;;  %v590_v59 = vsel %vm566_vm1, %v3600_v8, %v3236_v47  ;;  %v589_v44 = vsel %vm566_vm1, %v3598_v7, %v3235_v48  ;;  %3338 = vrot.lane.b32.xlu1 %v3332_v35, %s3528_s30  ;;  %v3245_v20 = vunpack.i.l.bf16 %v3244_v63 }
  0x9b   : > { %v3783_v56 = vpack.c.b16 %v720_v46, %v719_v45  ;;  %v622_v61 = vsel %vm599_vm2, %v589_v44, %v3240_v55  ;;  %v623_v62 = vsel %vm599_vm2, %v590_v59, %v3241_v50  ;;  %v592_v43 = vsel %vm566_vm1, %v3617_v14, %v3246_v19 }
  0x9c   : > { %v654_v0 = vpack.c.bf16 %v622_v61, %v622_v61  ;;  %v655_v1 = vpack.c.bf16 %v623_v62, %v623_v62  ;;  %v591_v35 = vsel %vm566_vm1, %v3615_v13, %v3245_v20  ;;  %v3347_v46 = vpack.i.bf16 %v3722_v10, %v3720_v2 }
  0x9e   : > { %v721_v11 = vunpack.c.l.b16 %v654_v0  ;;  %v722_v15 = vunpack.c.l.b16 %v655_v1  ;;  %3343 = vrot.lane.b32.xlu2 %v3347_v46, %s3529_s8 }
  0x9f   : > { %v3254_v16 = vpop.permute.xlu1 %3253  ;;  %v3249_v23 = vpop.permute.xlu0 %3248 }
  0xa0   : > { %v3259_v31 = vpop.permute.xlu2 %3258  ;;  %v3796_v32 = vpack.c.b16 %v722_v15, %v721_v11  ;;  %v3251_v36 = vunpack.i.h.bf16 %v3249_v23  ;;  %v3250_v37 = vunpack.i.l.bf16 %v3249_v23  ;;  %v3256_v0 = vunpack.i.h.bf16 %v3254_v16 }
  0xa1   : > { %v3255_v1 = vunpack.i.l.bf16 %v3254_v16 }
  0xa2   : > { %v625_v47 = vsel %vm599_vm2, %v592_v43, %v3251_v36  ;;  %v624_v48 = vsel %vm599_vm2, %v591_v35, %v3250_v37  ;;  %3348 = vrot.lane.b32.xlu0 %v3347_v46, %s3528_s30  ;;  %3353 = vrot.lane.b32.xlu1 %v3604_v9, %s3529_s8  ;;  %v3261_v36 = vunpack.i.h.bf16 %v3259_v31  ;;  %v3260_v37 = vunpack.i.l.bf16 %v3259_v31 }
  0xa3   : > { %v656_v50 = vpack.c.bf16 %v624_v48, %v624_v48  ;;  %v657_v55 = vpack.c.bf16 %v625_v47, %v625_v47  ;;  %v594_v43 = vsel %vm566_vm1, %v3626_v18, %v3256_v0  ;;  %v593_v35 = vsel %vm566_vm1, %v3624_v17, %v3255_v1 }
  0xa4   : > { %v626_v31 = vsel %vm599_vm2, %v593_v35, %v3260_v37 }
  0xa5   : > { %v723_v59 = vunpack.c.l.b16 %v656_v50  ;;  %v724_v44 = vunpack.c.l.b16 %v657_v55  ;;  %v627_v55 = vsel %vm599_vm2, %v594_v43, %v3261_v36 }
  0xa6   : > { %v659_v0 = vpack.c.bf16 %v627_v55, %v627_v55 }
  0xa7   : > { %v3806_v45 = vpop.permute.xlu1 %3268  ;;  %v3264_v11 = vpop.permute.xlu0 %3263  ;;  %v3821_v20 = vpack.c.b16 %v724_v44, %v723_v59 }
  0xa8   : > { %v3817_v49 = vpop.permute.xlu2 %3273 }
  0xa9   : > { %2987 = vmatmul.msk.bf16.gmra.mxu2 %vm752_vm3, %v3762_v12  ;;  %3007 = vmatmul.msk.bf16.gmra.mxu3 %vm752_vm3, %v3762_v12 }
  0xaf   : > { %v3279_v61 = vpop.permute.xlu1 %3278 }
  0xb0   : > { %v3281_v62 = vunpack.i.h.bf16 %v3279_v61  ;;  %v3280_v63 = vunpack.i.l.bf16 %v3279_v61  ;;  %v3284_v19 = vpop.permute.xlu2 %3283  ;;  %v3836_v61 = vpop.permute.xlu0 %533 }
  0xb1   : > { %v3286_v9 = vunpack.i.h.bf16 %v3284_v19  ;;  %v3285_v23 = vunpack.i.l.bf16 %v3284_v19  ;;  %v3265_v19 = vunpack.i.l.bf16 %v3264_v11 }
  0xb2   : > { %v568_v15 = vsel %vm566_vm1, 0.0, %v3281_v62  ;;  %v567_v60 = vsel %vm566_vm1, 0.0, %v3280_v63  ;;  %v658_v63 = vpack.c.bf16 %v626_v31, %v626_v31 }
  0xb3   : > { %v600_v16 = vsel %vm599_vm2, %v567_v60, %v3285_v23  ;;  %v601_v47 = vsel %vm599_vm2, %v568_v15, %v3286_v9  ;;  %v726_v15 = vunpack.c.l.b16 %v659_v0  ;;  %v3266_v60 = vunpack.i.h.bf16 %v3264_v11 }
  0xb4   : > { %v632_v48 = vpack.c.bf16 %v600_v16, %v600_v16  ;;  %v633_v50 = vpack.c.bf16 %v601_v47, %v601_v47  ;;  %v725_v1 = vunpack.c.l.b16 %v658_v63  ;;  %v3271_v16 = vunpack.i.h.bf16 %v3806_v45 }
  0xb5   : > { %v3270_v47 = vunpack.i.l.bf16 %v3806_v45  ;;  %v596_v11 = vsel %vm566_vm1, %v3636_v22, %v3266_v60  ;;  %v595_v31 = vsel %vm566_vm1, %v3634_v21, %v3265_v19 }
  0xb6   : > { %v699_v59 = vunpack.c.l.b16 %v632_v48  ;;  %v700_v44 = vunpack.c.l.b16 %v633_v50  ;;  %v3844_v37 = vpack.c.b16 %v726_v15, %v725_v1  ;;  %v629_v0 = vsel %vm599_vm2, %v596_v11, %v3271_v16 }
  0xb7   : > { %v3294_v36 = vpop.permute.xlu1 %3293  ;;  %v628_v45 = vsel %vm599_vm2, %v595_v31, %v3270_v47 }
  0xb8   : > { %v3838_v62 = vpack.c.b16 %v700_v44, %v699_v59  ;;  %v3289_v9 = vpop.permute.xlu0 %3288  ;;  %v3296_v43 = vunpack.i.h.bf16 %v3294_v36  ;;  %v3295_v35 = vunpack.i.l.bf16 %v3294_v36  ;;  %v660_v19 = vpack.c.bf16 %v628_v45, %v628_v45  ;;  %v3299_v16 = vpop.permute.xlu2 %3298 }
  0xb9   : > { %2988 = vmatmul.msk.bf16.gmra.mxu2 %vm752_vm3, %v3783_v56  ;;  %3008 = vmatmul.msk.bf16.gmra.mxu3 %vm752_vm3, %v3783_v56  ;;  %v3291_v46 = vunpack.i.h.bf16 %v3289_v9  ;;  %v3290_v23 = vunpack.i.l.bf16 %v3289_v9  ;;  %v661_v9 = vpack.c.bf16 %v629_v0, %v629_v0  ;;  %v3301_v11 = vunpack.i.h.bf16 %v3299_v16 }
  0xba   : > { %2978 = vmatmul.msk.bf16.vlgmr.msra.gmra.mxu0 %vm752_vm3, %v3838_v62  ;;  %2998 = vmatmul.msk.bf16.vlgmr.msra.gmra.mxu1 %vm752_vm3, %v3838_v62  ;;  %v3300_v31 = vunpack.i.l.bf16 %v3299_v16 }
  0xbb   : > { %v569_v48 = vsel %vm566_vm1, %v3663_v33, %v3290_v23  ;;  %v570_v50 = vsel %vm566_vm1, %v3665_v34, %v3291_v46  ;;  %v727_v46 = vunpack.c.l.b16 %v660_v19  ;;  %v728_v23 = vunpack.c.l.b16 %v661_v9 }
  0xbc   : > { %v603_v55 = vsel %vm599_vm2, %v570_v50, %v3296_v43  ;;  %v602_v59 = vsel %vm599_vm2, %v569_v48, %v3295_v35  ;;  %v3276_v43 = vunpack.i.h.bf16 %v3817_v49  ;;  %v3275_v35 = vunpack.i.l.bf16 %v3817_v49 }
  0xbd   : > { %v634_v44 = vpack.c.bf16 %v602_v59, %v602_v59  ;;  %v635_v63 = vpack.c.bf16 %v603_v55, %v603_v55  ;;  %v3872_v50 = vpack.c.b16 %v728_v23, %v727_v46 }
  0xbe   : > { %v598_v55 = vsel %vm566_vm1, %v3642_v25, %v3276_v43  ;;  %v597_v59 = vsel %vm566_vm1, %v3640_v24, %v3275_v35 }
  0xbf   : > { %v701_v1 = vunpack.c.l.b16 %v634_v44  ;;  %v702_v15 = vunpack.c.l.b16 %v635_v63  ;;  %v572_v44 = vsel %vm566_vm1, %v3674_v39, %v3301_v11  ;;  %v571_v63 = vsel %vm566_vm1, %v3672_v38, %v3300_v31  ;;  %v3309_v35 = vpop.permute.xlu1 %3308 }
  0xc0   : > { %v3304_v36 = vpop.permute.xlu0 %3303  ;;  %v631_v19 = vsel %vm599_vm2, %v598_v55, %v3836_v61  ;;  %v3310_v11 = vunpack.i.l.bf16 %v3309_v35 }
  0xc1   : > { %v3864_v60 = vpack.c.b16 %v702_v15, %v701_v1  ;;  %v3306_v47 = vunpack.i.h.bf16 %v3304_v36  ;;  %v3305_v48 = vunpack.i.l.bf16 %v3304_v36  ;;  %v630_v15 = vsel %vm599_vm2, %v597_v59, %v3836_v61 }
  0xc2   : > { %v662_v23 = vpack.c.bf16 %v630_v15, %v630_v15  ;;  %v663_v36 = vpack.c.bf16 %v631_v19, %v631_v19  ;;  %v573_v59 = vsel %vm566_vm1, %v3677_v41, %v3310_v11 }
  0xc3   : > { %v604_v49 = vsel %vm599_vm2, %v571_v63, %v3305_v48  ;;  %v605_v45 = vsel %vm599_vm2, %v572_v44, %v3306_v47  ;;  %v3311_v48 = vunpack.i.h.bf16 %v3309_v35  ;;  %v3314_v44 = vpop.permute.xlu2 %3313 }
  0xc4   : > { %v636_v0 = vpack.c.bf16 %v604_v49, %v604_v49  ;;  %v637_v1 = vpack.c.bf16 %v605_v45, %v605_v45  ;;  %v729_v16 = vunpack.c.l.b16 %v662_v23  ;;  %v730_v47 = vunpack.c.l.b16 %v663_v36 }
  0xc5   : > { %v574_v55 = vsel %vm566_vm1, %v3679_v42, %v3311_v48  ;;  %v3316_v63 = vunpack.i.h.bf16 %v3314_v44  ;;  %v3315_v49 = vunpack.i.l.bf16 %v3314_v44 }
  0xc6   : > { %v703_v9 = vunpack.c.l.b16 %v636_v0  ;;  %v704_v46 = vunpack.c.l.b16 %v637_v1  ;;  %v3898_v31 = vpack.c.b16 %v730_v47, %v729_v16 }
  0xc7   : > { %v606_v45 = vsel %vm599_vm2, %v573_v59, %v3315_v49  ;;  %v607_v0 = vsel %vm599_vm2, %v574_v55, %v3316_v63  ;;  %v3324_v48 = vpop.permute.xlu1 %3323 }
  0xc8   : > { %v3892_v43 = vpack.c.b16 %v704_v46, %v703_v9  ;;  %v638_v1 = vpack.c.bf16 %v606_v45, %v606_v45  ;;  %v639_v15 = vpack.c.bf16 %v607_v0, %v607_v0  ;;  %v3319_v23 = vpop.permute.xlu0 %3318  ;;  %v3326_v11 = vunpack.i.h.bf16 %v3324_v48 }
  0xc9   : > { %2989 = vmatmul.msk.bf16.gmra.mxu2 %vm752_vm3, %v3796_v32  ;;  %3009 = vmatmul.msk.bf16.gmra.mxu3 %vm752_vm3, %v3796_v32  ;;  %v3321_v36 = vunpack.i.h.bf16 %v3319_v23  ;;  %v3320_v35 = vunpack.i.l.bf16 %v3319_v23  ;;  %v3325_v55 = vunpack.i.l.bf16 %v3324_v48 }
  0xca   : > { %2979 = vmatmul.msk.bf16.gmra.mxu0 %vm752_vm3, %v3864_v60  ;;  %2999 = vmatmul.msk.bf16.gmra.mxu1 %vm752_vm3, %v3864_v60  ;;  %v705_v19 = vunpack.c.l.b16 %v638_v1  ;;  %v706_v9 = vunpack.c.l.b16 %v639_v15 }
  0xcb   : > { %v576_v16 = vsel %vm566_vm1, %v3712_v58, %v3321_v36  ;;  %v575_v47 = vsel %vm566_vm1, %v3710_v57, %v3320_v35 }
  0xcc   : > { %v3910_v46 = vpack.c.b16 %v706_v9, %v705_v19  ;;  %v609_v59 = vsel %vm599_vm2, %v576_v16, %v3326_v11  ;;  %v608_v44 = vsel %vm599_vm2, %v575_v47, %v3325_v55 }
  0xcd   : > { %v640_v63 = vpack.c.bf16 %v608_v44, %v608_v44  ;;  %v641_v49 = vpack.c.bf16 %v609_v59, %v609_v59 }
  0xcf   : > { %v707_v45 = vunpack.c.l.b16 %v640_v63  ;;  %v708_v0 = vunpack.c.l.b16 %v641_v49 }
  0xd1   : > { %v3925_v19 = vpack.c.b16 %v708_v0, %v707_v45 }
  0xd9   : > { %2990 = vmatmul.msk.bf16.gmra.mxu2 %vm752_vm3, %v3821_v20  ;;  %3010 = vmatmul.msk.bf16.gmra.mxu3 %vm752_vm3, %v3821_v20 }
  0xda   : > { %2980 = vmatmul.msk.bf16.gmra.mxu0 %vm752_vm3, %v3892_v43  ;;  %3000 = vmatmul.msk.bf16.gmra.mxu1 %vm752_vm3, %v3892_v43 }
  0xe9   : > { %2991 = vmatmul.msk.bf16.gmra.mxu2 %vm752_vm3, %v3844_v37  ;;  %3011 = vmatmul.msk.bf16.gmra.mxu3 %vm752_vm3, %v3844_v37 }
  0xea   : > { %2981 = vmatmul.msk.bf16.gmra.mxu0 %vm752_vm3, %v3910_v46  ;;  %3001 = vmatmul.msk.bf16.gmra.mxu1 %vm752_vm3, %v3910_v46 }
  0xf9   : > { %2992 = vmatmul.msk.bf16.gmra.mxu2 %vm752_vm3, %v3872_v50  ;;  %3012 = vmatmul.msk.bf16.gmra.mxu3 %vm752_vm3, %v3872_v50 }
  0xfa   : > { %2982 = vmatmul.msk.bf16.gmra.mxu0 %vm752_vm3, %v3925_v19  ;;  %3002 = vmatmul.msk.bf16.gmra.mxu1 %vm752_vm3, %v3925_v19 }
 0x109   : > { %2993 = vmatmul.msk.bf16.gmra.mxu2 %vm752_vm3, %v3898_v31  ;;  %3013 = vmatmul.msk.bf16.gmra.mxu3 %vm752_vm3, %v3898_v31 }
 0x10c   : > { %v3334_v36 = vpop.permute.xlu0 %3333 }
 0x10d   : > { %v3336_v47 = vunpack.i.h.bf16 %v3334_v36  ;;  %v3335_v48 = vunpack.i.l.bf16 %v3334_v36 }
 0x119   : > { %3020 = vmatmul.msk.bf16.vlgmr.msrb.gmra.mxu2 %vm752_vm3, %v3838_v62  ;;  %v3329_v62 = vpop.permute.xlu2 %3328 }
 0x11a   : > { %v3331_v35 = vunpack.i.h.bf16 %v3329_v62  ;;  %v3330_v16 = vunpack.i.l.bf16 %v3329_v62 }
 0x11c   : > { %v854_v1 = vpop.f32.mrf.mxu2  ;;  %v985_v15 = vpop.f32.mrf.mxu3  ;;  %v578_v11 = vsel %vm566_vm1, %v3745_v52, %v3331_v35  ;;  %v577_v55 = vsel %vm566_vm1, %v3743_v51, %v3330_v16 }
 0x11d   : > { %910 = vst.msk [vmem:[#allocation2 + $0x80] sm:$0xff] %vm566_vm1, %v854_v1  ;;  %v610_v59 = vsel %vm599_vm2, %v577_v55, %v3335_v48  ;;  %v611_v44 = vsel %vm599_vm2, %v578_v11, %v3336_v47 }
 0x11e   : > { %v642_v63 = vpack.c.bf16 %v610_v59, %v610_v59  ;;  %v643_v49 = vpack.c.bf16 %v611_v44, %v611_v44 }
 0x120   : > { %v709_v62 = vunpack.c.l.b16 %v642_v63  ;;  %v710_v36 = vunpack.c.l.b16 %v643_v49 }
 0x121   : > { %v3344_v55 = vpop.permute.xlu2 %3343 }
 0x122   : > { %v3941_v16 = vpack.c.b16 %v710_v36, %v709_v62  ;;  %v3346_v59 = vunpack.i.h.bf16 %v3344_v55  ;;  %v3345_v44 = vunpack.i.l.bf16 %v3344_v55 }
 0x124   : > { %v856_v9 = vpop.f32.mrf.mxu2  ;;  %v987_v23 = vpop.f32.mrf.mxu3  ;;  %2983 = vmatmul.msk.bf16.gmra.mxu0 %vm752_vm3, %v3941_v16  ;;  %3003 = vmatmul.msk.bf16.gmra.mxu1 %vm752_vm3, %v3941_v16 }
 0x125   : > { %911 = vst.msk [vmem:[#allocation2 + $0x88] sm:$0xff] %vm566_vm1, %v856_v9 }
 0x129   : > { %3021 = vmatmul.msk.bf16.gmra.mxu2 %vm752_vm3, %v3864_v60  ;;  %v3339_v60 = vpop.permute.xlu1 %3338 }
 0x12a   : > { %v3341_v47 = vunpack.i.h.bf16 %v3339_v60  ;;  %v3340_v48 = vunpack.i.l.bf16 %v3339_v60 }
 0x12c   : > { %v1041_v45 = vld [vmem:[#allocation2 + $0x81] sm:$0xff]  ;;  %v1042_v0 = vld [vmem:[#allocation2 + $0x89] sm:$0x7f]  ;;  %v859_v1 = vpop.f32.mrf.mxu2  ;;  %v990_v9 = vpop.f32.mrf.mxu3  ;;  %v580_v11 = vsel %vm566_vm1, %v3749_v54, %v3341_v47 }
 0x12d   : > { %v1073_v30 = vadd.f32 %v1041_v45, %v985_v15  ;;  %v1074_v35 = vadd.f32 %v1042_v0, %v987_v23  ;;  %912 = vst.msk [vmem:[#allocation2 + $0x90] sm:$0xff] %vm566_vm1, %v859_v1  ;;  %v613_v49 = vsel %vm599_vm2, %v580_v11, %v3346_v59 }
 0x12e   : > { %v645_v0 = vpack.c.bf16 %v613_v49, %v613_v49 }
 0x12f   : > { %1106 = vst.msk [vmem:[#allocation2 + $0x81] sm:$0xff] %vm566_vm1, %v1073_v30  ;;  %v579_v30 = vsel %vm566_vm1, %v3747_v53, %v3340_v48 }
 0x130   : > { %1107 = vst.msk [vmem:[#allocation2 + $0x89] sm:$0x7f] %vm1090_vm4, %v1074_v35  ;;  %v612_v63 = vsel %vm599_vm2, %v579_v30, %v3345_v44  ;;  %v712_v62 = vunpack.c.l.b16 %v645_v0 }
 0x131   : > { %v644_v45 = vpack.c.bf16 %v612_v63, %v612_v63  ;;  %v3354_v63 = vpop.permute.xlu1 %3353 }
 0x132   : > { %v3356_v49 = vunpack.i.h.bf16 %v3354_v63 }
 0x133   : > { %v711_v1 = vunpack.c.l.b16 %v644_v45  ;;  %v3355_v45 = vunpack.i.l.bf16 %v3354_v63 }
 0x134   : > { %v861_v15 = vpop.f32.mrf.mxu2  ;;  %v992_v23 = vpop.f32.mrf.mxu3 }
 0x135   : > { %913 = vst.msk [vmem:[#allocation2 + $0x98] sm:$0xff] %vm566_vm1, %v861_v15  ;;  %v3959_v55 = vpack.c.b16 %v712_v62, %v711_v1 }
 0x137   : > { %2984 = vmatmul.msk.bf16.gmra.mxu0 %vm752_vm3, %v3959_v55  ;;  %3004 = vmatmul.msk.bf16.gmra.mxu1 %vm752_vm3, %v3959_v55 }
 0x139   : > { %3022 = vmatmul.msk.bf16.gmra.mxu2 %vm752_vm3, %v3892_v43  ;;  %v3349_v43 = vpop.permute.xlu0 %3348 }
 0x13a   : > { %v3351_v11 = vunpack.i.h.bf16 %v3349_v43  ;;  %v3350_v30 = vunpack.i.l.bf16 %v3349_v43 }
 0x13c   : > { %v1043_v36 = vld [vmem:[#allocation2 + $0x91] sm:$0xff]  ;;  %v1044_v35 = vld [vmem:[#allocation2 + $0x99] sm:$0x7f]  ;;  %v864_v60 = vpop.f32.mrf.mxu2  ;;  %v995_v47 = vpop.f32.mrf.mxu3  ;;  %v581_v44 = vsel %vm566_vm1, %v3774_v26, %v3350_v30 }
 0x13d   : > { %v1075_v15 = vadd.f32 %v1043_v36, %v990_v9  ;;  %v1076_v48 = vadd.f32 %v1044_v35, %v992_v23  ;;  %914 = vst.msk [vmem:[#allocation2 + $0xa0] sm:$0xff] %vm566_vm1, %v864_v60  ;;  %v582_v23 = vsel %vm566_vm1, %v3776_v28, %v3351_v11  ;;  %v614_v1 = vsel %vm599_vm2, %v581_v44, %v3355_v45 }
 0x13e   : > { %v615_v0 = vsel %vm599_vm2, %v582_v23, %v3356_v49  ;;  %v646_v62 = vpack.c.bf16 %v614_v1, %v614_v1  ;;  %v814_v1 = vpop.f32.mrf.mxu0 }
 0x13f   : > { %1108 = vst.msk [vmem:[#allocation2 + $0x91] sm:$0xff] %vm566_vm1, %v1075_v15  ;;  %v647_v36 = vpack.c.bf16 %v615_v0, %v615_v0 }
 0x140   : > { %1109 = vst.msk [vmem:[#allocation2 + $0x99] sm:$0x7f] %vm1090_vm4, %v1076_v48  ;;  %v713_v35 = vunpack.c.l.b16 %v646_v62 }
 0x141   : > { %v714_v60 = vunpack.c.l.b16 %v647_v36  ;;  %894 = vst.msk [vmem:[#allocation2] sm:$0xff] %vm566_vm1, %v814_v1 }
 0x143   : > { %v3977_v63 = vpack.c.b16 %v714_v60, %v713_v35  ;;  %v945_v35 = vpop.f32.mrf.mxu1 }
 0x144   : > { %v866_v59 = vpop.f32.mrf.mxu2  ;;  %v997_v9 = vpop.f32.mrf.mxu3 }
 0x145   : > { %915 = vst.msk [vmem:[#allocation2 + $0xa8] sm:$0xff] %vm566_vm1, %v866_v59 }
 0x147   : > { %2985 = vmatmul.msk.bf16.gmra.mxu0 %vm752_vm3, %v3977_v63  ;;  %3005 = vmatmul.msk.bf16.gmra.mxu1 %vm752_vm3, %v3977_v63 }
 0x149   : > { %3023 = vmatmul.msk.bf16.gmra.mxu2 %vm752_vm3, %v3910_v46 }
 0x14c   : > { %v1045_v15 = vld [vmem:[#allocation2 + $0xa1] sm:$0xff]  ;;  %v1046_v48 = vld [vmem:[#allocation2 + $0xa9] sm:$0x7f]  ;;  %v869_v43 = vpop.f32.mrf.mxu2  ;;  %v1000_v11 = vpop.f32.mrf.mxu3 }
 0x14d   : > { %v1077_v59 = vadd.f32 %v1045_v15, %v995_v47  ;;  %v1078_v30 = vadd.f32 %v1046_v48, %v997_v9  ;;  %916 = vst.msk [vmem:[#allocation2 + $0xb0] sm:$0xff] %vm566_vm1, %v869_v43 }
 0x14f   : > { %1110 = vst.msk [vmem:[#allocation2 + $0xa1] sm:$0xff] %vm566_vm1, %v1077_v59 }
 0x150   : > { %1111 = vst.msk [vmem:[#allocation2 + $0xa9] sm:$0x7f] %vm1090_vm4, %v1078_v30 }
 0x154   : > { %v871_v46 = vpop.f32.mrf.mxu2  ;;  %v1002_v23 = vpop.f32.mrf.mxu3 }
 0x155   : > { %917 = vst.msk [vmem:[#allocation2 + $0xb8] sm:$0xff] %vm566_vm1, %v871_v46 }
 0x157   : > { %v1243_v21 = vld [vmem:[#allocation2 + $0xa8] sm:$0x7f] }
 0x159   : > { %3024 = vmatmul.msk.bf16.gmra.mxu2 %vm752_vm3, %v3925_v19  ;;  %v816_v19 = vpop.f32.mrf.mxu0 }
 0x15a   : > { %895 = vst.msk [vmem:[#allocation2 + $0x8] sm:$0xff] %vm566_vm1, %v816_v19 }
 0x15c   : > { %v1047_v47 = vld [vmem:[#allocation2 + $0xb1] sm:$0xff]  ;;  %v1048_v9 = vld [vmem:[#allocation2 + $0xb9] sm:$0x7f]  ;;  %v874_v44 = vpop.f32.mrf.mxu2  ;;  %v1005_v49 = vpop.f32.mrf.mxu3 }
 0x15d   : > { %v1079_v45 = vadd.f32 %v1047_v47, %v1000_v11  ;;  %v1080_v0 = vadd.f32 %v1048_v9, %v1002_v23  ;;  %918 = vst.msk [vmem:[#allocation2 + $0xc0] sm:$0xff] %vm566_vm1, %v874_v44  ;;  %v947_v47 = vpop.f32.mrf.mxu1 }
 0x15f   : > { %1112 = vst.msk [vmem:[#allocation2 + $0xb1] sm:$0xff] %vm566_vm1, %v1079_v45 }
 0x160   : > { %1113 = vst.msk [vmem:[#allocation2 + $0xb9] sm:$0x7f] %vm1090_vm4, %v1080_v0 }
 0x161   : > { %v1025_v30 = vld [vmem:[#allocation2 + $0x1] sm:$0xff]  ;;  %v819_v46 = vpop.f32.mrf.mxu0  ;;  %v1026_v9 = vld [vmem:[#allocation2 + $0x9] sm:$0x7f] }
 0x162   : > { %v1057_v23 = vadd.f32 %v1025_v30, %v945_v35  ;;  %896 = vst.msk [vmem:[#allocation2 + $0x10] sm:$0xff] %vm566_vm1, %v819_v46  ;;  %v1058_v44 = vadd.f32 %v1026_v9, %v947_v47 }
 0x164   : > { %v876_v62 = vpop.f32.mrf.mxu2  ;;  %v1007_v36 = vpop.f32.mrf.mxu3  ;;  %1089 = vst.msk [vmem:[#allocation2 + $0x1] sm:$0xff] %vm566_vm1, %v1057_v23 }
 0x165   : > { %919 = vst.msk [vmem:[#allocation2 + $0xc8] sm:$0xff] %vm566_vm1, %v876_v62  ;;  %v950_v0 = vpop.f32.mrf.mxu1 }
 0x166   : > { %1091 = vst.msk [vmem:[#allocation2 + $0x9] sm:$0x7f] %vm1090_vm4, %v1058_v44 }
 0x169   : > { %3025 = vmatmul.msk.bf16.gmra.mxu2 %vm752_vm3, %v3941_v16  ;;  %v821_v45 = vpop.f32.mrf.mxu0 }
 0x16a   : > { %897 = vst.msk [vmem:[#allocation2 + $0x18] sm:$0xff] %vm566_vm1, %v821_v45 }
 0x16c   : > { %v1049_v60 = vld [vmem:[#allocation2 + $0xc1] sm:$0xff]  ;;  %v1050_v15 = vld [vmem:[#allocation2 + $0xc9] sm:$0x7f]  ;;  %v879_v48 = vpop.f32.mrf.mxu2  ;;  %v1010_v43 = vpop.f32.mrf.mxu3 }
 0x16d   : > { %v1081_v11 = vadd.f32 %v1049_v60, %v1005_v49  ;;  %v1082_v59 = vadd.f32 %v1050_v15, %v1007_v36  ;;  %920 = vst.msk [vmem:[#allocation2 + $0xd0] sm:$0xff] %vm566_vm1, %v879_v48 }
 0x16f   : > { %1114 = vst.msk [vmem:[#allocation2 + $0xc1] sm:$0xff] %vm566_vm1, %v1081_v11 }
 0x170   : > { %1115 = vst.msk [vmem:[#allocation2 + $0xc9] sm:$0x7f] %vm1090_vm4, %v1082_v59  ;;  %v952_v59 = vpop.f32.mrf.mxu1 }
 0x171   : > { %v1027_v60 = vld [vmem:[#allocation2 + $0x11] sm:$0xff]  ;;  %v824_v15 = vpop.f32.mrf.mxu0  ;;  %v1028_v30 = vld [vmem:[#allocation2 + $0x19] sm:$0x7f] }
 0x172   : > { %v1059_v11 = vadd.f32 %v1027_v60, %v950_v0  ;;  %898 = vst.msk [vmem:[#allocation2 + $0x20] sm:$0xff] %vm566_vm1, %v824_v15  ;;  %v1060_v46 = vadd.f32 %v1028_v30, %v952_v59 }
 0x174   : > { %v881_v16 = vpop.f32.mrf.mxu2  ;;  %v1012_v49 = vpop.f32.mrf.mxu3  ;;  %1092 = vst.msk [vmem:[#allocation2 + $0x11] sm:$0xff] %vm566_vm1, %v1059_v11 }
 0x175   : > { %921 = vst.msk [vmem:[#allocation2 + $0xd8] sm:$0xff] %vm566_vm1, %v881_v16 }
 0x176   : > { %1093 = vst.msk [vmem:[#allocation2 + $0x19] sm:$0x7f] %vm1090_vm4, %v1060_v46 }
 0x178   : > { %v955_v23 = vpop.f32.mrf.mxu1 }
 0x179   : > { %3026 = vmatmul.msk.bf16.gmra.mxu2 %vm752_vm3, %v3959_v55 }
 0x17c   : > { %v1051_v1 = vld [vmem:[#allocation2 + $0xd1] sm:$0xff]  ;;  %v1052_v62 = vld [vmem:[#allocation2 + $0xd9] sm:$0x7f]  ;;  %v884_v36 = vpop.f32.mrf.mxu2  ;;  %v1015_v48 = vpop.f32.mrf.mxu3 }
 0x17d   : > { %v1083_v19 = vadd.f32 %v1051_v1, %v1010_v43  ;;  %v1084_v35 = vadd.f32 %v1052_v62, %v1012_v49  ;;  %922 = vst.msk [vmem:[#allocation2 + $0xe0] sm:$0xff] %vm566_vm1, %v884_v36  ;;  %v826_v43 = vpop.f32.mrf.mxu0 }
 0x17e   : > { %899 = vst.msk [vmem:[#allocation2 + $0x28] sm:$0xff] %vm566_vm1, %v826_v43 }
 0x17f   : > { %1116 = vst.msk [vmem:[#allocation2 + $0xd1] sm:$0xff] %vm566_vm1, %v1083_v19 }
 0x180   : > { %1117 = vst.msk [vmem:[#allocation2 + $0xd9] sm:$0x7f] %vm1090_vm4, %v1084_v35  ;;  %v957_v19 = vpop.f32.mrf.mxu1 }
 0x184   : > { %v886_v55 = vpop.f32.mrf.mxu2  ;;  %v1017_v47 = vpop.f32.mrf.mxu3 }
 0x185   : > { %923 = vst.msk [vmem:[#allocation2 + $0xe8] sm:$0xff] %vm566_vm1, %v886_v55  ;;  %v1029_v0 = vld [vmem:[#allocation2 + $0x21] sm:$0xff]  ;;  %v829_v1 = vpop.f32.mrf.mxu0  ;;  %v1030_v62 = vld [vmem:[#allocation2 + $0x29] sm:$0x7f] }
 0x186   : > { %v1061_v36 = vadd.f32 %v1029_v0, %v955_v23  ;;  %900 = vst.msk [vmem:[#allocation2 + $0x30] sm:$0xff] %vm566_vm1, %v829_v1  ;;  %v1062_v35 = vadd.f32 %v1030_v62, %v957_v19  ;;  %v1223_v62 = vld [vmem:[#allocation2 + $0x8] sm:$0x7f]  ;;  %v1222_v19 = vld [vmem:[#allocation2] sm:$0xff] }
 0x188   : > { %1094 = vst.msk [vmem:[#allocation2 + $0x21] sm:$0xff] %vm566_vm1, %v1061_v36 }
 0x189   : > { %3027 = vmatmul.msk.bf16.gmra.mxu2 %vm752_vm3, %v3977_v63  ;;  %1095 = vst.msk [vmem:[#allocation2 + $0x29] sm:$0x7f] %vm1090_vm4, %v1062_v35 }
 0x18c   : > { %v1053_v9 = vld [vmem:[#allocation2 + $0xe1] sm:$0xff]  ;;  %v1054_v44 = vld [vmem:[#allocation2 + $0xe9] sm:$0x7f]  ;;  %v889_v16 = vpop.f32.mrf.mxu2  ;;  %v1020_v63 = vpop.f32.mrf.mxu3 }
 0x18d   : > { %v1085_v49 = vadd.f32 %v1053_v9, %v1015_v48  ;;  %v1086_v45 = vadd.f32 %v1054_v44, %v1017_v47  ;;  %924 = vst.msk [vmem:[#allocation2 + $0xf0] sm:$0xff] %vm566_vm1, %v889_v16  ;;  %v831_v15 = vpop.f32.mrf.mxu0  ;;  %v960_v48 = vpop.f32.mrf.mxu1 }
 0x18e   : > { %901 = vst.msk [vmem:[#allocation2 + $0x38] sm:$0xff] %vm566_vm1, %v831_v15 }
 0x18f   : > { %1118 = vst.msk [vmem:[#allocation2 + $0xe1] sm:$0xff] %vm566_vm1, %v1085_v49 }
 0x190   : > { %1119 = vst.msk [vmem:[#allocation2 + $0xe9] sm:$0x7f] %vm1090_vm4, %v1086_v45 }
 0x194   : > { %v891_v60 = vpop.f32.mrf.mxu2  ;;  %v1022_v59 = vpop.f32.mrf.mxu3 }
 0x195   : > { %925 = vst.msk [vmem:[#allocation2 + $0xf8] sm:$0xff] %vm566_vm1, %v891_v60  ;;  %v1031_v23 = vld [vmem:[#allocation2 + $0x31] sm:$0xff]  ;;  %v834_v47 = vpop.f32.mrf.mxu0  ;;  %v1032_v9 = vld [vmem:[#allocation2 + $0x39] sm:$0x7f]  ;;  %v962_v16 = vpop.f32.mrf.mxu1 }
 0x196   : > { %v1063_v44 = vadd.f32 %v1031_v23, %v960_v48  ;;  %902 = vst.msk [vmem:[#allocation2 + $0x40] sm:$0xff] %vm566_vm1, %v834_v47  ;;  %v1064_v49 = vadd.f32 %v1032_v9, %v962_v16  ;;  %v4040_v48 = vld [vmem:[%s4869_s2] ss:$0 sm:$0xff] }
 0x197   : > { %v4052_v23 = vld [vmem:[%s4870_s3] ss:$0 sm:$0xff] }
 0x198   : > { %1096 = vst.msk [vmem:[#allocation2 + $0x31] sm:$0xff] %vm566_vm1, %v1063_v44 }
 0x199   : > { %3028 = vmatmul.msk.bf16.gmra.mxu2 %vm752_vm3, %v3730_v40  ;;  %1097 = vst.msk [vmem:[#allocation2 + $0x39] sm:$0x7f] %vm1090_vm4, %v1064_v49 }
 0x19c   : > { %v1055_v11 = vld [vmem:[#allocation2 + $0xf1] sm:$0xff]  ;;  %v1056_v30 = vld [vmem:[#allocation2 + $0xf9] sm:$0x7f]  ;;  %v1142_v46 = vpop.f32.mrf.mxu2 }
 0x19d   : > { %v1087_v55 = vadd.f32 %v1055_v11, %v1020_v63  ;;  %v1088_v43 = vadd.f32 %v1056_v30, %v1022_v59  ;;  %v1287_v45 = vrot.slane %v1142_v46, 1  ;;  %v836_v1 = vpop.f32.mrf.mxu0  ;;  %v965_v36 = vpop.f32.mrf.mxu1  ;;  %v3040_v46 = vld [vmem:[%s4871_s4 + $0x8] sm:$0xf] }
 0x19e   : > { %903 = vst.msk [vmem:[#allocation2 + $0x48] sm:$0xff] %vm566_vm1, %v836_v1 }
 0x19f   : > { %1120 = vst.msk [vmem:[#allocation2 + $0xf1] sm:$0xff] %vm566_vm1, %v1087_v55 }
 0x1a0   : > { %1121 = vst.msk [vmem:[#allocation2 + $0xf9] sm:$0x7f] %vm1090_vm4, %v1088_v43 }
 0x1a4   : > { %v1144_v40 = vpop.f32.mrf.mxu2 }
 0x1a5   : > { %v1288_v0 = vrot.slane %v1144_v40, 1  ;;  %v1033_v11 = vld [vmem:[#allocation2 + $0x41] sm:$0xff]  ;;  %v839_v59 = vpop.f32.mrf.mxu0  ;;  %v1034_v30 = vld [vmem:[#allocation2 + $0x49] sm:$0x7f]  ;;  %v967_v43 = vpop.f32.mrf.mxu1 }
 0x1a6   : > { %v1065_v55 = vadd.f32 %v1033_v11, %v965_v36  ;;  %904 = vst.msk [vmem:[#allocation2 + $0x50] sm:$0xff] %vm566_vm1, %v839_v59  ;;  %v1066_v47 = vadd.f32 %v1034_v30, %v967_v43  ;;  %v1224_v30 = vld [vmem:[#allocation2 + $0x10] sm:$0xff] }
 0x1a7   : > { %v1289_v35 = vsel %vm1286_vm5, %v1287_v45, %v1288_v0  ;;  %v1368_v63 = vadd.f32 %v1288_v0, %v1223_v62 }
 0x1a8   : > { %v1367_v60 = vadd.f32 %v1289_v35, %v1222_v19  ;;  %1098 = vst.msk [vmem:[#allocation2 + $0x41] sm:$0xff] %vm566_vm1, %v1065_v55 }
 0x1a9   : > { %1400 = vst.msk [vmem:[#allocation2 + $0x8] sm:$0x7f] %vm1090_vm4, %v1368_v63  ;;  %3029 = vmatmul.msk.bf16.gmra.mxu2 %vm752_vm3, %v3762_v12  ;;  %v3107_v12 = vld [vmem:[%s4871_s4 + $0x8] sm:$0x30] }
 0x1aa   : > { %1399 = vst.msk [vmem:[#allocation2] sm:$0xff] %vm566_vm1, %v1367_v60  ;;  %v3041_v9 = vor.u32 %v3107_v12, %v3040_v46  ;;  %v1225_v60 = vld [vmem:[#allocation2 + $0x18] sm:$0x7f] }
 0x1ab   : > { %1099 = vst.msk [vmem:[#allocation2 + $0x49] sm:$0x7f] %vm1090_vm4, %v1066_v47 }
 0x1ac   : > { %v1147_v15 = vpop.f32.mrf.mxu2  ;;  %v2082_v40 = vsel %vm801_vm0, %v3041_v9, 0  ;;  %v3060_v9 = vld [vmem:[%s4871_s4] sm:$0xf] }
 0x1ad   : > { %2091 = vmatpush.bf16.msrb.mxu3 %v2082_v40  ;;  %v1290_v36 = vrot.slane %v1147_v15, 1  ;;  %v841_v63 = vpop.f32.mrf.mxu0  ;;  %v970_v59 = vpop.f32.mrf.mxu1 }
 0x1ae   : > { %905 = vst.msk [vmem:[#allocation2 + $0x58] sm:$0xff] %vm566_vm1, %v841_v63 }
 0x1b0   : > { %v1432_v44 = vld [vmem:[#allocation2 + $0x8] sm:$0xff] }
 0x1b1   : > { %v1431_v16 = vld [vmem:[#allocation2] sm:$0xff]  ;;  %v1468_v49 = vmul.f32 %v4040_v48, %v1432_v44 }
 0x1b2   : > { %v1467_v45 = vmul.f32 %v4040_v48, %v1431_v16  ;;  %v3108_v44 = vld [vmem:[%s4871_s4] sm:$0x30] }
 0x1b3   : > { %v1504_v0 = vadd.f32 %v4052_v23, %v1468_v49  ;;  %v3061_v40 = vor.u32 %v3108_v44, %v3060_v9 }
 0x1b4   : > { %v1149_v1 = vpop.f32.mrf.mxu2  ;;  %v1503_v62 = vadd.f32 %v4052_v23, %v1467_v45 }
 0x1b5   : > { %v1291_v19 = vrot.slane %v1149_v1, 1  ;;  %v1536_v35 = vmax.f32 %v1504_v0, 0.0  ;;  %v1035_v12 = vld [vmem:[#allocation2 + $0x51] sm:$0xff]  ;;  %v844_v47 = vpop.f32.mrf.mxu0  ;;  %v1036_v45 = vld [vmem:[#allocation2 + $0x59] sm:$0x7f] }
 0x1b6   : > { %v1535_v11 = vmax.f32 %v1503_v62, 0.0  ;;  %v1067_v49 = vadd.f32 %v1035_v12, %v970_v59  ;;  %906 = vst.msk [vmem:[#allocation2 + $0x60] sm:$0xff] %vm566_vm1, %v844_v47  ;;  %v3109_v59 = vld [vmem:[%s4871_s4 + $0x10] sm:$0x30] }
 0x1b7   : > { %v1292_v46 = vsel %vm1286_vm5, %v1290_v36, %v1291_v19  ;;  %v1370_v55 = vadd.f32 %v1291_v19, %v1225_v60  ;;  %1568 = vst.msk [vmem:[#allocation3 + $0x8] sm:$0xff] %vm566_vm1, %v1536_v35  ;;  %v2213_v19 = vsel %vm801_vm0, %v3061_v40, 0  ;;  %v1227_v40 = vld [vmem:[#allocation2 + $0x28] sm:$0x7f] }
 0x1b8   : > { %v1369_v43 = vadd.f32 %v1292_v46, %v1224_v30  ;;  %1567 = vst.msk [vmem:[#allocation3] sm:$0xff] %vm566_vm1, %v1535_v11  ;;  %2222 = vmatpush.bf16.msrb.mxu0 %v2213_v19  ;;  %v3082_v11 = vld [vmem:[%s4871_s4 + $0x10] sm:$0xf] }
 0x1b9   : > { %1402 = vst.msk [vmem:[#allocation2 + $0x18] sm:$0x7f] %vm1090_vm4, %v1370_v55  ;;  %3030 = vmatmul.msk.bf16.gmra.mxu2 %vm752_vm3, %v3783_v56  ;;  %v972_v56 = vpop.f32.mrf.mxu1  ;;  %v3083_v46 = vor.u32 %v3109_v59, %v3082_v11 }
 0x1ba   : > { %1401 = vst.msk [vmem:[#allocation2 + $0x10] sm:$0xff] %vm566_vm1, %v1369_v43  ;;  %v1068_v1 = vadd.f32 %v1036_v45, %v972_v56 }
 0x1bb   : > { %1100 = vst.msk [vmem:[#allocation2 + $0x51] sm:$0xff] %vm566_vm1, %v1067_v49  ;;  %v2409_v49 = vsel %vm801_vm0, %v3083_v46, 0 }
 0x1bc   : > { %v1152_v15 = vpop.f32.mrf.mxu2  ;;  %1101 = vst.msk [vmem:[#allocation2 + $0x59] sm:$0x7f] %vm1090_vm4, %v1068_v1  ;;  %2418 = vmatpush.bf16.msrb.mxu1 %v2409_v49  ;;  %v1226_v1 = vld [vmem:[#allocation2 + $0x20] sm:$0xff] }
 0x1bd   : > { %v1293_v12 = vrot.slane %v1152_v15, 1  ;;  %v846_v44 = vpop.f32.mrf.mxu0 }
 0x1be   : > { %v4075_v16 = vld [vmem:[#allocation3 + $0x8] sm:$0xff]  ;;  %907 = vst.msk [vmem:[#allocation2 + $0x68] sm:$0xff] %vm566_vm1, %v846_v44 }
 0x1bf   : > { %v4078_v0 = vld [vmem:[#allocation3] sm:$0xff] }
 0x1c0   : > { %v3357_v62 = vpack.i.bf16 %v4075_v16, %v4078_v0  ;;  %v1434_v36 = vld [vmem:[#allocation2 + $0x18] sm:$0xff] }
 0x1c1   : > { %v1433_v35 = vld [vmem:[#allocation2 + $0x10] sm:$0xff]  ;;  %v1470_v63 = vmul.f32 %v4040_v48, %v1434_v36  ;;  %v975_v45 = vpop.f32.mrf.mxu1 }
 0x1c2   : > { %3358 = vrot.lane.b32.xlu2 %v3357_v62, %s3528_s30  ;;  %v1469_v60 = vmul.f32 %v4040_v48, %v1433_v35 }
 0x1c3   : > { %v1506_v30 = vadd.f32 %v4052_v23, %v1470_v63 }
 0x1c4   : > { %v1154_v55 = vpop.f32.mrf.mxu2  ;;  %v1505_v43 = vadd.f32 %v4052_v23, %v1469_v60 }
 0x1c5   : > { %v1294_v47 = vrot.slane %v1154_v55, 1  ;;  %v1538_v9 = vmax.f32 %v1506_v30, 0.0  ;;  %v1037_v35 = vld [vmem:[#allocation2 + $0x61] sm:$0xff]  ;;  %v849_v63 = vpop.f32.mrf.mxu0  ;;  %v1038_v60 = vld [vmem:[#allocation2 + $0x69] sm:$0x7f] }
 0x1c6   : > { %v1537_v56 = vmax.f32 %v1505_v43, 0.0  ;;  %v1069_v59 = vadd.f32 %v1037_v35, %v975_v45  ;;  %908 = vst.msk [vmem:[#allocation2 + $0x70] sm:$0xff] %vm566_vm1, %v849_v63  ;;  %v1228_v63 = vld [vmem:[#allocation2 + $0x30] sm:$0xff] }
 0x1c7   : > { %v1295_v62 = vsel %vm1286_vm5, %v1293_v12, %v1294_v47  ;;  %v1372_v36 = vadd.f32 %v1294_v47, %v1227_v40  ;;  %1570 = vst.msk [vmem:[#allocation3 + $0x18] sm:$0xff] %vm566_vm1, %v1538_v9 }
 0x1c8   : > { %v1371_v19 = vadd.f32 %v1295_v62, %v1226_v1  ;;  %1569 = vst.msk [vmem:[#allocation3 + $0x10] sm:$0xff] %vm566_vm1, %v1537_v56 }
 0x1c9   : > { %1404 = vst.msk [vmem:[#allocation2 + $0x28] sm:$0x7f] %vm1090_vm4, %v1372_v36  ;;  %3031 = vmatmul.msk.bf16.gmra.mxu2 %vm752_vm3, %v3796_v32  ;;  %v977_v30 = vpop.f32.mrf.mxu1  ;;  %v1229_v36 = vld [vmem:[#allocation2 + $0x38] sm:$0x7f] }
 0x1ca   : > { %1403 = vst.msk [vmem:[#allocation2 + $0x20] sm:$0xff] %vm566_vm1, %v1371_v19  ;;  %v1070_v55 = vadd.f32 %v1038_v60, %v977_v30 }
 0x1cb   : > { %1102 = vst.msk [vmem:[#allocation2 + $0x61] sm:$0xff] %vm566_vm1, %v1069_v59 }
 0x1cc   : > { %v1157_v15 = vpop.f32.mrf.mxu2  ;;  %1103 = vst.msk [vmem:[#allocation2 + $0x69] sm:$0x7f] %vm1090_vm4, %v1070_v55 }
 0x1cd   : > { %v1296_v56 = vrot.slane %v1157_v15, 1  ;;  %v851_v62 = vpop.f32.mrf.mxu0 }
 0x1ce   : > { %v4105_v11 = vld [vmem:[#allocation3 + $0x18] sm:$0xff]  ;;  %909 = vst.msk [vmem:[#allocation2 + $0x78] sm:$0xff] %vm566_vm1, %v851_v62 }
 0x1cf   : > { %v4108_v46 = vld [vmem:[#allocation3 + $0x10] sm:$0xff] }
 0x1d0   : > { %v3367_v43 = vpack.i.bf16 %v4105_v11, %v4108_v46  ;;  %v1436_v12 = vld [vmem:[#allocation2 + $0x28] sm:$0xff] }
 0x1d1   : > { %v1435_v32 = vld [vmem:[#allocation2 + $0x20] sm:$0xff]  ;;  %v1472_v47 = vmul.f32 %v4040_v48, %v1436_v12  ;;  %v980_v35 = vpop.f32.mrf.mxu1 }
 0x1d2   : > { %3368 = vrot.lane.b32.xlu1 %v3367_v43, %s3528_s30  ;;  %3363 = vrot.lane.b32.xlu0 %v3367_v43, %s3529_s8  ;;  %v1471_v9 = vmul.f32 %v4040_v48, %v1435_v32 }
 0x1d3   : > { %v1508_v44 = vadd.f32 %v4052_v23, %v1472_v47 }
 0x1d4   : > { %v1159_v49 = vpop.f32.mrf.mxu2  ;;  %v1507_v40 = vadd.f32 %v4052_v23, %v1471_v9 }
 0x1d5   : > { %v1297_v45 = vrot.slane %v1159_v49, 1  ;;  %v1540_v1 = vmax.f32 %v1508_v44, 0.0  ;;  %v1039_v55 = vld [vmem:[#allocation2 + $0x71] sm:$0xff]  ;;  %v1040_v43 = vld [vmem:[#allocation2 + $0x79] sm:$0x7f] }
 0x1d6   : > { %v1539_v19 = vmax.f32 %v1507_v40, 0.0  ;;  %v1071_v32 = vadd.f32 %v1039_v55, %v980_v35 }
 0x1d7   : > { %v1298_v60 = vsel %vm1286_vm5, %v1296_v56, %v1297_v45  ;;  %v1374_v59 = vadd.f32 %v1297_v45, %v1229_v36  ;;  %1572 = vst.msk [vmem:[#allocation3 + $0x28] sm:$0xff] %vm566_vm1, %v1540_v1 }
 0x1d8   : > { %v1373_v30 = vadd.f32 %v1298_v60, %v1228_v63  ;;  %1571 = vst.msk [vmem:[#allocation3 + $0x20] sm:$0xff] %vm566_vm1, %v1539_v19  ;;  %v1231_v60 = vld [vmem:[#allocation2 + $0x48] sm:$0x7f] }
 0x1d9   : > { %1406 = vst.msk [vmem:[#allocation2 + $0x38] sm:$0x7f] %vm1090_vm4, %v1374_v59  ;;  %3032 = vmatmul.msk.bf16.gmra.mxu2 %vm752_vm3, %v3821_v20  ;;  %v982_v47 = vpop.f32.mrf.mxu1 }
 0x1da   : > { %1405 = vst.msk [vmem:[#allocation2 + $0x30] sm:$0xff] %vm566_vm1, %v1373_v30  ;;  %v1072_v44 = vadd.f32 %v1040_v43, %v982_v47  ;;  %v1230_v30 = vld [vmem:[#allocation2 + $0x40] sm:$0xff] }
 0x1db   : > { %1104 = vst.msk [vmem:[#allocation2 + $0x71] sm:$0xff] %vm566_vm1, %v1071_v32 }
 0x1dc   : > { %v1162_v15 = vpop.f32.mrf.mxu2  ;;  %1105 = vst.msk [vmem:[#allocation2 + $0x79] sm:$0x7f] %vm1090_vm4, %v1072_v44 }
 0x1dd   : > { %v1299_v19 = vrot.slane %v1162_v15, 1 }
 0x1de   : > { %v4128_v12 = vld [vmem:[#allocation3 + $0x28] sm:$0xff] }
 0x1df   : > { %v4130_v9 = vld [vmem:[#allocation3 + $0x20] sm:$0xff] }
 0x1e0   : > { %v3377_v49 = vpack.i.bf16 %v4128_v12, %v4130_v9  ;;  %v1438_v40 = vld [vmem:[#allocation2 + $0x38] sm:$0xff] }
 0x1e1   : > { %v1437_v56 = vld [vmem:[#allocation2 + $0x30] sm:$0xff]  ;;  %v1474_v20 = vmul.f32 %v4040_v48, %v1438_v40 }
 0x1e2   : > { %3378 = vrot.lane.b32.xlu0 %v3377_v49, %s3528_s30  ;;  %3373 = vrot.lane.b32.xlu2 %v3377_v49, %s3529_s8  ;;  %v1473_v45 = vmul.f32 %v4040_v48, %v1437_v56 }
 0x1e3   : > { %v1510_v1 = vadd.f32 %v4052_v23, %v1474_v20 }
 0x1e4   : > { %v1164_v62 = vpop.f32.mrf.mxu2  ;;  %v1509_v36 = vadd.f32 %v4052_v23, %v1473_v45 }
 0x1e5   : > { %v1300_v35 = vrot.slane %v1164_v62, 1  ;;  %v1542_v63 = vmax.f32 %v1510_v1, 0.0 }
 0x1e6   : > { %v1541_v59 = vmax.f32 %v1509_v36, 0.0 }
 0x1e7   : > { %v1301_v55 = vsel %vm1286_vm5, %v1299_v19, %v1300_v35  ;;  %v1376_v43 = vadd.f32 %v1300_v35, %v1231_v60  ;;  %1574 = vst.msk [vmem:[#allocation3 + $0x38] sm:$0xff] %vm566_vm1, %v1542_v63  ;;  %v1233_v63 = vld [vmem:[#allocation2 + $0x58] sm:$0x7f] }
 0x1e8   : > { %v1375_v32 = vadd.f32 %v1301_v55, %v1230_v30  ;;  %1573 = vst.msk [vmem:[#allocation3 + $0x30] sm:$0xff] %vm566_vm1, %v1541_v59  ;;  %v1232_v59 = vld [vmem:[#allocation2 + $0x50] sm:$0xff] }
 0x1e9   : > { %1408 = vst.msk [vmem:[#allocation2 + $0x48] sm:$0x7f] %vm1090_vm4, %v1376_v43  ;;  %3033 = vmatmul.msk.bf16.gmra.mxu2 %vm752_vm3, %v3844_v37 }
 0x1ea   : > { %1407 = vst.msk [vmem:[#allocation2 + $0x40] sm:$0xff] %vm566_vm1, %v1375_v32 }
 0x1ec   : > { %v1167_v15 = vpop.f32.mrf.mxu2 }
 0x1ed   : > { %v1302_v36 = vrot.slane %v1167_v15, 1 }
 0x1ee   : > { %v4149_v47 = vld [vmem:[#allocation3 + $0x38] sm:$0xff] }
 0x1ef   : > { %v4151_v44 = vld [vmem:[#allocation3 + $0x30] sm:$0xff] }
 0x1f0   : > { %v3387_v49 = vpack.i.bf16 %v4149_v47, %v4151_v44  ;;  %v1440_v40 = vld [vmem:[#allocation2 + $0x48] sm:$0xff] }
 0x1f1   : > { %v1439_v56 = vld [vmem:[#allocation2 + $0x40] sm:$0xff]  ;;  %v1476_v20 = vmul.f32 %v4040_v48, %v1440_v40 }
 0x1f2   : > { %3388 = vrot.lane.b32.xlu2 %v3387_v49, %s3528_s30  ;;  %3383 = vrot.lane.b32.xlu1 %v3387_v49, %s3529_s8  ;;  %v1475_v37 = vmul.f32 %v4040_v48, %v1439_v56 }
 0x1f3   : > { %v1512_v45 = vadd.f32 %v4052_v23, %v1476_v20 }
 0x1f4   : > { %v1169_v1 = vpop.f32.mrf.mxu2  ;;  %v1511_v62 = vadd.f32 %v4052_v23, %v1475_v37 }
 0x1f5   : > { %v1303_v19 = vrot.slane %v1169_v1, 1  ;;  %v1544_v35 = vmax.f32 %v1512_v45, 0.0 }
 0x1f6   : > { %v1543_v60 = vmax.f32 %v1511_v62, 0.0 }
 0x1f7   : > { %v1304_v30 = vsel %vm1286_vm5, %v1302_v36, %v1303_v19  ;;  %v1378_v55 = vadd.f32 %v1303_v19, %v1233_v63  ;;  %1576 = vst.msk [vmem:[#allocation3 + $0x48] sm:$0xff] %vm566_vm1, %v1544_v35  ;;  %v1235_v63 = vld [vmem:[#allocation2 + $0x68] sm:$0x7f] }
 0x1f8   : > { %v1377_v43 = vadd.f32 %v1304_v30, %v1232_v59  ;;  %1575 = vst.msk [vmem:[#allocation3 + $0x40] sm:$0xff] %vm566_vm1, %v1543_v60  ;;  %v1234_v59 = vld [vmem:[#allocation2 + $0x60] sm:$0xff] }
 0x1f9   : > { %1410 = vst.msk [vmem:[#allocation2 + $0x58] sm:$0x7f] %vm1090_vm4, %v1378_v55  ;;  %3034 = vmatmul.msk.bf16.gmra.mxu2 %vm752_vm3, %v3872_v50 }
 0x1fa   : > { %1409 = vst.msk [vmem:[#allocation2 + $0x50] sm:$0xff] %vm566_vm1, %v1377_v43 }
 0x1fc   : > { %v1172_v32 = vpop.f32.mrf.mxu2 }
 0x1fd   : > { %v1305_v36 = vrot.slane %v1172_v32, 1 }
 0x1fe   : > { %v4168_v15 = vld [vmem:[#allocation3 + $0x48] sm:$0xff] }
 0x1ff   : > { %v4170_v49 = vld [vmem:[#allocation3 + $0x40] sm:$0xff] }
 0x200   : > { %v3397_v40 = vpack.i.bf16 %v4168_v15, %v4170_v49  ;;  %v1442_v56 = vld [vmem:[#allocation2 + $0x58] sm:$0xff] }
 0x201   : > { %v1441_v20 = vld [vmem:[#allocation2 + $0x50] sm:$0xff]  ;;  %v1478_v37 = vmul.f32 %v4040_v48, %v1442_v56 }
 0x202   : > { %3398 = vrot.lane.b32.xlu1 %v3397_v40, %s3528_s30  ;;  %3393 = vrot.lane.b32.xlu0 %v3397_v40, %s3529_s8  ;;  %v1477_v50 = vmul.f32 %v4040_v48, %v1441_v20 }
 0x203   : > { %v1514_v45 = vadd.f32 %v4052_v23, %v1478_v37 }
 0x204   : > { %v1174_v1 = vpop.f32.mrf.mxu2  ;;  %v1513_v62 = vadd.f32 %v4052_v23, %v1477_v50 }
 0x205   : > { %v1306_v19 = vrot.slane %v1174_v1, 1  ;;  %v1546_v35 = vmax.f32 %v1514_v45, 0.0 }
 0x206   : > { %v1545_v60 = vmax.f32 %v1513_v62, 0.0 }
 0x207   : > { %v1307_v30 = vsel %vm1286_vm5, %v1305_v36, %v1306_v19  ;;  %v1380_v55 = vadd.f32 %v1306_v19, %v1235_v63  ;;  %1578 = vst.msk [vmem:[#allocation3 + $0x58] sm:$0xff] %vm566_vm1, %v1546_v35 }
 0x208   : > { %v1379_v43 = vadd.f32 %v1307_v30, %v1234_v59  ;;  %1577 = vst.msk [vmem:[#allocation3 + $0x50] sm:$0xff] %vm566_vm1, %v1545_v60  ;;  %v1237_v60 = vld [vmem:[#allocation2 + $0x78] sm:$0x7f]  ;;  %v1236_v30 = vld [vmem:[#allocation2 + $0x70] sm:$0xff] }
 0x209   : > { %1412 = vst.msk [vmem:[#allocation2 + $0x68] sm:$0x7f] %vm1090_vm4, %v1380_v55  ;;  %3035 = vmatmul.msk.bf16.gmra.mxu2 %vm752_vm3, %v3898_v31 }
 0x20a   : > { %1411 = vst.msk [vmem:[#allocation2 + $0x60] sm:$0xff] %vm566_vm1, %v1379_v43 }
 0x20c   : > { %v1177_v32 = vpop.f32.mrf.mxu2 }
 0x20d   : > { %v1308_v19 = vrot.slane %v1177_v32, 1 }
 0x20e   : > { %v4187_v40 = vld [vmem:[#allocation3 + $0x58] sm:$0xff] }
 0x20f   : > { %v4189_v56 = vld [vmem:[#allocation3 + $0x50] sm:$0xff] }
 0x210   : > { %v3407_v20 = vpack.i.bf16 %v4187_v40, %v4189_v56  ;;  %v1444_v37 = vld [vmem:[#allocation2 + $0x68] sm:$0xff] }
 0x211   : > { %v1443_v50 = vld [vmem:[#allocation2 + $0x60] sm:$0xff]  ;;  %v1480_v45 = vmul.f32 %v4040_v48, %v1444_v37 }
 0x212   : > { %3408 = vrot.lane.b32.xlu0 %v3407_v20, %s3528_s30  ;;  %3403 = vrot.lane.b32.xlu2 %v3407_v20, %s3529_s8  ;;  %v1479_v31 = vmul.f32 %v4040_v48, %v1443_v50 }
 0x213   : > { %v1516_v1 = vadd.f32 %v4052_v23, %v1480_v45 }
 0x214   : > { %v1179_v62 = vpop.f32.mrf.mxu2  ;;  %v1515_v36 = vadd.f32 %v4052_v23, %v1479_v31 }
 0x215   : > { %v1309_v35 = vrot.slane %v1179_v62, 1  ;;  %v1548_v63 = vmax.f32 %v1516_v1, 0.0 }
 0x216   : > { %v1547_v59 = vmax.f32 %v1515_v36, 0.0 }
 0x217   : > { %v1310_v55 = vsel %vm1286_vm5, %v1308_v19, %v1309_v35  ;;  %v1382_v43 = vadd.f32 %v1309_v35, %v1237_v60  ;;  %1580 = vst.msk [vmem:[#allocation3 + $0x68] sm:$0xff] %vm566_vm1, %v1548_v63 }
 0x218   : > { %v1381_v37 = vadd.f32 %v1310_v55, %v1236_v30  ;;  %1579 = vst.msk [vmem:[#allocation3 + $0x60] sm:$0xff] %vm566_vm1, %v1547_v59  ;;  %v1239_v55 = vld [vmem:[#allocation2 + $0x88] sm:$0x7f] }
 0x219   : > { %1414 = vst.msk [vmem:[#allocation2 + $0x78] sm:$0x7f] %vm1090_vm4, %v1382_v43 }
 0x21a   : > { %1413 = vst.msk [vmem:[#allocation2 + $0x70] sm:$0xff] %vm566_vm1, %v1381_v37  ;;  %v1238_v37 = vld [vmem:[#allocation2 + $0x80] sm:$0xff] }
 0x21c   : > { %v1182_v20 = vpop.f32.mrf.mxu2 }
 0x21d   : > { %v1311_v60 = vrot.slane %v1182_v20, 1 }
 0x21e   : > { %v4204_v50 = vld [vmem:[#allocation3 + $0x68] sm:$0xff] }
 0x21f   : > { %v4206_v32 = vld [vmem:[#allocation3 + $0x60] sm:$0xff] }
 0x220   : > { %v3417_v45 = vpack.i.bf16 %v4204_v50, %v4206_v32  ;;  %v1446_v31 = vld [vmem:[#allocation2 + $0x78] sm:$0xff] }
 0x221   : > { %v1445_v1 = vld [vmem:[#allocation2 + $0x70] sm:$0xff]  ;;  %v1482_v62 = vmul.f32 %v4040_v48, %v1446_v31 }
 0x222   : > { %3418 = vrot.lane.b32.xlu2 %v3417_v45, %s3528_s30  ;;  %3413 = vrot.lane.b32.xlu1 %v3417_v45, %s3529_s8  ;;  %v1481_v36 = vmul.f32 %v4040_v48, %v1445_v1 }
 0x223   : > { %v1518_v19 = vadd.f32 %v4052_v23, %v1482_v62 }
 0x224   : > { %v1184_v35 = vpop.f32.mrf.mxu2  ;;  %v1517_v63 = vadd.f32 %v4052_v23, %v1481_v36 }
 0x225   : > { %v1312_v59 = vrot.slane %v1184_v35, 1  ;;  %v1550_v30 = vmax.f32 %v1518_v19, 0.0 }
 0x226   : > { %v1549_v43 = vmax.f32 %v1517_v63, 0.0 }
 0x227   : > { %v1313_v29 = vsel %vm1286_vm5, %v1311_v60, %v1312_v59  ;;  %v1384_v31 = vadd.f32 %v1312_v59, %v1239_v55  ;;  %1582 = vst.msk [vmem:[#allocation3 + $0x78] sm:$0xff] %vm566_vm1, %v1550_v30 }
 0x228   : > { %v1383_v27 = vadd.f32 %v1313_v29, %v1238_v37  ;;  %1581 = vst.msk [vmem:[#allocation3 + $0x70] sm:$0xff] %vm566_vm1, %v1549_v43  ;;  %v1241_v43 = vld [vmem:[#allocation2 + $0x98] sm:$0x7f] }
 0x229   : > { %1416 = vst.msk [vmem:[#allocation2 + $0x88] sm:$0x7f] %vm1090_vm4, %v1384_v31  ;;  %v1240_v31 = vld [vmem:[#allocation2 + $0x90] sm:$0xff] }
 0x22a   : > { %1415 = vst.msk [vmem:[#allocation2 + $0x80] sm:$0xff] %vm566_vm1, %v1383_v27 }
 0x22c   : > { %v1187_v45 = vpop.f32.mrf.mxu2 }
 0x22d   : > { %v1314_v59 = vrot.slane %v1187_v45, 1 }
 0x22e   : > { %v4221_v1 = vld [vmem:[#allocation3 + $0x78] sm:$0xff] }
 0x22f   : > { %v4223_v20 = vld [vmem:[#allocation3 + $0x70] sm:$0xff] }
 0x230   : > { %v3427_v62 = vpack.i.bf16 %v4221_v1, %v4223_v20  ;;  %v1448_v36 = vld [vmem:[#allocation2 + $0x88] sm:$0xff] }
 0x231   : > { %v1447_v19 = vld [vmem:[#allocation2 + $0x80] sm:$0xff]  ;;  %v1484_v35 = vmul.f32 %v4040_v48, %v1448_v36 }
 0x232   : > { %3428 = vrot.lane.b32.xlu1 %v3427_v62, %s3528_s30  ;;  %3423 = vrot.lane.b32.xlu0 %v3427_v62, %s3529_s8  ;;  %v1483_v29 = vmul.f32 %v4040_v48, %v1447_v19 }
 0x233   : > { %v1520_v27 = vadd.f32 %v4052_v23, %v1484_v35  ;;  %v3359_v35 = vpop.permute.xlu2 %3358 }
 0x234   : > { %v1189_v63 = vpop.f32.mrf.mxu2  ;;  %v1519_v60 = vadd.f32 %v4052_v23, %v1483_v29 }
 0x235   : > { %v1315_v30 = vrot.slane %v1189_v63, 1  ;;  %v1552_v55 = vmax.f32 %v1520_v27, 0.0 }
 0x236   : > { %v1551_v37 = vmax.f32 %v1519_v60, 0.0 }
 0x237   : > { %v1316_v25 = vsel %vm1286_vm5, %v1314_v59, %v1315_v30  ;;  %v1386_v36 = vadd.f32 %v1315_v30, %v1241_v43  ;;  %1584 = vst.msk [vmem:[#allocation3 + $0x88] sm:$0xff] %vm566_vm1, %v1552_v55  ;;  %v3360_v59 = vunpack.i.l.bf16 %v3359_v35 }
 0x238   : > { %v1385_v24 = vadd.f32 %v1316_v25, %v1240_v31  ;;  %1583 = vst.msk [vmem:[#allocation3 + $0x80] sm:$0xff] %vm566_vm1, %v1551_v37 }
 0x239   : > { %1418 = vst.msk [vmem:[#allocation2 + $0x98] sm:$0x7f] %vm1090_vm4, %v1386_v36 }
 0x23a   : > { %1417 = vst.msk [vmem:[#allocation2 + $0x90] sm:$0xff] %vm566_vm1, %v1385_v24  ;;  %v3361_v24 = vunpack.i.h.bf16 %v3359_v35 }
 0x23c   : > { %v1192_v62 = vpop.f32.mrf.mxu2  ;;  %v1850_v14 = vsel %vm566_vm1, 0.0, %v3361_v24 }
 0x23d   : > { %v1317_v37 = vrot.slane %v1192_v62, 1 }
 0x23e   : > { %v4238_v19 = vld [vmem:[#allocation3 + $0x88] sm:$0xff] }
 0x23f   : > { %v4240_v45 = vld [vmem:[#allocation3 + $0x80] sm:$0xff] }
 0x240   : > { %v3432_v29 = vpack.i.bf16 %v4238_v19, %v4240_v45  ;;  %v1450_v27 = vld [vmem:[#allocation2 + $0x98] sm:$0xff] }
 0x241   : > { %v1449_v63 = vld [vmem:[#allocation2 + $0x90] sm:$0xff]  ;;  %v1486_v60 = vmul.f32 %v4040_v48, %v1450_v27 }
 0x242   : > { %3433 = vrot.lane.b32.xlu2 %v3432_v29, %s3529_s8  ;;  %3438 = vrot.lane.b32.xlu0 %v3432_v29, %s3528_s30  ;;  %v1485_v25 = vmul.f32 %v4040_v48, %v1449_v63  ;;  %v1849_v29 = vsel %vm566_vm1, 0.0, %v3360_v59  ;;  %v1242_v63 = vld [vmem:[#allocation2 + $0xa0] sm:$0xff] }
 0x243   : > { %v1522_v30 = vadd.f32 %v4052_v23, %v1486_v60 }
 0x244   : > { %v1194_v55 = vpop.f32.mrf.mxu2  ;;  %v1521_v43 = vadd.f32 %v4052_v23, %v1485_v25  ;;  %v3364_v36 = vpop.permute.xlu0 %3363 }
 0x245   : > { %v1318_v31 = vrot.slane %v1194_v55, 1  ;;  %v1554_v22 = vmax.f32 %v1522_v30, 0.0  ;;  %v3366_v18 = vunpack.i.h.bf16 %v3364_v36  ;;  %v3365_v27 = vunpack.i.l.bf16 %v3364_v36  ;;  %v3369_v60 = vpop.permute.xlu1 %3368 }
 0x246   : > { %v1553_v17 = vmax.f32 %v1521_v43, 0.0  ;;  %v3370_v59 = vunpack.i.l.bf16 %v3369_v60  ;;  %v3371_v43 = vunpack.i.h.bf16 %v3369_v60 }
 0x247   : > { %v1319_v35 = vsel %vm1286_vm5, %v1317_v37, %v1318_v31  ;;  %v1388_v13 = vadd.f32 %v1318_v31, %v1243_v21  ;;  %1586 = vst.msk [vmem:[#allocation3 + $0x98] sm:$0xff] %vm566_vm1, %v1554_v22  ;;  %v1882_v62 = vsel %vm599_vm2, %v1850_v14, %v3366_v18  ;;  %v1881_v30 = vsel %vm599_vm2, %v1849_v29, %v3365_v27  ;;  %v3374_v31 = vpop.permute.xlu2 %3373 }
 0x248   : > { %v1387_v25 = vadd.f32 %v1319_v35, %v1242_v63  ;;  %1585 = vst.msk [vmem:[#allocation3 + $0x90] sm:$0xff] %vm566_vm1, %v1553_v17  ;;  %v1914_v55 = vpack.c.bf16 %v1882_v62, %v1882_v62  ;;  %v1913_v24 = vpack.c.bf16 %v1881_v30, %v1881_v30  ;;  %v1851_v14 = vsel %vm566_vm1, %v4078_v0, %v3370_v59 }
 0x249   : > { %1420 = vst.msk [vmem:[#allocation2 + $0xa8] sm:$0x7f] %vm1090_vm4, %v1388_v13  ;;  %v3375_v27 = vunpack.i.l.bf16 %v3374_v31  ;;  %v1852_v13 = vsel %vm566_vm1, %v4075_v16, %v3371_v43  ;;  %v3376_v29 = vunpack.i.h.bf16 %v3374_v31 }
 0x24a   : > { %1419 = vst.msk [vmem:[#allocation2 + $0xa0] sm:$0xff] %vm566_vm1, %v1387_v25  ;;  %v1981_v37 = vunpack.c.l.b16 %v1914_v55  ;;  %v1980_v21 = vunpack.c.l.b16 %v1913_v24 }
 0x24b   : > { %v1883_v0 = vsel %vm599_vm2, %v1851_v14, %v3375_v27  ;;  %v1884_v16 = vsel %vm599_vm2, %v1852_v13, %v3376_v29  ;;  %v1244_v27 = vld [vmem:[#allocation2 + $0xb0] sm:$0xff] }
 0x24c   : > { %v1197_v36 = vpop.f32.mrf.mxu2  ;;  %v2012_v22 = vpack.c.b16 %v1981_v37, %v1980_v21  ;;  %v1915_v24 = vpack.c.bf16 %v1883_v0, %v1883_v0  ;;  %v1916_v21 = vpack.c.bf16 %v1884_v16, %v1884_v16 }
 0x24d   : > { %v1320_v43 = vrot.slane %v1197_v36, 1 }
 0x24e   : > { %v4261_v18 = vld [vmem:[#allocation3 + $0x98] sm:$0xff]  ;;  %3042 = vmatmul.msk.bf16.vlgmr.msrb.gmra.mxu3 %vm752_vm3, %v2012_v22  ;;  %3062 = vmatmul.msk.bf16.vlgmr.msrb.gmra.mxu0 %vm752_vm3, %v2012_v22  ;;  %v1982_v29 = vunpack.c.l.b16 %v1915_v24  ;;  %v1983_v0 = vunpack.c.l.b16 %v1916_v21 }
 0x24f   : > { %v4267_v17 = vld [vmem:[#allocation3 + $0x90] sm:$0xff]  ;;  %3084 = vmatmul.msk.bf16.vlgmr.msrb.gmra.mxu1 %vm752_vm3, %v2012_v22  ;;  %v1245_v22 = vld [vmem:[#allocation2 + $0xb8] sm:$0x7f] }
 0x250   : > { %v3447_v63 = vpack.i.bf16 %v4261_v18, %v4267_v17  ;;  %v1452_v35 = vld [vmem:[#allocation2 + $0xa8] sm:$0xff] }
 0x251   : > { %v1451_v60 = vld [vmem:[#allocation2 + $0xa0] sm:$0xff]  ;;  %v1488_v25 = vmul.f32 %v4040_v48, %v1452_v35 }
 0x252   : > { %3448 = vrot.lane.b32.xlu2 %v3447_v63, %s3528_s30  ;;  %3443 = vrot.lane.b32.xlu1 %v3447_v63, %s3529_s8  ;;  %v1487_v62 = vmul.f32 %v4040_v48, %v1451_v60  ;;  %v2013_v60 = vpack.c.b16 %v1983_v0, %v1982_v29 }
 0x253   : > { %v1524_v30 = vadd.f32 %v4052_v23, %v1488_v25 }
 0x254   : > { %v1199_v55 = vpop.f32.mrf.mxu2  ;;  %v1523_v59 = vadd.f32 %v4052_v23, %v1487_v62  ;;  %v3379_v16 = vpop.permute.xlu0 %3378 }
 0x255   : > { %v1321_v37 = vrot.slane %v1199_v55, 1  ;;  %v1556_v31 = vmax.f32 %v1524_v30, 0.0 }
 0x256   : > { %v1555_v14 = vmax.f32 %v1523_v59, 0.0 }
 0x257   : > { %v1322_v35 = vsel %vm1286_vm5, %v1320_v43, %v1321_v37  ;;  %v1390_v63 = vadd.f32 %v1321_v37, %v1245_v22  ;;  %1588 = vst.msk [vmem:[#allocation3 + $0xa8] sm:$0xff] %vm566_vm1, %v1556_v31  ;;  %v3381_v43 = vunpack.i.h.bf16 %v3379_v16  ;;  %v3380_v37 = vunpack.i.l.bf16 %v3379_v16 }
 0x258   : > { %v1389_v13 = vadd.f32 %v1322_v35, %v1244_v27  ;;  %1587 = vst.msk [vmem:[#allocation3 + $0xa0] sm:$0xff] %vm566_vm1, %v1555_v14 }
 0x259   : > { %1422 = vst.msk [vmem:[#allocation2 + $0xb8] sm:$0x7f] %vm1090_vm4, %v1390_v63  ;;  %v1853_v16 = vsel %vm566_vm1, %v4108_v46, %v3380_v37 }
 0x25a   : > { %1421 = vst.msk [vmem:[#allocation2 + $0xb0] sm:$0xff] %vm566_vm1, %v1389_v13 }
 0x25c   : > { %v1202_v36 = vpop.f32.mrf.mxu2 }
 0x25d   : > { %v1323_v22 = vrot.slane %v1202_v36, 1 }
 0x25e   : > { %v4285_v25 = vld [vmem:[#allocation3 + $0xa8] sm:$0xff]  ;;  %3043 = vmatmul.msk.bf16.gmra.mxu3 %vm752_vm3, %v2013_v60  ;;  %3063 = vmatmul.msk.bf16.gmra.mxu0 %vm752_vm3, %v2013_v60 }
 0x25f   : > { %v4289_v62 = vld [vmem:[#allocation3 + $0xa0] sm:$0xff]  ;;  %3085 = vmatmul.msk.bf16.gmra.mxu1 %vm752_vm3, %v2013_v60  ;;  %v1854_v60 = vsel %vm566_vm1, %v4105_v11, %v3381_v43 }
 0x260   : > { %v3457_v30 = vpack.i.bf16 %v4285_v25, %v4289_v62  ;;  %v1454_v55 = vld [vmem:[#allocation2 + $0xb8] sm:$0xff] }
 0x261   : > { %v1453_v24 = vld [vmem:[#allocation2 + $0xb0] sm:$0xff]  ;;  %v1490_v59 = vmul.f32 %v4040_v48, %v1454_v55 }
 0x262   : > { %3458 = vrot.lane.b32.xlu1 %v3457_v30, %s3528_s30  ;;  %3453 = vrot.lane.b32.xlu0 %v3457_v30, %s3529_s8  ;;  %v1489_v21 = vmul.f32 %v4040_v48, %v1453_v24  ;;  %v1247_v30 = vld [vmem:[#allocation2 + $0xc8] sm:$0x7f]  ;;  %v1246_v24 = vld [vmem:[#allocation2 + $0xc0] sm:$0xff] }
 0x263   : > { %v1526_v31 = vadd.f32 %v4052_v23, %v1490_v59 }
 0x264   : > { %v1204_v14 = vpop.f32.mrf.mxu2  ;;  %v3384_v27 = vpop.permute.xlu1 %3383  ;;  %v1525_v35 = vadd.f32 %v4052_v23, %v1489_v21 }
 0x265   : > { %v1324_v63 = vrot.slane %v1204_v14, 1  ;;  %v3386_v13 = vunpack.i.h.bf16 %v3384_v27  ;;  %v3385_v29 = vunpack.i.l.bf16 %v3384_v27  ;;  %v1558_v0 = vmax.f32 %v1526_v31, 0.0 }
 0x266   : > { %v1557_v55 = vmax.f32 %v1525_v35, 0.0 }
 0x267   : > { %v1325_v59 = vsel %vm1286_vm5, %v1323_v22, %v1324_v63  ;;  %v1392_v36 = vadd.f32 %v1324_v63, %v1247_v30  ;;  %v1886_v8 = vsel %vm599_vm2, %v1854_v60, %v3386_v13  ;;  %v1885_v21 = vsel %vm599_vm2, %v1853_v16, %v3385_v29  ;;  %1590 = vst.msk [vmem:[#allocation3 + $0xb8] sm:$0xff] %vm566_vm1, %v1558_v0  ;;  %v3389_v63 = vpop.permute.xlu2 %3388 }
 0x268   : > { %v1391_v14 = vadd.f32 %v1325_v59, %v1246_v24  ;;  %v1917_v31 = vpack.c.bf16 %v1885_v21, %v1885_v21  ;;  %v1918_v27 = vpack.c.bf16 %v1886_v8, %v1886_v8  ;;  %1589 = vst.msk [vmem:[#allocation3 + $0xb0] sm:$0xff] %vm566_vm1, %v1557_v55  ;;  %v3391_v16 = vunpack.i.h.bf16 %v3389_v63 }
 0x269   : > { %1424 = vst.msk [vmem:[#allocation2 + $0xc8] sm:$0x7f] %vm1090_vm4, %v1392_v36  ;;  %v3390_v55 = vunpack.i.l.bf16 %v3389_v63 }
 0x26a   : > { %1423 = vst.msk [vmem:[#allocation2 + $0xc0] sm:$0xff] %vm566_vm1, %v1391_v14  ;;  %v1984_v11 = vunpack.c.l.b16 %v1917_v31  ;;  %v1985_v46 = vunpack.c.l.b16 %v1918_v27  ;;  %v1249_v27 = vld [vmem:[#allocation2 + $0xd8] sm:$0x7f] }
 0x26b   : > { %v1855_v63 = vsel %vm566_vm1, %v4130_v9, %v3390_v55 }
 0x26c   : > { %v1207_v43 = vpop.f32.mrf.mxu2  ;;  %v2014_v37 = vpack.c.b16 %v1985_v46, %v1984_v11 }
 0x26d   : > { %v1326_v36 = vrot.slane %v1207_v43, 1 }
 0x26e   : > { %v4311_v22 = vld [vmem:[#allocation3 + $0xb8] sm:$0xff]  ;;  %3044 = vmatmul.msk.bf16.gmra.mxu3 %vm752_vm3, %v2014_v37  ;;  %3064 = vmatmul.msk.bf16.gmra.mxu0 %vm752_vm3, %v2014_v37 }
 0x26f   : > { %v4315_v35 = vld [vmem:[#allocation3 + $0xb0] sm:$0xff]  ;;  %3086 = vmatmul.msk.bf16.gmra.mxu1 %vm752_vm3, %v2014_v37  ;;  %v3404_v9 = vpop.permute.xlu2 %3403 }
 0x270   : > { %v3462_v8 = vpack.i.bf16 %v4311_v22, %v4315_v35  ;;  %v1456_v13 = vld [vmem:[#allocation2 + $0xc8] sm:$0xff] }
 0x271   : > { %v1455_v29 = vld [vmem:[#allocation2 + $0xc0] sm:$0xff]  ;;  %v1492_v0 = vmul.f32 %v4040_v48, %v1456_v13  ;;  %v1248_v13 = vld [vmem:[#allocation2 + $0xd0] sm:$0xff] }
 0x272   : > { %3463 = vrot.lane.b32.xlu2 %v3462_v8, %s3529_s8  ;;  %3468 = vrot.lane.b32.xlu0 %v3462_v8, %s3528_s30  ;;  %v1491_v60 = vmul.f32 %v4040_v48, %v1455_v29  ;;  %v1856_v8 = vsel %vm566_vm1, %v4128_v12, %v3391_v16 }
 0x273   : > { %v1528_v30 = vadd.f32 %v4052_v23, %v1492_v0 }
 0x274   : > { %v1209_v24 = vpop.f32.mrf.mxu2  ;;  %v1527_v59 = vadd.f32 %v4052_v23, %v1491_v60  ;;  %v3394_v14 = vpop.permute.xlu0 %3393 }
 0x275   : > { %v1327_v21 = vrot.slane %v1209_v24, 1  ;;  %v1560_v31 = vmax.f32 %v1528_v30, 0.0  ;;  %v3396_v11 = vunpack.i.h.bf16 %v3394_v14  ;;  %v3395_v46 = vunpack.i.l.bf16 %v3394_v14  ;;  %v3399_v0 = vpop.permute.xlu1 %3398 }
 0x276   : > { %v1559_v37 = vmax.f32 %v1527_v59, 0.0  ;;  %v3401_v24 = vunpack.i.h.bf16 %v3399_v0 }
 0x277   : > { %v1328_v29 = vsel %vm1286_vm5, %v1326_v36, %v1327_v21  ;;  %v1394_v7 = vadd.f32 %v1327_v21, %v1249_v27  ;;  %1592 = vst.msk [vmem:[#allocation3 + $0xc8] sm:$0xff] %vm566_vm1, %v1560_v31  ;;  %v1888_v60 = vsel %vm599_vm2, %v1856_v8, %v3396_v11  ;;  %v1887_v30 = vsel %vm599_vm2, %v1855_v63, %v3395_v46 }
 0x278   : > { %v1393_v43 = vadd.f32 %v1328_v29, %v1248_v13  ;;  %1591 = vst.msk [vmem:[#allocation3 + $0xc0] sm:$0xff] %vm566_vm1, %v1559_v37  ;;  %v1920_v12 = vpack.c.bf16 %v1888_v60, %v1888_v60  ;;  %v1919_v16 = vpack.c.bf16 %v1887_v30, %v1887_v30  ;;  %v3400_v36 = vunpack.i.l.bf16 %v3399_v0 }
 0x279   : > { %1426 = vst.msk [vmem:[#allocation2 + $0xd8] sm:$0x7f] %vm1090_vm4, %v1394_v7  ;;  %v1858_v27 = vsel %vm566_vm1, %v4149_v47, %v3401_v24  ;;  %v3406_v8 = vunpack.i.h.bf16 %v3404_v9  ;;  %v3405_v13 = vunpack.i.l.bf16 %v3404_v9 }
 0x27a   : > { %1425 = vst.msk [vmem:[#allocation2 + $0xd0] sm:$0xff] %vm566_vm1, %v1393_v43  ;;  %v1987_v59 = vunpack.c.l.b16 %v1920_v12  ;;  %v1986_v14 = vunpack.c.l.b16 %v1919_v16  ;;  %v1857_v7 = vsel %vm566_vm1, %v4151_v44, %v3400_v36 }
 0x27b   : > { %v1889_v63 = vsel %vm599_vm2, %v1857_v7, %v3405_v13  ;;  %v1890_v43 = vsel %vm599_vm2, %v1858_v27, %v3406_v8 }
 0x27c   : > { %v1212_v21 = vpop.f32.mrf.mxu2  ;;  %v2015_v55 = vpack.c.b16 %v1987_v59, %v1986_v14  ;;  %v1921_v59 = vpack.c.bf16 %v1889_v63, %v1889_v63  ;;  %v1922_v36 = vpack.c.bf16 %v1890_v43, %v1890_v43  ;;  %v1251_v14 = vld [vmem:[#allocation2 + $0xe8] sm:$0x7f]  ;;  %v3516_v43 = vld [vmem:[%s4869_s2] ss:$0 sm:$0xff] }
 0x27d   : > { %v1329_v12 = vrot.slane %v1212_v21, 1 }
 0x27e   : > { %v4337_v31 = vld [vmem:[#allocation3 + $0xc8] sm:$0xff]  ;;  %3045 = vmatmul.msk.bf16.gmra.mxu3 %vm752_vm3, %v2015_v55  ;;  %3065 = vmatmul.msk.bf16.gmra.mxu0 %vm752_vm3, %v2015_v55  ;;  %v1988_v27 = vunpack.c.l.b16 %v1921_v59 }
 0x27f   : > { %v4341_v11 = vld [vmem:[#allocation3 + $0xc0] sm:$0xff]  ;;  %3087 = vmatmul.msk.bf16.gmra.mxu1 %vm752_vm3, %v2015_v55 }
 0x280   : > { %v3477_v46 = vpack.i.bf16 %v4337_v31, %v4341_v11  ;;  %v1458_v37 = vld [vmem:[#allocation2 + $0xd8] sm:$0xff]  ;;  %v1250_v55 = vld [vmem:[#allocation2 + $0xe0] sm:$0xff] }
 0x281   : > { %v1457_v29 = vld [vmem:[#allocation2 + $0xd0] sm:$0xff]  ;;  %v1494_v47 = vmul.f32 %v4040_v48, %v1458_v37 }
 0x282   : > { %3478 = vrot.lane.b32.xlu2 %v3477_v46, %s3528_s30  ;;  %3473 = vrot.lane.b32.xlu1 %v3477_v46, %s3529_s8  ;;  %v1493_v44 = vmul.f32 %v4040_v48, %v1457_v29 }
 0x283   : > { %v1530_v0 = vadd.f32 %v4052_v23, %v1494_v47 }
 0x284   : > { %v1214_v60 = vpop.f32.mrf.mxu2  ;;  %v1529_v30 = vadd.f32 %v4052_v23, %v1493_v44  ;;  %v1989_v23 = vunpack.c.l.b16 %v1922_v36  ;;  %v3409_v13 = vpop.permute.xlu0 %3408 }
 0x285   : > { %v1330_v16 = vrot.slane %v1214_v60, 1  ;;  %v1562_v24 = vmax.f32 %v1530_v0, 0.0  ;;  %v3411_v60 = vunpack.i.h.bf16 %v3409_v13 }
 0x286   : > { %v1561_v9 = vmax.f32 %v1529_v30, 0.0  ;;  %v2016_v37 = vpack.c.b16 %v1989_v23, %v1988_v27  ;;  %v3410_v30 = vunpack.i.l.bf16 %v3409_v13 }
 0x287   : > { %v1331_v46 = vsel %vm1286_vm5, %v1329_v12, %v1330_v16  ;;  %v1396_v48 = vadd.f32 %v1330_v16, %v1251_v14  ;;  %1594 = vst.msk [vmem:[#allocation3 + $0xd8] sm:$0xff] %vm566_vm1, %v1562_v24  ;;  %v3517_v16 = vld [vmem:[%s4870_s3] ss:$0 sm:$0xff]  ;;  %v1860_v27 = vsel %vm566_vm1, %v4168_v15, %v3411_v60 }
 0x288   : > { %v1395_v7 = vadd.f32 %v1331_v46, %v1250_v55  ;;  %1593 = vst.msk [vmem:[#allocation3 + $0xd0] sm:$0xff] %vm566_vm1, %v1561_v9  ;;  %v1859_v23 = vsel %vm566_vm1, %v4170_v49, %v3410_v30 }
 0x289   : > { %1428 = vst.msk [vmem:[#allocation2 + $0xe8] sm:$0x7f] %vm1090_vm4, %v1396_v48 }
 0x28a   : > { %1427 = vst.msk [vmem:[#allocation2 + $0xe0] sm:$0xff] %vm566_vm1, %v1395_v7 }
 0x28c   : > { %v1217_v21 = vpop.f32.mrf.mxu2 }
 0x28d   : > { %v1332_v59 = vrot.slane %v1217_v21, 1 }
 0x28e   : > { %v4363_v8 = vld [vmem:[#allocation3 + $0xd8] sm:$0xff]  ;;  %3046 = vmatmul.msk.bf16.gmra.mxu3 %vm752_vm3, %v2016_v37  ;;  %3066 = vmatmul.msk.bf16.gmra.mxu0 %vm752_vm3, %v2016_v37 }
 0x28f   : > { %v4365_v29 = vld [vmem:[#allocation3 + $0xd0] sm:$0xff]  ;;  %3088 = vmatmul.msk.bf16.gmra.mxu1 %vm752_vm3, %v2016_v37  ;;  %v1253_v37 = vld [vmem:[#allocation2 + $0xf8] sm:$0x7f] }
 0x290   : > { %v3487_v47 = vpack.i.bf16 %v4363_v8, %v4365_v29  ;;  %v1460_v44 = vld [vmem:[#allocation2 + $0xe8] sm:$0xff] }
 0x291   : > { %v1459_v63 = vld [vmem:[#allocation2 + $0xe0] sm:$0xff]  ;;  %v1496_v0 = vmul.f32 %v3516_v43, %v1460_v44 }
 0x292   : > { %3488 = vrot.lane.b32.xlu1 %v3487_v47, %s3528_s30  ;;  %3483 = vrot.lane.b32.xlu0 %v3487_v47, %s3529_s8  ;;  %v1495_v12 = vmul.f32 %v3516_v43, %v1459_v63  ;;  %v1252_v47 = vld [vmem:[#allocation2 + $0xf0] sm:$0xff] }
 0x293   : > { %v1532_v24 = vadd.f32 %v3517_v16, %v1496_v0 }
 0x294   : > { %v1219_v36 = vpop.f32.mrf.mxu2  ;;  %v3414_v14 = vpop.permute.xlu1 %3413  ;;  %v1531_v9 = vadd.f32 %v3517_v16, %v1495_v12 }
 0x295   : > { %v1333_v55 = vrot.slane %v1219_v36, 1  ;;  %v3416_v46 = vunpack.i.h.bf16 %v3414_v14  ;;  %v3415_v48 = vunpack.i.l.bf16 %v3414_v14  ;;  %v1564_v7 = vmax.f32 %v1532_v24, 0.0 }
 0x296   : > { %v1563_v13 = vmax.f32 %v1531_v9, 0.0 }
 0x297   : > { %v1334_v44 = vsel %vm1286_vm5, %v1332_v59, %v1333_v55  ;;  %v1398_v63 = vadd.f32 %v1333_v55, %v1253_v37  ;;  %v1892_v21 = vsel %vm599_vm2, %v1860_v27, %v3416_v46  ;;  %v1891_v0 = vsel %vm599_vm2, %v1859_v23, %v3415_v48  ;;  %1596 = vst.msk [vmem:[#allocation3 + $0xe8] sm:$0xff] %vm566_vm1, %v1564_v7  ;;  %v3419_v59 = vpop.permute.xlu2 %3418 }
 0x298   : > { %v1397_v12 = vadd.f32 %v1334_v44, %v1252_v47  ;;  %v1924_v24 = vpack.c.bf16 %v1892_v21, %v1892_v21  ;;  %v1923_v36 = vpack.c.bf16 %v1891_v0, %v1891_v0  ;;  %1595 = vst.msk [vmem:[#allocation3 + $0xe0] sm:$0xff] %vm566_vm1, %v1563_v13  ;;  %v3421_v7 = vunpack.i.h.bf16 %v3419_v59 }
 0x299   : > { %1430 = vst.msk [vmem:[#allocation2 + $0xf8] sm:$0x7f] %vm1090_vm4, %v1398_v63  ;;  %v3420_v27 = vunpack.i.l.bf16 %v3419_v59 }
 0x29a   : > { %1429 = vst.msk [vmem:[#allocation2 + $0xf0] sm:$0xff] %vm566_vm1, %v1397_v12  ;;  %v1991_v15 = vunpack.c.l.b16 %v1924_v24  ;;  %v1990_v49 = vunpack.c.l.b16 %v1923_v36  ;;  %v1862_v21 = vsel %vm566_vm1, %v4187_v40, %v3421_v7 }
 0x29b   : > { %v1861_v0 = vsel %vm566_vm1, %v4189_v56, %v3420_v27 }
 0x29c   : > { %v2017_v60 = vpack.c.b16 %v1991_v15, %v1990_v49 }
 0x29e   : > { %v4391_v30 = vld [vmem:[#allocation3 + $0xe8] sm:$0xff]  ;;  %3047 = vmatmul.msk.bf16.gmra.mxu3 %vm752_vm3, %v2017_v60  ;;  %3067 = vmatmul.msk.bf16.gmra.mxu0 %vm752_vm3, %v2017_v60 }
 0x29f   : > { %v4393_v14 = vld [vmem:[#allocation3 + $0xe0] sm:$0xff]  ;;  %3089 = vmatmul.msk.bf16.gmra.mxu1 %vm752_vm3, %v2017_v60 }
 0x2a0   : > { %v3492_v9 = vpack.i.bf16 %v4391_v30, %v4393_v14  ;;  %v1462_v55 = vld [vmem:[#allocation2 + $0xf8] sm:$0xff] }
 0x2a1   : > { %v1461_v46 = vld [vmem:[#allocation2 + $0xf0] sm:$0xff]  ;;  %v1498_v48 = vmul.f32 %v3516_v43, %v1462_v55 }
 0x2a2   : > { %3493 = vrot.lane.b32.xlu2 %v3492_v9, %s3529_s8  ;;  %3498 = vrot.lane.b32.xlu0 %v3492_v9, %s3528_s30  ;;  %v1497_v23 = vmul.f32 %v3516_v43, %v1461_v46  ;;  %v3434_v46 = vpop.permute.xlu2 %3433 }
 0x2a3   : > { %v1534_v37 = vadd.f32 %v3517_v16, %v1498_v48 }
 0x2a4   : > { %v3424_v13 = vpop.permute.xlu0 %3423  ;;  %v1533_v47 = vadd.f32 %v3517_v16, %v1497_v23  ;;  %v3429_v43 = vpop.permute.xlu1 %3428  ;;  %v3436_v23 = vunpack.i.h.bf16 %v3434_v46 }
 0x2a5   : > { %v3426_v44 = vunpack.i.h.bf16 %v3424_v13  ;;  %v3425_v63 = vunpack.i.l.bf16 %v3424_v13  ;;  %v1566_v24 = vmax.f32 %v1534_v37, 0.0  ;;  %v3431_v9 = vunpack.i.h.bf16 %v3429_v43 }
 0x2a6   : > { %v1565_v12 = vmax.f32 %v1533_v47, 0.0  ;;  %v3430_v40 = vunpack.i.l.bf16 %v3429_v43  ;;  %v3435_v37 = vunpack.i.l.bf16 %v3434_v46 }
 0x2a7   : > { %v1894_v36 = vsel %vm599_vm2, %v1862_v21, %v3426_v44  ;;  %v1893_v15 = vsel %vm599_vm2, %v1861_v0, %v3425_v63  ;;  %1598 = vst.msk [vmem:[#allocation3 + $0xf8] sm:$0xff] %vm566_vm1, %v1566_v24  ;;  %v1864_v48 = vsel %vm566_vm1, %v4204_v50, %v3431_v9 }
 0x2a8   : > { %v1926_v49 = vpack.c.bf16 %v1894_v36, %v1894_v36  ;;  %v1925_v60 = vpack.c.bf16 %v1893_v15, %v1893_v15  ;;  %1597 = vst.msk [vmem:[#allocation3 + $0xf0] sm:$0xff] %vm566_vm1, %v1565_v12  ;;  %v1863_v7 = vsel %vm566_vm1, %v4206_v32, %v3430_v40  ;;  %v1896_v47 = vsel %vm599_vm2, %v1864_v48, %v3436_v23 }
 0x2a9   : > { %v1895_v44 = vsel %vm599_vm2, %v1863_v7, %v3435_v37  ;;  %v1928_v50 = vpack.c.bf16 %v1896_v47, %v1896_v47 }
 0x2aa   : > { %v1993_v16 = vunpack.c.l.b16 %v1926_v49  ;;  %v1992_v59 = vunpack.c.l.b16 %v1925_v60  ;;  %v1927_v32 = vpack.c.bf16 %v1895_v44, %v1895_v44 }
 0x2ab   : > { %v1995_v63 = vunpack.c.l.b16 %v1928_v50 }
 0x2ac   : > { %v2018_v55 = vpack.c.b16 %v1993_v16, %v1992_v59  ;;  %v1994_v21 = vunpack.c.l.b16 %v1927_v32  ;;  %v3449_v23 = vpop.permute.xlu2 %3448 }
 0x2ad   : > { %v3450_v37 = vunpack.i.l.bf16 %v3449_v23 }
 0x2ae   : > { %3048 = vmatmul.msk.bf16.gmra.mxu3 %vm752_vm3, %v2018_v55  ;;  %3068 = vmatmul.msk.bf16.gmra.mxu0 %vm752_vm3, %v2018_v55  ;;  %v1630_v27 = vld [vmem:[#allocation3 + $0xf8] sm:$0xff]  ;;  %v2019_v0 = vpack.c.b16 %v1995_v63, %v1994_v21 }
 0x2af   : > { %v1629_v56 = vld [vmem:[#allocation3 + $0xf0] sm:$0xff]  ;;  %3090 = vmatmul.msk.bf16.gmra.mxu1 %vm752_vm3, %v2018_v55  ;;  %v1867_v21 = vsel %vm566_vm1, %v4240_v45, %v3450_v37 }
 0x2b0   : > { %v3507_v13 = vpack.i.bf16 %v1630_v27, %v1629_v56 }
 0x2b2   : > { %3508 = vrot.lane.b32.xlu2 %v3507_v13, %s3528_s30  ;;  %3503 = vrot.lane.b32.xlu1 %v3507_v13, %s3529_s8 }
 0x2b4   : > { %v3439_v12 = vpop.permute.xlu0 %3438 }
 0x2b5   : > { %v3441_v24 = vunpack.i.h.bf16 %v3439_v12  ;;  %v3440_v36 = vunpack.i.l.bf16 %v3439_v12 }
 0x2b7   : > { %v1866_v43 = vsel %vm566_vm1, %v4221_v1, %v3441_v24  ;;  %v1865_v16 = vsel %vm566_vm1, %v4223_v20, %v3440_v36  ;;  %v3451_v20 = vunpack.i.h.bf16 %v3449_v23 }
 0x2b9   : > { %v1868_v63 = vsel %vm566_vm1, %v4238_v19, %v3451_v20 }
 0x2be   : > { %3049 = vmatmul.msk.bf16.gmra.mxu3 %vm752_vm3, %v2019_v0  ;;  %3069 = vmatmul.msk.bf16.gmra.mxu0 %vm752_vm3, %v2019_v0 }
 0x2bf   : > { %3091 = vmatmul.msk.bf16.gmra.mxu1 %vm752_vm3, %v2019_v0 }
 0x2c4   : > { %v3444_v15 = vpop.permute.xlu1 %3443 }
 0x2c5   : > { %v3446_v49 = vunpack.i.h.bf16 %v3444_v15  ;;  %v3445_v60 = vunpack.i.l.bf16 %v3444_v15 }
 0x2c7   : > { %v1897_v59 = vsel %vm599_vm2, %v1865_v16, %v3445_v60  ;;  %v1898_v9 = vsel %vm599_vm2, %v1866_v43, %v3446_v49 }
 0x2c8   : > { %v1929_v40 = vpack.c.bf16 %v1897_v59, %v1897_v59  ;;  %v1930_v55 = vpack.c.bf16 %v1898_v9, %v1898_v9 }
 0x2ca   : > { %v1996_v46 = vunpack.c.l.b16 %v1929_v40  ;;  %v1997_v56 = vunpack.c.l.b16 %v1930_v55 }
 0x2cb   : > { %v2224_v48 = vpop.f32.mrf.mxu0 }
 0x2cc   : > { %v2020_v7 = vpack.c.b16 %v1997_v56, %v1996_v46  ;;  %v2420_v27 = vpop.f32.mrf.mxu1  ;;  %v3464_v19 = vpop.permute.xlu2 %3463 }
 0x2cd   : > { %v3466_v56 = vunpack.i.h.bf16 %v3464_v19 }
 0x2ce   : > { %3050 = vmatmul.msk.bf16.gmra.mxu3 %vm752_vm3, %v2020_v7  ;;  %3070 = vmatmul.msk.bf16.gmra.mxu0 %vm752_vm3, %v2020_v7 }
 0x2cf   : > { %3092 = vmatmul.msk.bf16.gmra.mxu1 %vm752_vm3, %v2020_v7  ;;  %v3465_v7 = vunpack.i.l.bf16 %v3464_v19 }
 0x2d1   : > { %v2093_v1 = vpop.f32.mrf.mxu3 }
 0x2d2   : > { %2173 = vst.msk [vmem:[#allocation2] sm:$0xff] %vm566_vm1, %v2093_v1 }
 0x2d3   : > { %v2226_v13 = vpop.f32.mrf.mxu0 }
 0x2d4   : > { %v2422_v47 = vpop.f32.mrf.mxu1  ;;  %v3454_v44 = vpop.permute.xlu0 %3453 }
 0x2d5   : > { %v3456_v50 = vunpack.i.h.bf16 %v3454_v44  ;;  %v3455_v32 = vunpack.i.l.bf16 %v3454_v44  ;;  %v3459_v12 = vpop.permute.xlu1 %3458 }
 0x2d6   : > { %v3461_v43 = vunpack.i.h.bf16 %v3459_v12  ;;  %v3460_v16 = vunpack.i.l.bf16 %v3459_v12  ;;  %v2564_v12 = vrot.slane %v2420_v27, 1 }
 0x2d7   : > { %v1900_v0 = vsel %vm599_vm2, %v1868_v63, %v3456_v50  ;;  %v1899_v36 = vsel %vm599_vm2, %v1867_v21, %v3455_v32 }
 0x2d8   : > { %v1932_v24 = vpack.c.bf16 %v1900_v0, %v1900_v0  ;;  %v1931_v15 = vpack.c.bf16 %v1899_v36, %v1899_v36  ;;  %v1870_v45 = vsel %vm566_vm1, %v4261_v18, %v3461_v43  ;;  %v1869_v46 = vsel %vm566_vm1, %v4267_v17, %v3460_v16 }
 0x2d9   : > { %v2095_v49 = vpop.f32.mrf.mxu3  ;;  %v1902_v37 = vsel %vm599_vm2, %v1870_v45, %v3466_v56  ;;  %v1901_v44 = vsel %vm599_vm2, %v1869_v46, %v3465_v7  ;;  %v2565_v0 = vrot.slane %v2422_v47, 1  ;;  %v4471_v7 = vld [vmem:[%s4872_s5] ss:$0 sm:$0xff] }
 0x2da   : > { %v1999_v60 = vunpack.c.l.b16 %v1932_v24  ;;  %2174 = vst.msk [vmem:[#allocation2 + $0x8] sm:$0xff] %vm566_vm1, %v2095_v49  ;;  %v1998_v59 = vunpack.c.l.b16 %v1931_v15  ;;  %v1934_v63 = vpack.c.bf16 %v1902_v37, %v1902_v37  ;;  %v1933_v21 = vpack.c.bf16 %v1901_v44, %v1901_v44  ;;  %v4477_v44 = vld [vmem:[%s4873_s6] ss:$0 sm:$0xff] }
 0x2db   : > { %v2229_v9 = vpop.f32.mrf.mxu0 }
 0x2dc   : > { %v4441_v40 = vpop.f32.mrf.mxu1  ;;  %v2021_v55 = vpack.c.b16 %v1999_v60, %v1998_v59  ;;  %v2001_v24 = vunpack.c.l.b16 %v1934_v63  ;;  %v2000_v36 = vunpack.c.l.b16 %v1933_v21 }
 0x2de   : > { %3051 = vmatmul.msk.bf16.gmra.mxu3 %vm752_vm3, %v2021_v55  ;;  %3071 = vmatmul.msk.bf16.gmra.mxu0 %vm752_vm3, %v2021_v55  ;;  %v2022_v19 = vpack.c.b16 %v2001_v24, %v2000_v36 }
 0x2df   : > { %3093 = vmatmul.msk.bf16.gmra.mxu1 %vm752_vm3, %v2021_v55 }
 0x2e1   : > { %v2304_v23 = vld [vmem:[#allocation2 + $0x1] sm:$0xff]  ;;  %v2305_v1 = vld [vmem:[#allocation2 + $0x9] sm:$0x7f]  ;;  %v2098_v20 = vpop.f32.mrf.mxu3 }
 0x2e2   : > { %v2336_v50 = vadd.f32 %v2304_v23, %v2224_v48  ;;  %v2337_v18 = vadd.f32 %v2305_v1, %v2226_v13  ;;  %2175 = vst.msk [vmem:[#allocation2 + $0x10] sm:$0xff] %vm566_vm1, %v2098_v20  ;;  %v2566_v48 = vsel %vm1286_vm5, %v2564_v12, %v2565_v0 }
 0x2e3   : > { %v2231_v17 = vpop.f32.mrf.mxu0 }
 0x2e4   : > { %2368 = vst.msk [vmem:[#allocation2 + $0x1] sm:$0xff] %vm566_vm1, %v2336_v50  ;;  %v4454_v32 = vpop.f32.mrf.mxu1  ;;  %v3469_v47 = vpop.permute.xlu0 %3468 }
 0x2e5   : > { %2369 = vst.msk [vmem:[#allocation2 + $0x9] sm:$0x7f] %vm1090_vm4, %v2337_v18  ;;  %v3471_v27 = vunpack.i.h.bf16 %v3469_v47  ;;  %v3470_v55 = vunpack.i.l.bf16 %v3469_v47 }
 0x2e9   : > { %v2100_v15 = vpop.f32.mrf.mxu3 }
 0x2ea   : > { %2176 = vst.msk [vmem:[#allocation2 + $0x18] sm:$0xff] %vm566_vm1, %v2100_v15 }
 0x2eb   : > { %v2500_v13 = vld [vmem:[#allocation2] sm:$0xff]  ;;  %v4459_v49 = vpop.f32.mrf.mxu0 }
 0x2ec   : > { %v2501_v60 = vld [vmem:[#allocation2 + $0x8] sm:$0x7f]  ;;  %v2644_v43 = vadd.f32 %v2566_v48, %v2500_v13  ;;  %v4461_v16 = vpop.f32.mrf.mxu1  ;;  %v2568_v48 = vrot.slane %v4454_v32, 1 }
 0x2ed   : > { %v2645_v59 = vadd.f32 %v2565_v0, %v2501_v60 }
 0x2ee   : > { %2676 = vst.msk [vmem:[#allocation2] sm:$0xff] %vm566_vm1, %v2644_v43  ;;  %3052 = vmatmul.msk.bf16.gmra.mxu3 %vm752_vm3, %v2022_v19  ;;  %3072 = vmatmul.msk.bf16.gmra.mxu0 %vm752_vm3, %v2022_v19  ;;  %v2567_v43 = vrot.slane %v4441_v40, 1 }
 0x2ef   : > { %2677 = vst.msk [vmem:[#allocation2 + $0x8] sm:$0x7f] %vm1090_vm4, %v2645_v59  ;;  %3094 = vmatmul.msk.bf16.gmra.mxu1 %vm752_vm3, %v2022_v19 }
 0x2f1   : > { %v2306_v45 = vld [vmem:[#allocation2 + $0x11] sm:$0xff]  ;;  %v2307_v46 = vld [vmem:[#allocation2 + $0x19] sm:$0x7f]  ;;  %v2103_v56 = vpop.f32.mrf.mxu3 }
 0x2f2   : > { %v2338_v23 = vadd.f32 %v2306_v45, %v2229_v9  ;;  %v2339_v1 = vadd.f32 %v2307_v46, %v2231_v17  ;;  %2177 = vst.msk [vmem:[#allocation2 + $0x20] sm:$0xff] %vm566_vm1, %v2103_v56  ;;  %v1872_v9 = vsel %vm566_vm1, %v4285_v25, %v3471_v27  ;;  %v1871_v17 = vsel %vm566_vm1, %v4289_v62, %v3470_v55 }
 0x2f3   : > { %v2236_v20 = vpop.f32.mrf.mxu0  ;;  %v2569_v55 = vsel %vm1286_vm5, %v2567_v43, %v2568_v48 }
 0x2f4   : > { %v3474_v37 = vpop.permute.xlu1 %3473  ;;  %2370 = vst.msk [vmem:[#allocation2 + $0x11] sm:$0xff] %vm566_vm1, %v2338_v23  ;;  %v4480_v50 = vpop.f32.mrf.mxu1 }
 0x2f5   : > { %v3476_v18 = vunpack.i.h.bf16 %v3474_v37  ;;  %v3475_v63 = vunpack.i.l.bf16 %v3474_v37  ;;  %v2708_v21 = vld [vmem:[#allocation2] sm:$0xff]  ;;  %2371 = vst.msk [vmem:[#allocation2 + $0x19] sm:$0x7f] %vm1090_vm4, %v2339_v1  ;;  %v2571_v43 = vrot.slane %v4480_v50, 1 }
 0x2f6   : > { %v2709_v0 = vld [vmem:[#allocation2 + $0x8] sm:$0xff]  ;;  %v2744_v12 = vmul.f32 %v4471_v7, %v2708_v21 }
 0x2f7   : > { %v1903_v24 = vsel %vm599_vm2, %v1871_v17, %v3475_v63  ;;  %v1904_v36 = vsel %vm599_vm2, %v1872_v9, %v3476_v18  ;;  %v2745_v15 = vmul.f32 %v4471_v7, %v2709_v0  ;;  %v3479_v63 = vpop.permute.xlu2 %3478 }
 0x2f8   : > { %v1935_v13 = vpack.c.bf16 %v1903_v24, %v1903_v24  ;;  %v1936_v60 = vpack.c.bf16 %v1904_v36, %v1904_v36  ;;  %v2780_v25 = vadd.f32 %v4477_v44, %v2744_v12  ;;  %v3480_v17 = vunpack.i.l.bf16 %v3479_v63 }
 0x2f9   : > { %v2781_v62 = vadd.f32 %v4477_v44, %v2745_v15  ;;  %v2105_v47 = vpop.f32.mrf.mxu3 }
 0x2fa   : > { %v2002_v59 = vunpack.c.l.b16 %v1935_v13  ;;  %v2003_v19 = vunpack.c.l.b16 %v1936_v60  ;;  %v2812_v27 = vadd.f32 %v3663_v33, %v2780_v25  ;;  %2178 = vst.msk [vmem:[#allocation2 + $0x28] sm:$0xff] %vm566_vm1, %v2105_v47 }
 0x2fb   : > { %v2813_v32 = vadd.f32 %v3665_v34, %v2781_v62  ;;  %v2502_v45 = vld [vmem:[#allocation2 + $0x10] sm:$0xff]  ;;  %v4505_v1 = vpop.f32.mrf.mxu0  ;;  %v3481_v34 = vunpack.i.h.bf16 %v3479_v63 }
 0x2fc   : > { %v2023_v40 = vpack.c.b16 %v2003_v19, %v2002_v59  ;;  %v2844_v46 = vmax.f32 %v2812_v27, 0.0  ;;  %v2503_v56 = vld [vmem:[#allocation2 + $0x18] sm:$0x7f]  ;;  %v2646_v23 = vadd.f32 %v2569_v55, %v2502_v45  ;;  %v4507_v18 = vpop.f32.mrf.mxu1 }
 0x2fd   : > { %v2845_v33 = vmax.f32 %v2813_v32, 0.0  ;;  %v2647_v37 = vadd.f32 %v2568_v48, %v2503_v56  ;;  %v1874_v60 = vsel %vm566_vm1, %v4311_v22, %v3481_v34  ;;  %v2570_v32 = vrot.slane %v4461_v16, 1 }
 0x2fe   : > { %2876 = vst.msk [vmem:[%s4501_s29] sm:$0xff] %vm566_vm1, %v2844_v46  ;;  %3053 = vmatmul.msk.bf16.gmra.mxu3 %vm752_vm3, %v2023_v40  ;;  %3073 = vmatmul.msk.bf16.gmra.mxu0 %vm752_vm3, %v2023_v40 }
 0x2ff   : > { %2877 = vst.msk [vmem:[%s4501_s29 + $0x8] sm:$0xff] %vm566_vm1, %v2845_v33  ;;  %3095 = vmatmul.msk.bf16.gmra.mxu1 %vm752_vm3, %v2023_v40  ;;  %v2572_v50 = vsel %vm1286_vm5, %v2570_v32, %v2571_v43 }
 0x300   : > { %2678 = vst.msk [vmem:[#allocation2 + $0x10] sm:$0xff] %vm566_vm1, %v2646_v23 }
 0x301   : > { %2679 = vst.msk [vmem:[#allocation2 + $0x18] sm:$0x7f] %vm1090_vm4, %v2647_v37  ;;  %v2308_v21 = vld [vmem:[#allocation2 + $0x21] sm:$0xff]  ;;  %v2309_v9 = vld [vmem:[#allocation2 + $0x29] sm:$0x7f]  ;;  %v2108_v24 = vpop.f32.mrf.mxu3 }
 0x302   : > { %v2340_v0 = vadd.f32 %v2308_v21, %v4459_v49  ;;  %v2341_v12 = vadd.f32 %v2309_v9, %v2236_v20  ;;  %2179 = vst.msk [vmem:[#allocation2 + $0x30] sm:$0xff] %vm566_vm1, %v2108_v24  ;;  %v1873_v49 = vsel %vm566_vm1, %v4315_v35, %v3480_v17 }
 0x303   : > { %v2241_v15 = vpop.f32.mrf.mxu0 }
 0x304   : > { %v3484_v36 = vpop.permute.xlu0 %3483  ;;  %2372 = vst.msk [vmem:[#allocation2 + $0x21] sm:$0xff] %vm566_vm1, %v2340_v0  ;;  %v4524_v25 = vpop.f32.mrf.mxu1 }
 0x305   : > { %v3486_v48 = vunpack.i.h.bf16 %v3484_v36  ;;  %v3485_v13 = vunpack.i.l.bf16 %v3484_v36  ;;  %2373 = vst.msk [vmem:[#allocation2 + $0x29] sm:$0x7f] %vm1090_vm4, %v2341_v12  ;;  %v3489_v55 = vpop.permute.xlu1 %3488  ;;  %v3494_v36 = vpop.permute.xlu2 %3493 }
 0x306   : > { %v3491_v16 = vunpack.i.h.bf16 %v3489_v55  ;;  %v3490_v21 = vunpack.i.l.bf16 %v3489_v55 }
 0x307   : > { %v1906_v20 = vsel %vm599_vm2, %v1874_v60, %v3486_v48  ;;  %v2710_v62 = vld [vmem:[#allocation2 + $0x10] sm:$0xff]  ;;  %v1905_v19 = vsel %vm599_vm2, %v1873_v49, %v3485_v13  ;;  %v3495_v49 = vunpack.i.l.bf16 %v3494_v36 }
 0x308   : > { %v1938_v59 = vpack.c.bf16 %v1906_v20, %v1906_v20  ;;  %v2711_v47 = vld [vmem:[#allocation2 + $0x18] sm:$0xff]  ;;  %v2746_v27 = vmul.f32 %v4471_v7, %v2710_v62  ;;  %v1937_v45 = vpack.c.bf16 %v1905_v19, %v1905_v19  ;;  %v1875_v60 = vsel %vm566_vm1, %v4341_v11, %v3490_v21 }
 0x309   : > { %v2747_v22 = vmul.f32 %v4471_v7, %v2711_v47  ;;  %v2110_v46 = vpop.f32.mrf.mxu3 }
 0x30a   : > { %v2782_v40 = vadd.f32 %v4477_v44, %v2746_v27  ;;  %v2005_v35 = vunpack.c.l.b16 %v1938_v59  ;;  %v2004_v33 = vunpack.c.l.b16 %v1937_v45  ;;  %2180 = vst.msk [vmem:[#allocation2 + $0x38] sm:$0xff] %vm566_vm1, %v2110_v46 }
 0x30b   : > { %v2783_v56 = vadd.f32 %v4477_v44, %v2747_v22  ;;  %v2504_v23 = vld [vmem:[#allocation2 + $0x20] sm:$0xff]  ;;  %v4539_v9 = vpop.f32.mrf.mxu0 }
 0x30c   : > { %v2814_v37 = vadd.f32 %v3672_v38, %v2782_v40  ;;  %v2505_v63 = vld [vmem:[#allocation2 + $0x28] sm:$0x7f]  ;;  %v2648_v34 = vadd.f32 %v2572_v50, %v2504_v23  ;;  %v4542_v12 = vpop.f32.mrf.mxu1  ;;  %v2024_v48 = vpack.c.b16 %v2005_v35, %v2004_v33  ;;  %v1876_v38 = vsel %vm566_vm1, %v4337_v31, %v3491_v16 }
 0x30d   : > { %v2815_v17 = vadd.f32 %v3674_v39, %v2783_v56  ;;  %v2649_v0 = vadd.f32 %v2571_v43, %v2505_v63  ;;  %v3496_v39 = vunpack.i.h.bf16 %v3494_v36  ;;  %v1907_v31 = vsel %vm599_vm2, %v1875_v60, %v3495_v49 }
 0x30e   : > { %v2846_v24 = vmax.f32 %v2814_v37, 0.0  ;;  %2680 = vst.msk [vmem:[#allocation2 + $0x20] sm:$0xff] %vm566_vm1, %v2648_v34  ;;  %3054 = vmatmul.msk.bf16.gmra.mxu3 %vm752_vm3, %v2024_v48  ;;  %3074 = vmatmul.msk.bf16.gmra.mxu0 %vm752_vm3, %v2024_v48  ;;  %v1939_v40 = vpack.c.bf16 %v1907_v31, %v1907_v31  ;;  %v2573_v50 = vrot.slane %v4507_v18, 1 }
 0x30f   : > { %v2847_v13 = vmax.f32 %v2815_v17, 0.0  ;;  %2681 = vst.msk [vmem:[#allocation2 + $0x28] sm:$0x7f] %vm1090_vm4, %v2649_v0  ;;  %3096 = vmatmul.msk.bf16.gmra.mxu1 %vm752_vm3, %v2024_v48  ;;  %v1908_v59 = vsel %vm599_vm2, %v1876_v38, %v3496_v39 }
 0x310   : > { %2878 = vst.msk [vmem:[%s4501_s29 + $0x10] sm:$0xff] %vm566_vm1, %v2846_v24  ;;  %v1940_v45 = vpack.c.bf16 %v1908_v59, %v1908_v59  ;;  %v2006_v33 = vunpack.c.l.b16 %v1939_v40  ;;  %v3509_v40 = vpop.permute.xlu2 %3508 }
 0x311   : > { %2879 = vst.msk [vmem:[%s4501_s29 + $0x18] sm:$0xff] %vm566_vm1, %v2847_v13  ;;  %v2310_v20 = vld [vmem:[#allocation2 + $0x31] sm:$0xff]  ;;  %v2311_v62 = vld [vmem:[#allocation2 + $0x39] sm:$0x7f]  ;;  %v2113_v43 = vpop.f32.mrf.mxu3 }
 0x312   : > { %v2342_v19 = vadd.f32 %v2310_v20, %v4505_v1  ;;  %v2343_v11 = vadd.f32 %v2311_v62, %v2241_v15  ;;  %2181 = vst.msk [vmem:[#allocation2 + $0x40] sm:$0xff] %vm566_vm1, %v2113_v43  ;;  %v2574_v15 = vrot.slane %v4524_v25, 1  ;;  %v2007_v23 = vunpack.c.l.b16 %v1940_v45 }
 0x313   : > { %v2246_v47 = vpop.f32.mrf.mxu0 }
 0x314   : > { %2374 = vst.msk [vmem:[#allocation2 + $0x31] sm:$0xff] %vm566_vm1, %v2342_v19  ;;  %v4562_v22 = vpop.f32.mrf.mxu1  ;;  %v2575_v16 = vsel %vm1286_vm5, %v2573_v50, %v2574_v15  ;;  %v2025_v36 = vpack.c.b16 %v2007_v23, %v2006_v33 }
 0x315   : > { %v2712_v27 = vld [vmem:[#allocation2 + $0x20] sm:$0xff]  ;;  %2375 = vst.msk [vmem:[#allocation2 + $0x39] sm:$0x7f] %vm1090_vm4, %v2343_v11 }
 0x316   : > { %v2713_v32 = vld [vmem:[#allocation2 + $0x28] sm:$0xff]  ;;  %v2748_v55 = vmul.f32 %v4471_v7, %v2712_v27 }
 0x317   : > { %v2749_v35 = vmul.f32 %v4471_v7, %v2713_v32 }
 0x318   : > { %v2784_v1 = vadd.f32 %v4477_v44, %v2748_v55 }
 0x319   : > { %v2785_v46 = vadd.f32 %v4477_v44, %v2749_v35  ;;  %v2115_v37 = vpop.f32.mrf.mxu3  ;;  %v2577_v35 = vrot.slane %v4562_v22, 1  ;;  %v3510_v22 = vunpack.i.l.bf16 %v3509_v40 }
 0x31a   : > { %v2816_v56 = vadd.f32 %v3677_v41, %v2784_v1  ;;  %2182 = vst.msk [vmem:[#allocation2 + $0x48] sm:$0xff] %vm566_vm1, %v2115_v37  ;;  %v3511_v37 = vunpack.i.h.bf16 %v3509_v40 }
 0x31b   : > { %v2817_v63 = vadd.f32 %v3679_v42, %v2785_v46  ;;  %v2506_v21 = vld [vmem:[#allocation2 + $0x30] sm:$0xff]  ;;  %v4575_v25 = vpop.f32.mrf.mxu0  ;;  %v3499_v42 = vpop.permute.xlu0 %3498 }
 0x31c   : > { %v2848_v34 = vmax.f32 %v2816_v56, 0.0  ;;  %v2507_v0 = vld [vmem:[#allocation2 + $0x38] sm:$0x7f]  ;;  %v2650_v24 = vadd.f32 %v2575_v16, %v2506_v21  ;;  %v4577_v41 = vpop.f32.mrf.mxu1  ;;  %v3501_v48 = vunpack.i.h.bf16 %v3499_v42  ;;  %v3500_v13 = vunpack.i.l.bf16 %v3499_v42 }
 0x31d   : > { %v2849_v17 = vmax.f32 %v2817_v63, 0.0  ;;  %v2651_v18 = vadd.f32 %v2574_v15, %v2507_v0 }
 0x31e   : > { %2880 = vst.msk [vmem:[%s4501_s29 + $0x20] sm:$0xff] %vm566_vm1, %v2848_v34  ;;  %3055 = vmatmul.msk.bf16.gmra.mxu3 %vm752_vm3, %v2025_v36  ;;  %3075 = vmatmul.msk.bf16.gmra.mxu0 %vm752_vm3, %v2025_v36  ;;  %v1878_v11 = vsel %vm566_vm1, %v4363_v8, %v3501_v48  ;;  %v1877_v27 = vsel %vm566_vm1, %v4365_v29, %v3500_v13  ;;  %v2576_v29 = vrot.slane %v4542_v12, 1 }
 0x31f   : > { %2881 = vst.msk [vmem:[%s4501_s29 + $0x28] sm:$0xff] %vm566_vm1, %v2849_v17  ;;  %3097 = vmatmul.msk.bf16.gmra.mxu1 %vm752_vm3, %v2025_v36  ;;  %v1879_v13 = vsel %vm566_vm1, %v4393_v14, %v3510_v22 }
 0x320   : > { %2682 = vst.msk [vmem:[#allocation2 + $0x30] sm:$0xff] %vm566_vm1, %v2650_v24  ;;  %v2578_v34 = vsel %vm1286_vm5, %v2576_v29, %v2577_v35 }
 0x321   : > { %2683 = vst.msk [vmem:[#allocation2 + $0x38] sm:$0x7f] %vm1090_vm4, %v2651_v18  ;;  %v2312_v38 = vld [vmem:[#allocation2 + $0x41] sm:$0xff]  ;;  %v2313_v60 = vld [vmem:[#allocation2 + $0x49] sm:$0x7f]  ;;  %v2118_v39 = vpop.f32.mrf.mxu3 }
 0x322   : > { %v2344_v49 = vadd.f32 %v2312_v38, %v4539_v9  ;;  %v2345_v20 = vadd.f32 %v2313_v60, %v2246_v47  ;;  %2183 = vst.msk [vmem:[#allocation2 + $0x50] sm:$0xff] %vm566_vm1, %v2118_v39 }
 0x323   : > { %v2251_v62 = vpop.f32.mrf.mxu0 }
 0x324   : > { %v3504_v43 = vpop.permute.xlu1 %3503  ;;  %2376 = vst.msk [vmem:[#allocation2 + $0x41] sm:$0xff] %vm566_vm1, %v2344_v49  ;;  %v4591_v59 = vpop.f32.mrf.mxu1 }
 0x325   : > { %v3506_v31 = vunpack.i.h.bf16 %v3504_v43  ;;  %v3505_v19 = vunpack.i.l.bf16 %v3504_v43  ;;  %2377 = vst.msk [vmem:[#allocation2 + $0x49] sm:$0x7f] %vm1090_vm4, %v2345_v20 }
 0x327   : > { %v2714_v9 = vld [vmem:[#allocation2 + $0x30] sm:$0xff]  ;;  %v1909_v47 = vsel %vm599_vm2, %v1877_v27, %v3505_v19  ;;  %v1910_v32 = vsel %vm599_vm2, %v1878_v11, %v3506_v31 }
 0x328   : > { %v2715_v55 = vld [vmem:[#allocation2 + $0x38] sm:$0xff]  ;;  %v2750_v45 = vmul.f32 %v4471_v7, %v2714_v9  ;;  %v1941_v1 = vpack.c.bf16 %v1909_v47, %v1909_v47  ;;  %v1942_v15 = vpack.c.bf16 %v1910_v32, %v1910_v32  ;;  %v2580_v9 = vrot.slane %v4591_v59, 1 }
 0x329   : > { %v2751_v8 = vmul.f32 %v4471_v7, %v2715_v55  ;;  %v2120_v23 = vpop.f32.mrf.mxu3  ;;  %v2579_v55 = vrot.slane %v4577_v41, 1 }
 0x32a   : > { %v2786_v46 = vadd.f32 %v4477_v44, %v2750_v45  ;;  %v2008_v56 = vunpack.c.l.b16 %v1941_v1  ;;  %v2009_v50 = vunpack.c.l.b16 %v1942_v15  ;;  %2184 = vst.msk [vmem:[#allocation2 + $0x58] sm:$0xff] %vm566_vm1, %v2120_v23 }
 0x32b   : > { %v2787_v33 = vadd.f32 %v4477_v44, %v2751_v8  ;;  %v2508_v16 = vld [vmem:[#allocation2 + $0x40] sm:$0xff]  ;;  %v4609_v21 = vpop.f32.mrf.mxu0  ;;  %v2581_v1 = vsel %vm1286_vm5, %v2579_v55, %v2580_v9 }
 0x32c   : > { %v2818_v63 = vadd.f32 %v3710_v57, %v2786_v46  ;;  %v2026_v17 = vpack.c.b16 %v2009_v50, %v2008_v56  ;;  %v2509_v0 = vld [vmem:[#allocation2 + $0x48] sm:$0x7f]  ;;  %v2652_v24 = vadd.f32 %v2578_v34, %v2508_v16  ;;  %v4612_v18 = vpop.f32.mrf.mxu1  ;;  %v1880_v57 = vsel %vm566_vm1, %v4391_v30, %v3511_v37 }
 0x32d   : > { %v2819_v12 = vadd.f32 %v3712_v58, %v2787_v33  ;;  %v2653_v42 = vadd.f32 %v2577_v35, %v2509_v0  ;;  %v1912_v39 = vsel %vm599_vm2, %v1880_v57, %v3836_v61  ;;  %v1911_v30 = vsel %vm599_vm2, %v1879_v13, %v3836_v61 }
 0x32e   : > { %v2850_v36 = vmax.f32 %v2818_v63, 0.0  ;;  %2684 = vst.msk [vmem:[#allocation2 + $0x40] sm:$0xff] %vm566_vm1, %v2652_v24  ;;  %3056 = vmatmul.msk.bf16.gmra.mxu3 %vm752_vm3, %v2026_v17  ;;  %3076 = vmatmul.msk.bf16.gmra.mxu0 %vm752_vm3, %v2026_v17  ;;  %v1944_v31 = vpack.c.bf16 %v1912_v39, %v1912_v39  ;;  %v1943_v19 = vpack.c.bf16 %v1911_v30, %v1911_v30 }
 0x32f   : > { %v2851_v48 = vmax.f32 %v2819_v12, 0.0  ;;  %3098 = vmatmul.msk.bf16.gmra.mxu1 %vm752_vm3, %v2026_v17  ;;  %2685 = vst.msk [vmem:[#allocation2 + $0x48] sm:$0x7f] %vm1090_vm4, %v2653_v42 }
 0x330   : > { %2882 = vst.msk [vmem:[%s4501_s29 + $0x30] sm:$0xff] %vm566_vm1, %v2850_v36  ;;  %v2010_v47 = vunpack.c.l.b16 %v1943_v19 }
 0x331   : > { %2883 = vst.msk [vmem:[%s4501_s29 + $0x38] sm:$0xff] %vm566_vm1, %v2851_v48  ;;  %v2314_v58 = vld [vmem:[#allocation2 + $0x51] sm:$0xff]  ;;  %v2315_v38 = vld [vmem:[#allocation2 + $0x59] sm:$0x7f]  ;;  %v2123_v60 = vpop.f32.mrf.mxu3 }
 0x332   : > { %v2346_v14 = vadd.f32 %v2314_v58, %v4575_v25  ;;  %v2347_v49 = vadd.f32 %v2315_v38, %v2251_v62  ;;  %2185 = vst.msk [vmem:[#allocation2 + $0x60] sm:$0xff] %vm566_vm1, %v2123_v60  ;;  %v2011_v62 = vunpack.c.l.b16 %v1944_v31 }
 0x333   : > { %v2256_v20 = vpop.f32.mrf.mxu0 }
 0x334   : > { %2378 = vst.msk [vmem:[#allocation2 + $0x51] sm:$0xff] %vm566_vm1, %v2346_v14  ;;  %v4634_v43 = vpop.f32.mrf.mxu1  ;;  %v2027_v23 = vpack.c.b16 %v2011_v62, %v2010_v47 }
 0x335   : > { %v2716_v11 = vld [vmem:[#allocation2 + $0x40] sm:$0xff]  ;;  %2379 = vst.msk [vmem:[#allocation2 + $0x59] sm:$0x7f] %vm1090_vm4, %v2347_v49  ;;  %v2583_v24 = vrot.slane %v4634_v43, 1 }
 0x336   : > { %v2752_v27 = vmul.f32 %v4471_v7, %v2716_v11  ;;  %v2717_v61 = vld [vmem:[#allocation2 + $0x48] sm:$0xff] }
 0x337   : > { %v2753_v32 = vmul.f32 %v4471_v7, %v2717_v61 }
 0x338   : > { %v2788_v25 = vadd.f32 %v4477_v44, %v2752_v27 }
 0x339   : > { %v2125_v45 = vpop.f32.mrf.mxu3  ;;  %v2789_v35 = vadd.f32 %v4477_v44, %v2753_v32 }
 0x33a   : > { %v2820_v40 = vadd.f32 %v3743_v51, %v2788_v25  ;;  %2186 = vst.msk [vmem:[#allocation2 + $0x68] sm:$0xff] %vm566_vm1, %v2125_v45 }
 0x33b   : > { %v2510_v59 = vld [vmem:[#allocation2 + $0x50] sm:$0xff]  ;;  %v2259_v15 = vpop.f32.mrf.mxu0  ;;  %v2821_v50 = vadd.f32 %v3745_v52, %v2789_v35 }
 0x33c   : > { %v2852_v8 = vmax.f32 %v2820_v40, 0.0  ;;  %v2511_v46 = vld [vmem:[#allocation2 + $0x58] sm:$0x7f]  ;;  %v2654_v29 = vadd.f32 %v2581_v1, %v2510_v59  ;;  %v4646_v56 = vpop.f32.mrf.mxu1 }
 0x33d   : > { %v2655_v41 = vadd.f32 %v2580_v9, %v2511_v46  ;;  %v2853_v51 = vmax.f32 %v2821_v50, 0.0  ;;  %v2585_v45 = vrot.slane %v4646_v56, 1 }
 0x33e   : > { %2884 = vst.msk [vmem:[%s4501_s29 + $0x40] sm:$0xff] %vm566_vm1, %v2852_v8  ;;  %3057 = vmatmul.msk.bf16.gmra.mxu3 %vm752_vm3, %v2027_v23  ;;  %3077 = vmatmul.msk.bf16.gmra.mxu0 %vm752_vm3, %v2027_v23 }
 0x33f   : > { %2686 = vst.msk [vmem:[#allocation2 + $0x50] sm:$0xff] %vm566_vm1, %v2654_v29  ;;  %3099 = vmatmul.msk.bf16.gmra.mxu1 %vm752_vm3, %v2027_v23 }
 0x340   : > { %2687 = vst.msk [vmem:[#allocation2 + $0x58] sm:$0x7f] %vm1090_vm4, %v2655_v41 }
 0x341   : > { %2885 = vst.msk [vmem:[%s4501_s29 + $0x48] sm:$0xff] %vm566_vm1, %v2853_v51  ;;  %v2316_v33 = vld [vmem:[#allocation2 + $0x61] sm:$0xff]  ;;  %v2317_v37 = vld [vmem:[#allocation2 + $0x69] sm:$0x7f]  ;;  %v2128_v52 = vpop.f32.mrf.mxu3 }
 0x342   : > { %v2348_v63 = vadd.f32 %v2316_v33, %v4609_v21  ;;  %v2349_v22 = vadd.f32 %v2317_v37, %v2256_v20  ;;  %2187 = vst.msk [vmem:[#allocation2 + $0x70] sm:$0xff] %vm566_vm1, %v2128_v52  ;;  %v2582_v21 = vrot.slane %v4612_v18, 1 }
 0x343   : > { %v2261_v34 = vpop.f32.mrf.mxu0 }
 0x344   : > { %2380 = vst.msk [vmem:[#allocation2 + $0x61] sm:$0xff] %vm566_vm1, %v2348_v63  ;;  %v2457_v16 = vpop.f32.mrf.mxu1  ;;  %v2584_v58 = vsel %vm1286_vm5, %v2582_v21, %v2583_v24 }
 0x345   : > { %2381 = vst.msk [vmem:[#allocation2 + $0x69] sm:$0x7f] %vm1090_vm4, %v2349_v22  ;;  %v2586_v62 = vrot.slane %v2457_v16, 1 }
 0x346   : > { %v2718_v17 = vld [vmem:[#allocation2 + $0x50] sm:$0xff] }
 0x347   : > { %v2719_v12 = vld [vmem:[#allocation2 + $0x58] sm:$0xff]  ;;  %v2754_v0 = vmul.f32 %v4471_v7, %v2718_v17  ;;  %v2587_v59 = vsel %vm1286_vm5, %v2585_v45, %v2586_v62 }
 0x348   : > { %v2755_v36 = vmul.f32 %v4471_v7, %v2719_v12 }
 0x349   : > { %v2790_v42 = vadd.f32 %v4477_v44, %v2754_v0  ;;  %v2130_v48 = vpop.f32.mrf.mxu3 }
 0x34a   : > { %v2791_v57 = vadd.f32 %v4477_v44, %v2755_v36  ;;  %2188 = vst.msk [vmem:[#allocation2 + $0x78] sm:$0xff] %vm566_vm1, %v2130_v48 }
 0x34b   : > { %v2822_v13 = vadd.f32 %v3747_v53, %v2790_v42  ;;  %v2512_v38 = vld [vmem:[#allocation2 + $0x60] sm:$0xff]  ;;  %v2264_v60 = vpop.f32.mrf.mxu0 }
 0x34c   : > { %v2823_v39 = vadd.f32 %v3749_v54, %v2791_v57  ;;  %v2513_v30 = vld [vmem:[#allocation2 + $0x68] sm:$0x7f]  ;;  %v2656_v14 = vadd.f32 %v2584_v58, %v2512_v38  ;;  %v4672_v49 = vpop.f32.mrf.mxu1 }
 0x34d   : > { %v2854_v18 = vmax.f32 %v2822_v13, 0.0  ;;  %v2657_v20 = vadd.f32 %v2583_v24, %v2513_v30  ;;  %v2588_v36 = vrot.slane %v4672_v49, 1 }
 0x34e   : > { %v2855_v43 = vmax.f32 %v2823_v39, 0.0  ;;  %2688 = vst.msk [vmem:[#allocation2 + $0x60] sm:$0xff] %vm566_vm1, %v2656_v14 }
 0x34f   : > { %2886 = vst.msk [vmem:[%s4501_s29 + $0x50] sm:$0xff] %vm566_vm1, %v2854_v18 }
 0x350   : > { %2887 = vst.msk [vmem:[%s4501_s29 + $0x58] sm:$0xff] %vm566_vm1, %v2855_v43 }
 0x351   : > { %2689 = vst.msk [vmem:[#allocation2 + $0x68] sm:$0x7f] %vm1090_vm4, %v2657_v20  ;;  %v2318_v53 = vld [vmem:[#allocation2 + $0x71] sm:$0xff]  ;;  %v2319_v31 = vld [vmem:[#allocation2 + $0x79] sm:$0x7f]  ;;  %v2133_v19 = vpop.f32.mrf.mxu3 }
 0x352   : > { %v2350_v11 = vadd.f32 %v2318_v53, %v2259_v15  ;;  %v2351_v54 = vadd.f32 %v2319_v31, %v2261_v34  ;;  %2189 = vst.msk [vmem:[#allocation2 + $0x80] sm:$0xff] %vm566_vm1, %v2133_v19 }
 0x353   : > { %v2266_v27 = vpop.f32.mrf.mxu0 }
 0x354   : > { %2382 = vst.msk [vmem:[#allocation2 + $0x71] sm:$0xff] %vm566_vm1, %v2350_v11  ;;  %v2462_v9 = vpop.f32.mrf.mxu1 }
 0x355   : > { %v2720_v61 = vld [vmem:[#allocation2 + $0x60] sm:$0xff]  ;;  %2383 = vst.msk [vmem:[#allocation2 + $0x79] sm:$0x7f] %vm1090_vm4, %v2351_v54  ;;  %v2589_v12 = vrot.slane %v2462_v9, 1 }
 0x356   : > { %v2756_v25 = vmul.f32 %v4471_v7, %v2720_v61 }
 0x357   : > { %v2590_v57 = vsel %vm1286_vm5, %v2588_v36, %v2589_v12 }
 0x358   : > { %v2721_v47 = vld [vmem:[#allocation2 + $0x68] sm:$0xff]  ;;  %v2792_v32 = vadd.f32 %v4477_v44, %v2756_v25 }
 0x359   : > { %v2757_v55 = vmul.f32 %v4471_v7, %v2721_v47  ;;  %v2135_v40 = vpop.f32.mrf.mxu3 }
 0x35a   : > { %v2824_v35 = vadd.f32 %v3774_v26, %v2792_v32  ;;  %2190 = vst.msk [vmem:[#allocation2 + $0x88] sm:$0xff] %vm566_vm1, %v2135_v40 }
 0x35b   : > { %v2793_v1 = vadd.f32 %v4477_v44, %v2757_v55  ;;  %v2514_v15 = vld [vmem:[#allocation2 + $0x70] sm:$0xff]  ;;  %v2269_v8 = vpop.f32.mrf.mxu0 }
 0x35c   : > { %v2856_v46 = vmax.f32 %v2824_v35, 0.0  ;;  %v2515_v29 = vld [vmem:[#allocation2 + $0x78] sm:$0x7f]  ;;  %v2658_v50 = vadd.f32 %v2587_v59, %v2514_v15  ;;  %v4691_v41 = vpop.f32.mrf.mxu1 }
 0x35d   : > { %v2825_v23 = vadd.f32 %v3776_v28, %v2793_v1  ;;  %v2659_v56 = vadd.f32 %v2586_v62, %v2515_v29  ;;  %v2591_v62 = vrot.slane %v4691_v41, 1 }
 0x35e   : > { %2888 = vst.msk [vmem:[%s4501_s29 + $0x60] sm:$0xff] %vm566_vm1, %v2856_v46 }
 0x35f   : > { %v2857_v26 = vmax.f32 %v2825_v23, 0.0  ;;  %2690 = vst.msk [vmem:[#allocation2 + $0x70] sm:$0xff] %vm566_vm1, %v2658_v50 }
 0x360   : > { %2691 = vst.msk [vmem:[#allocation2 + $0x78] sm:$0x7f] %vm1090_vm4, %v2659_v56 }
 0x361   : > { %2889 = vst.msk [vmem:[%s4501_s29 + $0x68] sm:$0xff] %vm566_vm1, %v2857_v26  ;;  %v2320_v51 = vld [vmem:[#allocation2 + $0x81] sm:$0xff]  ;;  %v2321_v33 = vld [vmem:[#allocation2 + $0x89] sm:$0x7f]  ;;  %v2138_v37 = vpop.f32.mrf.mxu3 }
 0x362   : > { %v2352_v52 = vadd.f32 %v2320_v51, %v2264_v60  ;;  %v2353_v63 = vadd.f32 %v2321_v33, %v2266_v27  ;;  %2191 = vst.msk [vmem:[#allocation2 + $0x90] sm:$0xff] %vm566_vm1, %v2138_v37 }
 0x363   : > { %v2271_v22 = vpop.f32.mrf.mxu0 }
 0x364   : > { %2384 = vst.msk [vmem:[#allocation2 + $0x81] sm:$0xff] %vm566_vm1, %v2352_v52  ;;  %v2467_v28 = vpop.f32.mrf.mxu1 }
 0x365   : > { %2385 = vst.msk [vmem:[#allocation2 + $0x89] sm:$0x7f] %vm1090_vm4, %v2353_v63  ;;  %v2592_v27 = vrot.slane %v2467_v28, 1 }
 0x366   : > { %v2722_v34 = vld [vmem:[#allocation2 + $0x70] sm:$0xff] }
 0x367   : > { %v2723_v16 = vld [vmem:[#allocation2 + $0x78] sm:$0xff]  ;;  %v2758_v17 = vmul.f32 %v4471_v7, %v2722_v34  ;;  %v2593_v45 = vsel %vm1286_vm5, %v2591_v62, %v2592_v27 }
 0x368   : > { %v2759_v0 = vmul.f32 %v4471_v7, %v2723_v16 }
 0x369   : > { %v2794_v24 = vadd.f32 %v4477_v44, %v2758_v17  ;;  %v2140_v42 = vpop.f32.mrf.mxu3 }
 0x36a   : > { %v2795_v21 = vadd.f32 %v4477_v44, %v2759_v0  ;;  %2192 = vst.msk [vmem:[#allocation2 + $0x98] sm:$0xff] %vm566_vm1, %v2140_v42 }
 0x36b   : > { %v2826_v48 = vadd.f32 %v3720_v2, %v2794_v24  ;;  %v2516_v13 = vld [vmem:[#allocation2 + $0x80] sm:$0xff]  ;;  %v2274_v58 = vpop.f32.mrf.mxu0 }
 0x36c   : > { %v2827_v38 = vadd.f32 %v3722_v10, %v2795_v21  ;;  %v2517_v60 = vld [vmem:[#allocation2 + $0x88] sm:$0x7f]  ;;  %v2660_v39 = vadd.f32 %v2590_v57, %v2516_v13  ;;  %v4712_v30 = vpop.f32.mrf.mxu1 }
 0x36d   : > { %v2858_v14 = vmax.f32 %v2826_v48, 0.0  ;;  %v2661_v49 = vadd.f32 %v2589_v12, %v2517_v60  ;;  %v2594_v34 = vrot.slane %v4712_v30, 1 }
 0x36e   : > { %v2859_v18 = vmax.f32 %v2827_v38, 0.0  ;;  %2692 = vst.msk [vmem:[#allocation2 + $0x80] sm:$0xff] %vm566_vm1, %v2660_v39 }
 0x36f   : > { %2890 = vst.msk [vmem:[%s4501_s29 + $0x70] sm:$0xff] %vm566_vm1, %v2858_v14 }
 0x370   : > { %2891 = vst.msk [vmem:[%s4501_s29 + $0x78] sm:$0xff] %vm566_vm1, %v2859_v18 }
 0x371   : > { %2693 = vst.msk [vmem:[#allocation2 + $0x88] sm:$0x7f] %vm1090_vm4, %v2661_v49  ;;  %v2322_v2 = vld [vmem:[#allocation2 + $0x91] sm:$0xff]  ;;  %v2323_v20 = vld [vmem:[#allocation2 + $0x99] sm:$0x7f]  ;;  %v2143_v43 = vpop.f32.mrf.mxu3 }
 0x372   : > { %v2354_v53 = vadd.f32 %v2322_v2, %v2269_v8  ;;  %v2355_v10 = vadd.f32 %v2323_v20, %v2271_v22  ;;  %2193 = vst.msk [vmem:[#allocation2 + $0xa0] sm:$0xff] %vm566_vm1, %v2143_v43 }
 0x373   : > { %v2276_v31 = vpop.f32.mrf.mxu0 }
 0x374   : > { %2386 = vst.msk [vmem:[#allocation2 + $0x91] sm:$0xff] %vm566_vm1, %v2354_v53  ;;  %v2472_v19 = vpop.f32.mrf.mxu1 }
 0x375   : > { %v2724_v11 = vld [vmem:[#allocation2 + $0x80] sm:$0xff]  ;;  %2387 = vst.msk [vmem:[#allocation2 + $0x99] sm:$0x7f] %vm1090_vm4, %v2355_v10  ;;  %v2595_v63 = vrot.slane %v2472_v19, 1 }
 0x376   : > { %v2760_v54 = vmul.f32 %v4471_v7, %v2724_v11  ;;  %v4900_v19 = vld [vmem:[#allocation4_spill] sm:$0xff] }
 0x377   : > { %v2596_v0 = vsel %vm1286_vm5, %v2594_v34, %v2595_v63 }
 0x378   : > { %v2725_v9 = vld [vmem:[#allocation2 + $0x88] sm:$0xff]  ;;  %v2796_v61 = vadd.f32 %v4477_v44, %v2760_v54 }
 0x379   : > { %v2761_v25 = vmul.f32 %v4471_v7, %v2725_v9  ;;  %v2145_v47 = vpop.f32.mrf.mxu3 }
 0x37a   : > { %v2828_v32 = vadd.f32 %v3590_v3, %v2796_v61  ;;  %2194 = vst.msk [vmem:[#allocation2 + $0xa8] sm:$0xff] %vm566_vm1, %v2145_v47 }
 0x37b   : > { %v2797_v55 = vadd.f32 %v4477_v44, %v2761_v25  ;;  %v2518_v40 = vld [vmem:[#allocation2 + $0x90] sm:$0xff]  ;;  %v2279_v35 = vpop.f32.mrf.mxu0 }
 0x37c   : > { %v2860_v1 = vmax.f32 %v2828_v32, 0.0  ;;  %v2519_v59 = vld [vmem:[#allocation2 + $0x98] sm:$0x7f]  ;;  %v2662_v15 = vadd.f32 %v2593_v45, %v2518_v40  ;;  %v4731_v8 = vpop.f32.mrf.mxu1  ;;  %v4901_v32 = vld [vmem:[#allocation5_spill] sm:$0xff] }
 0x37d   : > { %v2829_v46 = vadd.f32 %v3592_v4, %v2797_v55  ;;  %v2663_v29 = vadd.f32 %v2592_v27, %v2519_v59  ;;  %v2597_v10 = vrot.slane %v4731_v8, 1 }
 0x37e   : > { %2892 = vst.msk [vmem:[%s4501_s29 + $0x80] sm:$0xff] %vm566_vm1, %v2860_v1 }
 0x37f   : > { %v2861_v3 = vmax.f32 %v2829_v46, 0.0  ;;  %2694 = vst.msk [vmem:[#allocation2 + $0x90] sm:$0xff] %vm566_vm1, %v2662_v15 }
 0x380   : > { %2695 = vst.msk [vmem:[#allocation2 + $0x98] sm:$0x7f] %vm1090_vm4, %v2663_v29 }
 0x381   : > { %2893 = vst.msk [vmem:[%s4501_s29 + $0x88] sm:$0xff] %vm566_vm1, %v2861_v3  ;;  %v2324_v50 = vld [vmem:[#allocation2 + $0xa1] sm:$0xff]  ;;  %v2325_v41 = vld [vmem:[#allocation2 + $0xa9] sm:$0x7f]  ;;  %v2148_v23 = vpop.f32.mrf.mxu3 }
 0x382   : > { %v2356_v56 = vadd.f32 %v2324_v50, %v2274_v58  ;;  %v2357_v26 = vadd.f32 %v2325_v41, %v2276_v31  ;;  %2195 = vst.msk [vmem:[#allocation2 + $0xb0] sm:$0xff] %vm566_vm1, %v2148_v23 }
 0x383   : > { %v2281_v51 = vpop.f32.mrf.mxu0 }
 0x384   : > { %2388 = vst.msk [vmem:[#allocation2 + $0xa1] sm:$0xff] %vm566_vm1, %v2356_v56  ;;  %v2477_v4 = vpop.f32.mrf.mxu1 }
 0x385   : > { %2389 = vst.msk [vmem:[#allocation2 + $0xa9] sm:$0x7f] %vm1090_vm4, %v2357_v26  ;;  %v2598_v2 = vrot.slane %v2477_v4, 1 }
 0x386   : > { %v2726_v33 = vld [vmem:[#allocation2 + $0x90] sm:$0xff] }
 0x387   : > { %v2727_v37 = vld [vmem:[#allocation2 + $0x98] sm:$0xff]  ;;  %v2762_v52 = vmul.f32 %v4471_v7, %v2726_v33  ;;  %v2599_v9 = vsel %vm1286_vm5, %v2597_v10, %v2598_v2  ;;  %v4904_v10 = vld [vmem:[#allocation8_spill] sm:$0xff] }
 0x388   : > { %v2763_v22 = vmul.f32 %v4471_v7, %v2727_v37 }
 0x389   : > { %v2798_v28 = vadd.f32 %v4477_v44, %v2762_v52  ;;  %v2150_v16 = vpop.f32.mrf.mxu3  ;;  %v4902_v52 = vld [vmem:[#allocation6_spill] sm:$0xff] }
 0x38a   : > { %v2799_v17 = vadd.f32 %v4477_v44, %v2763_v22  ;;  %2196 = vst.msk [vmem:[#allocation2 + $0xb8] sm:$0xff] %vm566_vm1, %v2150_v16  ;;  %v4903_v22 = vld [vmem:[#allocation7_spill] sm:$0xff] }
 0x38b   : > { %v2830_v12 = vadd.f32 %v3594_v5, %v2798_v28  ;;  %v2520_v24 = vld [vmem:[#allocation2 + $0xa0] sm:$0xff]  ;;  %v2284_v48 = vpop.f32.mrf.mxu0 }
 0x38c   : > { %v2831_v36 = vadd.f32 %v3596_v6, %v2799_v17  ;;  %v2521_v42 = vld [vmem:[#allocation2 + $0xa8] sm:$0x7f]  ;;  %v2664_v21 = vadd.f32 %v2596_v0, %v2520_v24  ;;  %v2480_v38 = vpop.f32.mrf.mxu1 }
 0x38d   : > { %v2862_v57 = vmax.f32 %v2830_v12, 0.0  ;;  %v2665_v13 = vadd.f32 %v2595_v63, %v2521_v42  ;;  %v2600_v4 = vrot.slane %v2480_v38, 1 }
 0x38e   : > { %v2863_v58 = vmax.f32 %v2831_v36, 0.0  ;;  %2696 = vst.msk [vmem:[#allocation2 + $0xa0] sm:$0xff] %vm566_vm1, %v2664_v21 }
 0x38f   : > { %2894 = vst.msk [vmem:[%s4501_s29 + $0x90] sm:$0xff] %vm566_vm1, %v2862_v57 }
 0x390   : > { %2895 = vst.msk [vmem:[%s4501_s29 + $0x98] sm:$0xff] %vm566_vm1, %v2863_v58 }
 0x391   : > { %2697 = vst.msk [vmem:[#allocation2 + $0xa8] sm:$0x7f] %vm1090_vm4, %v2665_v13  ;;  %v2326_v5 = vld [vmem:[#allocation2 + $0xb1] sm:$0xff]  ;;  %v2327_v60 = vld [vmem:[#allocation2 + $0xb9] sm:$0x7f]  ;;  %v2153_v6 = vpop.f32.mrf.mxu3 }
 0x392   : > { %v2358_v39 = vadd.f32 %v2326_v5, %v2279_v35  ;;  %v2359_v30 = vadd.f32 %v2327_v60, %v2281_v51  ;;  %2197 = vst.msk [vmem:[#allocation2 + $0xc0] sm:$0xff] %vm566_vm1, %v2153_v6 }
 0x393   : > { %v2286_v18 = vpop.f32.mrf.mxu0 }
 0x394   : > { %2390 = vst.msk [vmem:[#allocation2 + $0xb1] sm:$0xff] %vm566_vm1, %v2358_v39  ;;  %v2482_v31 = vpop.f32.mrf.mxu1  ;;  %v4799_v39 = vld [vmem:[%s4872_s5] ss:$0 sm:$0xff] }
 0x395   : > { %v2728_v14 = vld [vmem:[#allocation2 + $0xa0] sm:$0xff]  ;;  %2391 = vst.msk [vmem:[#allocation2 + $0xb9] sm:$0x7f] %vm1090_vm4, %v2359_v30  ;;  %v2601_v56 = vrot.slane %v2482_v31, 1 }
 0x396   : > { %v2764_v49 = vmul.f32 %v4471_v7, %v2728_v14 }
 0x397   : > { %v2602_v34 = vsel %vm1286_vm5, %v2600_v4, %v2601_v56  ;;  %v4907_v4 = vld [vmem:[#allocation11_spill] sm:$0xff] }
 0x398   : > { %v2729_v20 = vld [vmem:[#allocation2 + $0xa8] sm:$0xff]  ;;  %v2800_v43 = vadd.f32 %v4477_v44, %v2764_v49 }
 0x399   : > { %v2765_v53 = vmul.f32 %v4471_v7, %v2729_v20  ;;  %v2155_v54 = vpop.f32.mrf.mxu3 }
 0x39a   : > { %v2832_v11 = vadd.f32 %v4900_v19, %v2800_v43  ;;  %2198 = vst.msk [vmem:[#allocation2 + $0xc8] sm:$0xff] %vm566_vm1, %v2155_v54  ;;  %v4905_v54 = vld [vmem:[#allocation9_spill] sm:$0xff] }
 0x39b   : > { %v2801_v27 = vadd.f32 %v4477_v44, %v2765_v53  ;;  %v2522_v61 = vld [vmem:[#allocation2 + $0xb0] sm:$0xff]  ;;  %v2289_v35 = vpop.f32.mrf.mxu0 }
 0x39c   : > { %v2864_v25 = vmax.f32 %v2832_v11, 0.0  ;;  %v2523_v62 = vld [vmem:[#allocation2 + $0xb8] sm:$0x7f]  ;;  %v2666_v47 = vadd.f32 %v2599_v9, %v2522_v61  ;;  %v2485_v29 = vpop.f32.mrf.mxu1 }
 0x39d   : > { %v2833_v55 = vadd.f32 %v4901_v32, %v2801_v27  ;;  %v2667_v45 = vadd.f32 %v2598_v2, %v2523_v62  ;;  %v2603_v14 = vrot.slane %v2485_v29, 1 }
 0x39e   : > { %2896 = vst.msk [vmem:[%s4501_s29 + $0xa0] sm:$0xff] %vm566_vm1, %v2864_v25 }
 0x39f   : > { %v2865_v40 = vmax.f32 %v2833_v55, 0.0  ;;  %2698 = vst.msk [vmem:[#allocation2 + $0xb0] sm:$0xff] %vm566_vm1, %v2666_v47 }
 0x3a0   : > { %2699 = vst.msk [vmem:[#allocation2 + $0xb8] sm:$0x7f] %vm1090_vm4, %v2667_v45 }
 0x3a1   : > { %2897 = vst.msk [vmem:[%s4501_s29 + $0xa8] sm:$0xff] %vm566_vm1, %v2865_v40  ;;  %v2328_v1 = vld [vmem:[#allocation2 + $0xc1] sm:$0xff]  ;;  %v2329_v59 = vld [vmem:[#allocation2 + $0xc9] sm:$0x7f]  ;;  %v2158_v15 = vpop.f32.mrf.mxu3 }
 0x3a2   : > { %v2360_v8 = vadd.f32 %v2328_v1, %v2284_v48  ;;  %v2361_v46 = vadd.f32 %v2329_v59, %v2286_v18  ;;  %2199 = vst.msk [vmem:[#allocation2 + $0xd0] sm:$0xff] %vm566_vm1, %v2158_v15  ;;  %v4806_v18 = vld [vmem:[%s4873_s6] ss:$0 sm:$0xff] }
 0x3a3   : > { %v2291_v33 = vpop.f32.mrf.mxu0 }
 0x3a4   : > { %2392 = vst.msk [vmem:[#allocation2 + $0xc1] sm:$0xff] %vm566_vm1, %v2360_v8  ;;  %v2487_v0 = vpop.f32.mrf.mxu1 }
 0x3a5   : > { %2393 = vst.msk [vmem:[#allocation2 + $0xc9] sm:$0x7f] %vm1090_vm4, %v2361_v46  ;;  %v2604_v5 = vrot.slane %v2487_v0, 1 }
 0x3a6   : > { %v2730_v3 = vld [vmem:[#allocation2 + $0xb0] sm:$0xff] }
 0x3a7   : > { %v2731_v50 = vld [vmem:[#allocation2 + $0xb8] sm:$0xff]  ;;  %v2766_v41 = vmul.f32 %v4471_v7, %v2730_v3  ;;  %v2605_v43 = vsel %vm1286_vm5, %v2603_v14, %v2604_v5 }
 0x3a8   : > { %v2767_v23 = vmul.f32 %v4471_v7, %v2731_v50 }
 0x3a9   : > { %v2802_v26 = vadd.f32 %v4477_v44, %v2766_v41  ;;  %v2160_v37 = vpop.f32.mrf.mxu3 }
 0x3aa   : > { %v2803_v51 = vadd.f32 %v4477_v44, %v2767_v23  ;;  %2200 = vst.msk [vmem:[#allocation2 + $0xd8] sm:$0xff] %vm566_vm1, %v2160_v37 }
 0x3ab   : > { %v2834_v63 = vadd.f32 %v4902_v52, %v2802_v26  ;;  %v2524_v16 = vld [vmem:[#allocation2 + $0xc0] sm:$0xff]  ;;  %v2294_v13 = vpop.f32.mrf.mxu0 }
 0x3ac   : > { %v2835_v28 = vadd.f32 %v4903_v22, %v2803_v51  ;;  %v2525_v17 = vld [vmem:[#allocation2 + $0xc8] sm:$0x7f]  ;;  %v2668_v12 = vadd.f32 %v2602_v34, %v2524_v16  ;;  %v2490_v58 = vpop.f32.mrf.mxu1 }
 0x3ad   : > { %v2866_v7 = vmax.f32 %v2834_v63, 0.0  ;;  %v2669_v36 = vadd.f32 %v2601_v56, %v2525_v17  ;;  %v2606_v41 = vrot.slane %v2490_v58, 1  ;;  %v4906_v56 = vld [vmem:[#allocation10_spill] sm:$0xff] }
 0x3ae   : > { %v2867_v24 = vmax.f32 %v2835_v28, 0.0  ;;  %2700 = vst.msk [vmem:[#allocation2 + $0xc0] sm:$0xff] %vm566_vm1, %v2668_v12 }
 0x3af   : > { %2898 = vst.msk [vmem:[%s4501_s29 + $0xb0] sm:$0xff] %vm566_vm1, %v2866_v7 }
 0x3b0   : > { %2899 = vst.msk [vmem:[%s4501_s29 + $0xb8] sm:$0xff] %vm566_vm1, %v2867_v24 }
 0x3b1   : > { %2701 = vst.msk [vmem:[#allocation2 + $0xc8] sm:$0x7f] %vm1090_vm4, %v2669_v36  ;;  %v2330_v44 = vld [vmem:[#allocation2 + $0xd1] sm:$0xff]  ;;  %v2331_v42 = vld [vmem:[#allocation2 + $0xd9] sm:$0x7f]  ;;  %v2163_v21 = vpop.f32.mrf.mxu3 }
 0x3b2   : > { %v2362_v48 = vadd.f32 %v2330_v44, %v2289_v35  ;;  %v2363_v57 = vadd.f32 %v2331_v42, %v2291_v33  ;;  %2201 = vst.msk [vmem:[#allocation2 + $0xe0] sm:$0xff] %vm566_vm1, %v2163_v21 }
 0x3b3   : > { %v2296_v61 = vpop.f32.mrf.mxu0 }
 0x3b4   : > { %2394 = vst.msk [vmem:[#allocation2 + $0xd1] sm:$0xff] %vm566_vm1, %v2362_v48  ;;  %v2492_v47 = vpop.f32.mrf.mxu1 }
 0x3b5   : > { %2395 = vst.msk [vmem:[#allocation2 + $0xd9] sm:$0x7f] %vm1090_vm4, %v2363_v57  ;;  %v2732_v38 = vld [vmem:[#allocation2 + $0xc0] sm:$0xff]  ;;  %v2607_v46 = vrot.slane %v2492_v47, 1 }
 0x3b6   : > { %v2768_v30 = vmul.f32 %v4799_v39, %v2732_v38 }
 0x3b7   : > { %v2608_v37 = vsel %vm1286_vm5, %v2606_v41, %v2607_v46 }
 0x3b8   : > { %v2733_v60 = vld [vmem:[#allocation2 + $0xc8] sm:$0xff]  ;;  %v2804_v2 = vadd.f32 %v4806_v18, %v2768_v30  ;;  %v4908_v30 = vld [vmem:[#allocation12_spill] sm:$0xff] }
 0x3b9   : > { %v2769_v6 = vmul.f32 %v4799_v39, %v2733_v60  ;;  %v2165_v49 = vpop.f32.mrf.mxu3 }
 0x3ba   : > { %2202 = vst.msk [vmem:[#allocation2 + $0xe8] sm:$0xff] %vm566_vm1, %v2165_v49  ;;  %v2836_v31 = vadd.f32 %v4904_v10, %v2804_v2  ;;  %v4909_v2 = vld [vmem:[#allocation13_spill] sm:$0xff] }
 0x3bb   : > { %v2805_v20 = vadd.f32 %v4806_v18, %v2769_v6  ;;  %v2526_v53 = vld [vmem:[#allocation2 + $0xd0] sm:$0xff]  ;;  %v2299_v29 = vpop.f32.mrf.mxu0 }
 0x3bc   : > { %v2527_v19 = vld [vmem:[#allocation2 + $0xd8] sm:$0x7f]  ;;  %v2670_v11 = vadd.f32 %v2605_v43, %v2526_v53  ;;  %v2868_v25 = vmax.f32 %v2836_v31, 0.0  ;;  %v2495_v51 = vpop.f32.mrf.mxu1 }
 0x3bd   : > { %v2837_v27 = vadd.f32 %v4905_v54, %v2805_v20  ;;  %v2671_v9 = vadd.f32 %v2604_v5, %v2527_v19 }
 0x3be   : > { %2702 = vst.msk [vmem:[#allocation2 + $0xd0] sm:$0xff] %vm566_vm1, %v2670_v11 }
 0x3bf   : > { %v2869_v62 = vmax.f32 %v2837_v27, 0.0  ;;  %2703 = vst.msk [vmem:[#allocation2 + $0xd8] sm:$0x7f] %vm1090_vm4, %v2671_v9 }
 0x3c0   : > { %2900 = vst.msk [vmem:[%s4501_s29 + $0xc0] sm:$0xff] %vm566_vm1, %v2868_v25 }
 0x3c1   : > { %2901 = vst.msk [vmem:[%s4501_s29 + $0xc8] sm:$0xff] %vm566_vm1, %v2869_v62  ;;  %v2332_v32 = vld [vmem:[#allocation2 + $0xe1] sm:$0xff]  ;;  %v2333_v55 = vld [vmem:[#allocation2 + $0xe9] sm:$0x7f]  ;;  %v2168_v45 = vpop.f32.mrf.mxu3 }
 0x3c2   : > { %v2364_v40 = vadd.f32 %v2332_v32, %v2294_v13  ;;  %v2365_v35 = vadd.f32 %v2333_v55, %v2296_v61  ;;  %2203 = vst.msk [vmem:[#allocation2 + $0xf0] sm:$0xff] %vm566_vm1, %v2168_v45  ;;  %v2609_v13 = vrot.slane %v2495_v51, 1  ;;  %v4910_v61 = vld [vmem:[#allocation14_spill] sm:$0xff] }
 0x3c3   : > { %v2301_v7 = vpop.f32.mrf.mxu0  ;;  %v4911_v25 = vunpack.c.l.bf16 %v4910_v61  ;;  %v4912_v47 = vunpack.c.h.bf16 %v4910_v61 }
 0x3c4   : > { %2396 = vst.msk [vmem:[#allocation2 + $0xe1] sm:$0xff] %vm566_vm1, %v2364_v40  ;;  %v2497_v36 = vpop.f32.mrf.mxu1 }
 0x3c5   : > { %v2734_v1 = vld [vmem:[#allocation2 + $0xd0] sm:$0xff]  ;;  %2397 = vst.msk [vmem:[#allocation2 + $0xe9] sm:$0x7f] %vm1090_vm4, %v2365_v35  ;;  %v2610_v42 = vrot.slane %v2497_v36, 1 }
 0x3c6   : > { %v2735_v59 = vld [vmem:[#allocation2 + $0xd8] sm:$0xff]  ;;  %v2770_v15 = vmul.f32 %v4799_v39, %v2734_v1 }
 0x3c7   : > { %v2771_v8 = vmul.f32 %v4799_v39, %v2735_v59  ;;  %v2611_v5 = vsel %vm1286_vm5, %v2609_v13, %v2610_v42 }
 0x3c8   : > { %v2806_v3 = vadd.f32 %v4806_v18, %v2770_v15 }
 0x3c9   : > { %v2807_v50 = vadd.f32 %v4806_v18, %v2771_v8  ;;  %v2170_v23 = vpop.f32.mrf.mxu3 }
 0x3ca   : > { %v2838_v26 = vadd.f32 %v4906_v56, %v2806_v3  ;;  %2204 = vst.msk [vmem:[#allocation2 + $0xf8] sm:$0xff] %vm566_vm1, %v2170_v23 }
 0x3cb   : > { %v2839_v33 = vadd.f32 %v4907_v4, %v2807_v50  ;;  %v2528_v52 = vld [vmem:[#allocation2 + $0xe0] sm:$0xff] }
 0x3cc   : > { %v2870_v63 = vmax.f32 %v2838_v26, 0.0  ;;  %v2529_v22 = vld [vmem:[#allocation2 + $0xe8] sm:$0x7f]  ;;  %v2672_v28 = vadd.f32 %v2608_v37, %v2528_v52 }
 0x3cd   : > { %v2871_v34 = vmax.f32 %v2839_v33, 0.0  ;;  %v2673_v16 = vadd.f32 %v2607_v46, %v2529_v22 }
 0x3ce   : > { %2902 = vst.msk [vmem:[%s4501_s29 + $0xd0] sm:$0xff] %vm566_vm1, %v2870_v63 }
 0x3cf   : > { %2903 = vst.msk [vmem:[%s4501_s29 + $0xd8] sm:$0xff] %vm566_vm1, %v2871_v34 }
 0x3d0   : > { %2704 = vst.msk [vmem:[#allocation2 + $0xe0] sm:$0xff] %vm566_vm1, %v2672_v28 }
 0x3d1   : > { %2705 = vst.msk [vmem:[#allocation2 + $0xe8] sm:$0x7f] %vm1090_vm4, %v2673_v16  ;;  %v2334_v17 = vld [vmem:[#allocation2 + $0xf1] sm:$0xff]  ;;  %v2335_v12 = vld [vmem:[#allocation2 + $0xf9] sm:$0x7f] }
 0x3d2   : > { %v2366_v0 = vadd.f32 %v2334_v17, %v2299_v29  ;;  %v2367_v24 = vadd.f32 %v2335_v12, %v2301_v7 }
 0x3d4   : > { %2398 = vst.msk [vmem:[#allocation2 + $0xf1] sm:$0xff] %vm566_vm1, %v2366_v0 }
 0x3d5   : > { %2399 = vst.msk [vmem:[#allocation2 + $0xf9] sm:$0x7f] %vm1090_vm4, %v2367_v24 }
 0x3d7   : > { %v2736_v44 = vld [vmem:[#allocation2 + $0xe0] sm:$0xff] }
 0x3d8   : > { %v2737_v21 = vld [vmem:[#allocation2 + $0xe8] sm:$0xff]  ;;  %v2772_v48 = vmul.f32 %v4799_v39, %v2736_v44 }
 0x3d9   : > { %v2773_v57 = vmul.f32 %v4799_v39, %v2737_v21 }
 0x3da   : > { %v2808_v58 = vadd.f32 %v4806_v18, %v2772_v48 }
 0x3db   : > { %v2809_v38 = vadd.f32 %v4806_v18, %v2773_v57  ;;  %v2530_v60 = vld [vmem:[#allocation2 + $0xf0] sm:$0xff] }
 0x3dc   : > { %v2840_v6 = vadd.f32 %v4908_v30, %v2808_v58  ;;  %v2531_v14 = vld [vmem:[#allocation2 + $0xf8] sm:$0x7f]  ;;  %v2674_v49 = vadd.f32 %v2611_v5, %v2530_v60 }
 0x3dd   : > { %v2841_v20 = vadd.f32 %v4909_v2, %v2809_v38  ;;  %v2675_v43 = vadd.f32 %v2610_v42, %v2531_v14 }
 0x3de   : > { %v2872_v53 = vmax.f32 %v2840_v6, 0.0  ;;  %2706 = vst.msk [vmem:[#allocation2 + $0xf0] sm:$0xff] %vm566_vm1, %v2674_v49 }
 0x3df   : > { %v2873_v10 = vmax.f32 %v2841_v20, 0.0  ;;  %2707 = vst.msk [vmem:[#allocation2 + $0xf8] sm:$0x7f] %vm1090_vm4, %v2675_v43 }
 0x3e0   : > { %2904 = vst.msk [vmem:[%s4501_s29 + $0xe0] sm:$0xff] %vm566_vm1, %v2872_v53 }
 0x3e1   : > { %2905 = vst.msk [vmem:[%s4501_s29 + $0xe8] sm:$0xff] %vm566_vm1, %v2873_v10 }
 0x3e5   : > { %v2738_v31 = vld [vmem:[#allocation2 + $0xf0] sm:$0xff] }
 0x3e6   : > { %v2739_v19 = vld [vmem:[#allocation2 + $0xf8] sm:$0xff]  ;;  %v2774_v11 = vmul.f32 %v4799_v39, %v2738_v31 }
 0x3e7   : > { %v2775_v54 = vmul.f32 %v4799_v39, %v2739_v19 }
 0x3e8   : > { %v2810_v27 = vadd.f32 %v4806_v18, %v2774_v11 }
 0x3e9   : > { %v2811_v9 = vadd.f32 %v4806_v18, %v2775_v54 }
 0x3ea   : > { %v2842_v62 = vadd.f32 %v4911_v25, %v2810_v27 }
 0x3eb   : > { %v2843_v32 = vadd.f32 %v4912_v47, %v2811_v9 }
 0x3ec   : > { %v2874_v55 = vmax.f32 %v2842_v62, 0.0 }
 0x3ed   : > { %v2875_v45 = vmax.f32 %v2843_v32, 0.0 }
 0x3ee   : > { %2906 = vst.msk [vmem:[%s4501_s29 + $0xf0] sm:$0xff] %vm566_vm1, %v2874_v55 }
 0x3ef   : > { %2907 = vst.msk [vmem:[%s4501_s29 + $0xf8] sm:$0xff] %vm566_vm1, %v2875_v45 }
 0x3f0 PF: > { %s17_s24 = sadd.s32 1, %s3526_s24  }
 0x3f1   : > { %p14_p4 = scmp.ge.s32.totalorder %s17_s24, 4  }
 0x3f3   :  { %16 = sbr.rel (!%p14_p4) target bundleno = 1 (0x1), region = 82 }

</bundles_post_ra>
